<compile_context>
chip_gen: v5e
topology: v5e:2x2
jax: 0.10.0
libtpu: 0.0.40
codegen_flags: <defaults>
</compile_context>

<pallas_src>
import functools
import math

import jax
import jax.numpy as jnp
from jax.experimental import pallas as pl
from jax.experimental.pallas import tpu as pltpu


NEG_INF = -1e10


# ----------------------------------------------------------------------------
# In-kernel helpers
# ----------------------------------------------------------------------------
def _mab_heads(Qp, Kp, Vp, bias, wo, bo, *, num_heads, dim_v):
    """Masked multi-head attention block (GraFITi / Set-Transformer MAB):
         A_h = softmax(Q_h K_h^T / sqrt(dim_v) + bias)
         O   = Qp + concat_h(A_h V_h);  O = O + relu(O wo + bo)
    `bias` is the additive mask (0 / NEG_INF), computed once and shared by all
    heads.  Heads are a short unrolled loop over static lane slices."""
    dh = dim_v // num_heads
    scale = 1.0 / math.sqrt(dim_v)            # full-dim scale, as in GraFITi MAB
    Qs = (Qp * scale).astype(jnp.bfloat16)    # scale folded into Q, hoisted
    Kb = Kp.astype(jnp.bfloat16)
    Vb = Vp.astype(jnp.bfloat16)
    outs = []
    # TODO(synk): for medium/large Nq*Nk convert this unrolled head loop into a
    # lax.fori_loop accumulating into scratch to bound live (Nq,Nk) temporaries.
    for h in range(num_heads):
        sl = slice(h * dh, (h + 1) * dh)
        s = jax.lax.dot_general(Qs[:, sl], Kb[:, sl], (((1,), (1,)), ((), ())),
                                preferred_element_type=jnp.float32)   # (Nq, Nk)
        s = s + bias
        m = jnp.max(s, axis=-1, keepdims=True)
        e = jnp.exp(s - m)
        a = e * pl.reciprocal(jnp.sum(e, axis=-1, keepdims=True), approx=True)
        outs.append(jnp.dot(a.astype(jnp.bfloat16), Vb[:, sl],
                            preferred_element_type=jnp.float32))      # (Nq, dh)
    O = Qp + jnp.concatenate(outs, axis=-1)                           # (Nq, K)
    O = O + jnp.maximum(
        jnp.dot(O.astype(jnp.bfloat16), wo, preferred_element_type=jnp.float32)
        + bo, 0.0)
    return O


def _layer_kernel(*refs, num_heads, K, first, with_pred):
    """One fused GraFITi encoder layer (optionally + edge init + read-out):
         [edge init], ct-MAB (channel nodes <- edges),
         tc-MAB (time nodes <- edges), edge MLP with residual,
         [lane-dense output projection written as (1, N)].
    One batch element per grid step.  The batch-invariant one-hot gather
    matrices / mask templates are inputs with a constant index_map (VMEM
    resident across the batch grid); only the observation-mask row varies."""
    refs = list(refs)
    pop = lambda: refs.pop(0)

    t_ref, c_ref = pop(), pop()
    if first:
        x_ref, mt_ref = pop(), pop()
    else:
        u_ref = pop()
    mobs_ref = pop()
    tmpl_t_ref, tmpl_c_ref, rep_t_ref, rep_c_ref = pop(), pop(), pop(), pop()
    if first:
        ei_w0, ei_w1, ei_b = pop(), pop(), pop()
    (wc_all, wt_all, wu_all,
     ct_bq, ct_bkv, ct_wo, ct_bo,
     tc_bq, tc_bkv, tc_wo, tc_bo,
     ew_c, ew_t, e_b) = [pop() for _ in range(14)]
    if with_pred:
        ow_c, ow_t, ow_u, o_b = pop(), pop(), pop(), pop()
    t_out, c_out, u_out = pop(), pop(), pop()
    if with_pred:
        p_out = pop()

    T_emb = t_ref[0]                    # (T, K) f32
    C_emb = c_ref[0]                    # (D, K) f32
    if first:
        # fused edge init: U0 = relu(value * w0 + target_indicator * w1 + b)
        U_emb = jnp.maximum(
            x_ref[0] * ei_w0[...] + mt_ref[0] * ei_w1[...] + ei_b[...], 0.0)
    else:
        U_emb = u_ref[0]                # (N, K) f32

    mrow = mobs_ref[0]                  # (1, N) f32 flattened observation mask
    obs = mrow > 0.0                    # (1, N) bool
    tmpl_t = tmpl_t_ref[...]            # (T, N) bf16 one-hot: time(n) == t
    tmpl_c = tmpl_c_ref[...]            # (D, N) bf16 one-hot: chan(n) == c
    rep_t = rep_t_ref[...]              # (N, T) bf16 (= tmpl_t^T)
    rep_c = rep_c_ref[...]              # (N, D) bf16 (= tmpl_c^T)

    # additive attention bias, computed once per MAB (shared across heads)
    bias_t = jnp.where((tmpl_t > 0) & obs, 0.0, NEG_INF)   # (T, N)
    bias_c = jnp.where((tmpl_c > 0) & obs, 0.0, NEG_INF)   # (D, N)

    T_b = T_emb.astype(jnp.bfloat16)
    C_b = C_emb.astype(jnp.bfloat16)
    U_b = U_emb.astype(jnp.bfloat16)

    # ---- fused projections (one matmul per source tensor) -----------------
    proj_c = jnp.dot(C_b, wc_all[...], preferred_element_type=jnp.float32)  # (D,3K)
    proj_t = jnp.dot(T_b, wt_all[...], preferred_element_type=jnp.float32)  # (T,3K)
    proj_u = jnp.dot(U_b, wu_all[...], preferred_element_type=jnp.float32)  # (N,5K)

    Qp_c = proj_c[:, :K] + ct_bq[...]                 # (D, K)
    kv_c = proj_c[:, K:3 * K].astype(jnp.bfloat16)    # (D, 2K)
    Qp_t = proj_t[:, :K] + tc_bq[...]                 # (T, K)
    kv_t = proj_t[:, K:3 * K].astype(jnp.bfloat16)    # (T, 2K)
    kv_u_ct = proj_u[:, :2 * K]                       # (N, 2K)
    kv_u_tc = proj_u[:, 2 * K:4 * K]                  # (N, 2K)
    e_u = proj_u[:, 4 * K:5 * K]                      # (N, K)

    # ---- ct-MAB: channel nodes attend over their (time, edge) neighbours --
    KVc = (jnp.dot(rep_t, kv_t, preferred_element_type=jnp.float32)
           + kv_u_ct + ct_bkv[...])                                     # (N, 2K)
    C_new = _mab_heads(Qp_c, KVc[:, :K], KVc[:, K:], bias_c,
                       ct_wo[...], ct_bo[...],
                       num_heads=num_heads, dim_v=K)                    # (D, K)

    # ---- tc-MAB: time nodes attend over their (channel, edge) neighbours --
    KVt = (jnp.dot(rep_c, kv_c, preferred_element_type=jnp.float32)
           + kv_u_tc + tc_bkv[...])                                     # (N, 2K)
    T_new = _mab_heads(Qp_t, KVt[:, :K], KVt[:, K:], bias_t,
                       tc_wo[...], tc_bo[...],
                       num_heads=num_heads, dim_v=K)                    # (T, K)

    # ---- edge MLP with residual:  U' = relu([C_g | T_g | U] W + b) + U ----
    e_c = jnp.dot(C_new.astype(jnp.bfloat16), ew_c[...],
                  preferred_element_type=jnp.float32).astype(jnp.bfloat16)
    e_t = jnp.dot(T_new.astype(jnp.bfloat16), ew_t[...],
                  preferred_element_type=jnp.float32).astype(jnp.bfloat16)
    U_new = jnp.maximum(
        jnp.dot(rep_c, e_c, preferred_element_type=jnp.float32)
        + jnp.dot(rep_t, e_t, preferred_element_type=jnp.float32)
        + e_u + e_b[...], 0.0) + U_emb                                  # (N, K)

    t_out[0] = T_new.astype(t_out.dtype)
    c_out[0] = C_new.astype(c_out.dtype)
    u_out[0] = U_new.astype(u_out.dtype)

    if with_pred:
        # fused lane-dense read-out: pred[n] = [C_g|T_g|U'](n) @ ow + ob, (1, N)
        p_u = jax.lax.dot_general(ow_u[...], U_new.astype(jnp.bfloat16),
                                  (((1,), (1,)), ((), ())),
                                  preferred_element_type=jnp.float32)   # (1, N)
        p_t = jax.lax.dot_general(ow_t[...], T_new.astype(jnp.bfloat16),
                                  (((1,), (1,)), ((), ())),
                                  preferred_element_type=jnp.float32)   # (1, T)
        p_c = jax.lax.dot_general(ow_c[...], C_new.astype(jnp.bfloat16),
                                  (((1,), (1,)), ((), ())),
                                  preferred_element_type=jnp.float32)   # (1, D)
        p_out[0] = (p_u
                    + jnp.dot(p_t.astype(jnp.bfloat16), tmpl_t,
                              preferred_element_type=jnp.float32)
                    + jnp.dot(p_c.astype(jnp.bfloat16), tmpl_c,
                              preferred_element_type=jnp.float32)
                    + o_b[...]).astype(p_out.dtype)


# ----------------------------------------------------------------------------
# Pallas wrapper (one fused call per encoder layer)
# ----------------------------------------------------------------------------
def pallas_layer(lp, T_emb, C_emb, edge_in, mask3, tmpl_t, tmpl_c, rep_t, rep_c,
                 edge_init=None, out_proj=None, *, num_heads):
    B, T, K = T_emb.shape
    D = C_emb.shape[1]
    N = T * D
    first = edge_init is not None
    with_pred = out_proj is not None

    # fused per-source weight matrices (bf16, concatenated under jit)
    wc_all = jnp.concatenate([lp["ct"]["wq"], lp["tc"]["wkv_node"]], axis=1)  # (K,3K)
    wt_all = jnp.concatenate([lp["tc"]["wq"], lp["ct"]["wkv_node"]], axis=1)  # (K,3K)
    wu_all = jnp.concatenate([lp["ct"]["wkv_edge"], lp["tc"]["wkv_edge"],
                              lp["edge"]["w_u"]], axis=1)                     # (K,5K)

    operands = [T_emb, C_emb]
    in_specs = [pl.BlockSpec((1, T, K), lambda i: (i, 0, 0)),
                pl.BlockSpec((1, D, K), lambda i: (i, 0, 0))]
    if first:
        x_col, m_col = edge_in
        operands += [x_col, m_col]
        in_specs += [pl.BlockSpec((1, N, 1), lambda i: (i, 0, 0)),
                     pl.BlockSpec((1, N, 1), lambda i: (i, 0, 0))]
    else:
        operands += [edge_in]
        in_specs += [pl.BlockSpec((1, N, K), lambda i: (i, 0, 0))]

    # observation mask row (per-batch) + batch-invariant graph structure
    operands += [mask3, tmpl_t, tmpl_c, rep_t, rep_c]
    in_specs += [pl.BlockSpec((1, 1, N), lambda i: (i, 0, 0)),
                 pl.BlockSpec((T, N), lambda i: (0, 0)),
                 pl.BlockSpec((D, N), lambda i: (0, 0)),
                 pl.BlockSpec((N, T), lambda i: (0, 0)),
                 pl.BlockSpec((N, D), lambda i: (0, 0))]

    weights = []
    if first:
        ew, eb = edge_init
        weights += [ew[0:1, :], ew[1:2, :], eb]
    weights += [wc_all, wt_all, wu_all,
                lp["ct"]["bq"], lp["ct"]["bkv"], lp["ct"]["wo"], lp["ct"]["bo"],
                lp["tc"]["bq"], lp["tc"]["bkv"], lp["tc"]["wo"], lp["tc"]["bo"],
                lp["edge"]["w_c"], lp["edge"]["w_t"], lp["edge"]["b"]]
    if with_pred:
        weights += [out_proj["w_c"], out_proj["w_t"], out_proj["w_u"],
                    out_proj["b"]]
    operands += weights
    in_specs += [pl.BlockSpec(w.shape, lambda i: (0, 0)) for w in weights]

    out_shapes = [jax.ShapeDtypeStruct((B, T, K), jnp.float32),
                  jax.ShapeDtypeStruct((B, D, K), jnp.float32),
                  jax.ShapeDtypeStruct((B, N, K), jnp.float32)]
    out_specs = [pl.BlockSpec((1, T, K), lambda i: (i, 0, 0)),
                 pl.BlockSpec((1, D, K), lambda i: (i, 0, 0)),
                 pl.BlockSpec((1, N, K), lambda i: (i, 0, 0))]
    if with_pred:
        # lane-dense prediction (B, 1, N); reshaped to (B, T, D) in the wrapper
        out_shapes.append(jax.ShapeDtypeStruct((B, 1, N), jnp.float32))
        out_specs.append(pl.BlockSpec((1, 1, N), lambda i: (i, 0, 0)))

    return pl.pallas_call(
        functools.partial(_layer_kernel, num_heads=num_heads, K=K,
                          first=first, with_pred=with_pred),
        out_shape=tuple(out_shapes),
        grid=(B,),
        in_specs=in_specs,
        out_specs=tuple(out_specs),
        compiler_params=pltpu.CompilerParams(
            dimension_semantics=("parallel",),       # shard batch over TCs (v7x)
            vmem_limit_bytes=32 * 1024 * 1024),      # fits v7x 64 MiB/TC budget
    )(*operands)


# ----------------------------------------------------------------------------
# Parameters (deterministic, synthetic init; matmul weights stored in bf16)
# ----------------------------------------------------------------------------
def _init_mat(key, din, dout, dtype=jnp.bfloat16):
    return (jax.random.normal(key, (din, dout), jnp.float32)
            / math.sqrt(din)).astype(dtype)


def _init_mab(key, K):
    k = jax.random.split(key, 4)
    return dict(
        wq=_init_mat(k[0], K, K),
        bq=jnp.zeros((1, K), jnp.float32),
        # fused K|V projection, split by KV source (node half / edge half)
        wkv_node=_init_mat(k[1], K, 2 * K),
        wkv_edge=_init_mat(k[2], K, 2 * K),
        bkv=jnp.zeros((1, 2 * K), jnp.float32),
        wo=_init_mat(k[3], K, K),
        bo=jnp.zeros((1, K), jnp.float32),
    )


def _init_edge(key, K):
    k = jax.random.split(key, 3)
    return dict(w_c=_init_mat(k[0], K, K), w_t=_init_mat(k[1], K, K),
                w_u=_init_mat(k[2], K, K), b=jnp.zeros((1, K), jnp.float32))


def _init_out(key, K):
    k = jax.random.split(key, 3)
    return dict(w_c=_init_mat(k[0], 1, K), w_t=_init_mat(k[1], 1, K),
                w_u=_init_mat(k[2], 1, K), b=jnp.zeros((1, 1), jnp.float32))


def _init_layer(key, K):
    k = jax.random.split(key, 3)
    return dict(ct=_init_mab(k[0], K), tc=_init_mab(k[1], K),
                edge=_init_edge(k[2], K))


def init_params(key, input_dim, imab_dim, n_layers):
    K = imab_dim
    keys = jax.random.split(key, 4 + n_layers)
    return {
        "time_init": (jax.random.normal(keys[0], (1, K), jnp.float32),
                      jnp.zeros((1, K), jnp.float32)),
        "chan_init": (jax.random.normal(keys[1], (input_dim, K), jnp.float32)
                      / math.sqrt(input_dim),
                      jnp.zeros((1, K), jnp.float32)),
        "edge_init": (jax.random.normal(keys[2], (2, K), jnp.float32)
                      / math.sqrt(2.0),
                      jnp.zeros((1, K), jnp.float32)),
        "output": _init_out(keys[3], K),
        "layers": [_init_layer(keys[4 + l], K) for l in range(n_layers)],
    }


# ----------------------------------------------------------------------------
# Encoder (dense GraFITi graph encoder) + GrATiF forward
# ----------------------------------------------------------------------------
def encoder_forward(params, t, X, mask, tgt_vals, tgt_mask, *, num_heads):
    B, T, D = X.shape
    K = params["time_init"][0].shape[1]
    N = T * D
    n_layers = len(params["layers"])
    assert n_layers >= 1

    # node embeddings: tiny batch-parallel glue kept in plain JAX
    tw, tb = params["time_init"]
    T_emb = jnp.sin(t[..., None] * tw + tb)                     # (B, T, K)
    cw, cb = params["chan_init"]
    C_emb = jnp.broadcast_to((cw + cb)[None], (B, D, K))        # (B, D, K)

    # batch-invariant graph structure (edge n = t*D + c), built once, bf16
    tmpl_t = jnp.repeat(jnp.eye(T, dtype=jnp.bfloat16), D, axis=1)   # (T, N)
    tmpl_c = jnp.tile(jnp.eye(D, dtype=jnp.bfloat16), (1, T))        # (D, N)
    rep_t = tmpl_t.T                                                 # (N, T)
    rep_c = tmpl_c.T                                                 # (N, D)

    mask3 = mask.reshape(B, 1, N)          # flattened observation mask (per-batch)
    x_col = X.reshape(B, N, 1)             # edge values (feeds fused edge init)
    m_col = tgt_mask.reshape(B, N, 1)      # target indicator per edge

    T_cur, C_cur, U_cur, pred = T_emb, C_emb, None, None
    for li, lp in enumerate(params["layers"]):
        first = li == 0
        out_proj = params["output"] if li == n_layers - 1 else None
        res = pallas_layer(
            lp, T_cur, C_cur,
            (x_col, m_col) if first else U_cur,
            mask3, tmpl_t, tmpl_c, rep_t, rep_c,
            edge_init=params["edge_init"] if first else None,
            out_proj=out_proj, num_heads=num_heads)
        if out_proj is None:
            T_cur, C_cur, U_cur = res
        else:
            T_cur, C_cur, U_cur, pred_flat = res
            pred = pred_flat.reshape(B, T, D)     # free row-major reshape

    return pred, tgt_vals, tgt_mask


def gratif_forward(params, x_time, x_vals, x_mask, y_time, y_vals, y_mask,
                   *, input_dim, num_heads):
    # convert_data
    context_w = jnp.concatenate([x_vals, x_mask], -1)
    target_y = jnp.concatenate([y_vals, y_mask], -1)
    # get_extrapolation
    context_mask = context_w[:, :, input_dim:]
    X = context_w[:, :, :input_dim] * context_mask
    context_mask = context_mask + target_y[:, :, input_dim:]
    output, target_U_, target_mask_ = encoder_forward(
        params, x_time, X, context_mask,
        target_y[:, :, :input_dim], target_y[:, :, input_dim:],
        num_heads=num_heads)
    return output, target_U_, target_mask_.astype(jnp.bool_)


# ----------------------------------------------------------------------------
# Demo
# ----------------------------------------------------------------------------
if __name__ == "__main__":
    B, T, D = 2, 8, 4          # batch (even: both v7x TCs used), time, channels
    IMAB_DIM, HEADS, LAYERS = 32, 4, 2

    key = jax.random.PRNGKey(0)
    k = jax.random.split(key, 6)
    x_time = jnp.sort(jax.random.uniform(k[0], (B, T), jnp.float32), axis=-1)
    x_vals = jax.random.normal(k[1], (B, T, D), jnp.float32)
    x_mask = (jax.random.uniform(k[2], (B, T, D)) < 0.6).astype(jnp.float32)
    y_time = x_time
    y_vals = jax.random.normal(k[3], (B, T, D), jnp.float32)
    y_mask = ((jax.random.uniform(k[4], (B, T, D)) < 0.5).astype(jnp.float32)
              * (1.0 - x_mask))

    params = init_params(jax.random.PRNGKey(1), D, IMAB_DIM, LAYERS)

    run = jax.jit(functools.partial(gratif_forward, params,
                                    input_dim=D, num_heads=HEADS))
    output, target_U_, target_mask_ = run(x_time, x_vals, x_mask,
                                          y_time, y_vals, y_mask)
    jax.block_until_ready((output, target_U_, target_mask_))

    assert output.shape == (B, T, D)
    assert target_U_.shape == (B, T, D)
    assert target_mask_.dtype == jnp.bool_
    assert bool(jnp.all(jnp.isfinite(output)))
    print("KERNEL_OK")
</pallas_src>

<mosaic_0001>
module attributes {stable_mosaic.version = 11 : i64} {
  func.func @_layer_kernel(%arg0: i32, %arg1: memref<1x8x32xf32, #tpu.memory_space<vmem>>, %arg2: memref<1x4x32xf32, #tpu.memory_space<vmem>>, %arg3: memref<1x32x1xf32, #tpu.memory_space<vmem>>, %arg4: memref<1x32x1xf32, #tpu.memory_space<vmem>>, %arg5: memref<1x1x32xf32, #tpu.memory_space<vmem>>, %arg6: memref<8x32xbf16, #tpu.memory_space<vmem>>, %arg7: memref<4x32xbf16, #tpu.memory_space<vmem>>, %arg8: memref<32x8xbf16, #tpu.memory_space<vmem>>, %arg9: memref<32x4xbf16, #tpu.memory_space<vmem>>, %arg10: memref<1x32xf32, #tpu.memory_space<vmem>>, %arg11: memref<1x32xf32, #tpu.memory_space<vmem>>, %arg12: memref<1x32xf32, #tpu.memory_space<vmem>>, %arg13: memref<32x96xbf16, #tpu.memory_space<vmem>>, %arg14: memref<32x96xbf16, #tpu.memory_space<vmem>>, %arg15: memref<32x160xbf16, #tpu.memory_space<vmem>>, %arg16: memref<1x32xf32, #tpu.memory_space<vmem>>, %arg17: memref<1x64xf32, #tpu.memory_space<vmem>>, %arg18: memref<32x32xbf16, #tpu.memory_space<vmem>>, %arg19: memref<1x32xf32, #tpu.memory_space<vmem>>, %arg20: memref<1x32xf32, #tpu.memory_space<vmem>>, %arg21: memref<1x64xf32, #tpu.memory_space<vmem>>, %arg22: memref<32x32xbf16, #tpu.memory_space<vmem>>, %arg23: memref<1x32xf32, #tpu.memory_space<vmem>>, %arg24: memref<32x32xbf16, #tpu.memory_space<vmem>>, %arg25: memref<32x32xbf16, #tpu.memory_space<vmem>>, %arg26: memref<1x32xf32, #tpu.memory_space<vmem>>, %arg27: memref<1x8x32xf32, #tpu.memory_space<vmem>>, %arg28: memref<1x4x32xf32, #tpu.memory_space<vmem>>, %arg29: memref<1x32x32xf32, #tpu.memory_space<vmem>>) attributes {dimension_semantics = [#tpu.dimension_semantics<parallel>], iteration_bounds = array<i64: 2>, scalar_prefetch = 0 : i64, scratch_operands = 0 : i64, tpu.core_type = #tpu.core_type<tc>, window_params = [{transform_indices = @transform_0, window_bounds = array<i64: 1, 8, 32>}, {transform_indices = @transform_1, window_bounds = array<i64: 1, 4, 32>}, {transform_indices = @transform_2, window_bounds = array<i64: 1, 32, 1>}, {transform_indices = @transform_3, window_bounds = array<i64: 1, 32, 1>}, {transform_indices = @transform_4, window_bounds = array<i64: 1, 1, 32>}, {pipeline_mode = #tpu.pipeline_mode<synchronous>, transform_indices = @transform_5, window_bounds = array<i64: 8, 32>}, {pipeline_mode = #tpu.pipeline_mode<synchronous>, transform_indices = @transform_6, window_bounds = array<i64: 4, 32>}, {pipeline_mode = #tpu.pipeline_mode<synchronous>, transform_indices = @transform_7, window_bounds = array<i64: 32, 8>}, {pipeline_mode = #tpu.pipeline_mode<synchronous>, transform_indices = @transform_8, window_bounds = array<i64: 32, 4>}, {pipeline_mode = #tpu.pipeline_mode<synchronous>, transform_indices = @transform_9, window_bounds = array<i64: 1, 32>}, {pipeline_mode = #tpu.pipeline_mode<synchronous>, transform_indices = @transform_10, window_bounds = array<i64: 1, 32>}, {pipeline_mode = #tpu.pipeline_mode<synchronous>, transform_indices = @transform_11, window_bounds = array<i64: 1, 32>}, {pipeline_mode = #tpu.pipeline_mode<synchronous>, transform_indices = @transform_12, window_bounds = array<i64: 32, 96>}, {pipeline_mode = #tpu.pipeline_mode<synchronous>, transform_indices = @transform_13, window_bounds = array<i64: 32, 96>}, {pipeline_mode = #tpu.pipeline_mode<synchronous>, transform_indices = @transform_14, window_bounds = array<i64: 32, 160>}, {pipeline_mode = #tpu.pipeline_mode<synchronous>, transform_indices = @transform_15, window_bounds = array<i64: 1, 32>}, {pipeline_mode = #tpu.pipeline_mode<synchronous>, transform_indices = @transform_16, window_bounds = array<i64: 1, 64>}, {pipeline_mode = #tpu.pipeline_mode<synchronous>, transform_indices = @transform_17, window_bounds = array<i64: 32, 32>}, {pipeline_mode = #tpu.pipeline_mode<synchronous>, transform_indices = @transform_18, window_bounds = array<i64: 1, 32>}, {pipeline_mode = #tpu.pipeline_mode<synchronous>, transform_indices = @transform_19, window_bounds = array<i64: 1, 32>}, {pipeline_mode = #tpu.pipeline_mode<synchronous>, transform_indices = @transform_20, window_bounds = array<i64: 1, 64>}, {pipeline_mode = #tpu.pipeline_mode<synchronous>, transform_indices = @transform_21, window_bounds = array<i64: 32, 32>}, {pipeline_mode = #tpu.pipeline_mode<synchronous>, transform_indices = @transform_22, window_bounds = array<i64: 1, 32>}, {pipeline_mode = #tpu.pipeline_mode<synchronous>, transform_indices = @transform_23, window_bounds = array<i64: 32, 32>}, {pipeline_mode = #tpu.pipeline_mode<synchronous>, transform_indices = @transform_24, window_bounds = array<i64: 32, 32>}, {pipeline_mode = #tpu.pipeline_mode<synchronous>, transform_indices = @transform_25, window_bounds = array<i64: 1, 32>}, {transform_indices = @transform_26, window_bounds = array<i64: 1, 8, 32>}, {transform_indices = @transform_27, window_bounds = array<i64: 1, 4, 32>}, {transform_indices = @transform_28, window_bounds = array<i64: 1, 32, 32>}]} {
    %c0 = arith.constant 0 : index
    %c0_0 = arith.constant 0 : index
    %c0_1 = arith.constant 0 : index
    %0 = vector.load %arg1[%c0, %c0_0, %c0_1] : memref<1x8x32xf32, #tpu.memory_space<vmem>>, vector<1x8x32xf32>
    %1 = vector.shape_cast %0 : vector<1x8x32xf32> to vector<8x32xf32>
    %c0_2 = arith.constant 0 : index
    %c0_3 = arith.constant 0 : index
    %c0_4 = arith.constant 0 : index
    %2 = vector.load %arg2[%c0_2, %c0_3, %c0_4] : memref<1x4x32xf32, #tpu.memory_space<vmem>>, vector<1x4x32xf32>
    %3 = vector.shape_cast %2 : vector<1x4x32xf32> to vector<4x32xf32>
    %c0_5 = arith.constant 0 : index
    %c0_6 = arith.constant 0 : index
    %c0_7 = arith.constant 0 : index
    %4 = vector.load %arg3[%c0_5, %c0_6, %c0_7] : memref<1x32x1xf32, #tpu.memory_space<vmem>>, vector<1x32x1xf32>
    %5 = vector.shape_cast %4 : vector<1x32x1xf32> to vector<32x1xf32>
    %c0_8 = arith.constant 0 : index
    %c0_9 = arith.constant 0 : index
    %6 = vector.load %arg10[%c0_8, %c0_9] : memref<1x32xf32, #tpu.memory_space<vmem>>, vector<1x32xf32>
    %7 = vector.broadcast %5 : vector<32x1xf32> to vector<32x32xf32>
    %8 = vector.broadcast %6 : vector<1x32xf32> to vector<32x32xf32>
    %9 = arith.mulf %7, %8 : vector<32x32xf32>
    %c0_10 = arith.constant 0 : index
    %c0_11 = arith.constant 0 : index
    %c0_12 = arith.constant 0 : index
    %10 = vector.load %arg4[%c0_10, %c0_11, %c0_12] : memref<1x32x1xf32, #tpu.memory_space<vmem>>, vector<1x32x1xf32>
    %11 = vector.shape_cast %10 : vector<1x32x1xf32> to vector<32x1xf32>
    %c0_13 = arith.constant 0 : index
    %c0_14 = arith.constant 0 : index
    %12 = vector.load %arg11[%c0_13, %c0_14] : memref<1x32xf32, #tpu.memory_space<vmem>>, vector<1x32xf32>
    %13 = vector.broadcast %11 : vector<32x1xf32> to vector<32x32xf32>
    %14 = vector.broadcast %12 : vector<1x32xf32> to vector<32x32xf32>
    %15 = arith.mulf %13, %14 : vector<32x32xf32>
    %16 = arith.addf %9, %15 : vector<32x32xf32>
    %c0_15 = arith.constant 0 : index
    %c0_16 = arith.constant 0 : index
    %17 = vector.load %arg12[%c0_15, %c0_16] : memref<1x32xf32, #tpu.memory_space<vmem>>, vector<1x32xf32>
    %18 = vector.broadcast %17 : vector<1x32xf32> to vector<32x32xf32>
    %19 = arith.addf %16, %18 : vector<32x32xf32>
    %cst = arith.constant 0.000000e+00 : f32
    %20 = vector.broadcast %cst : f32 to vector<32x32xf32>
    %21 = arith.maximumf %19, %20 : vector<32x32xf32>
    %c0_17 = arith.constant 0 : index
    %c0_18 = arith.constant 0 : index
    %c0_19 = arith.constant 0 : index
    %22 = vector.load %arg5[%c0_17, %c0_18, %c0_19] : memref<1x1x32xf32, #tpu.memory_space<vmem>>, vector<1x1x32xf32>
    %23 = vector.shape_cast %22 : vector<1x1x32xf32> to vector<1x32xf32>
    %cst_20 = arith.constant 0.000000e+00 : f32
    %24 = vector.broadcast %cst_20 : f32 to vector<1x32xf32>
    %25 = arith.cmpf ogt, %23, %24 : vector<1x32xf32>
    %c0_21 = arith.constant 0 : index
    %c0_22 = arith.constant 0 : index
    %26 = vector.load %arg6[%c0_21, %c0_22] : memref<8x32xbf16, #tpu.memory_space<vmem>>, vector<8x32xbf16>
    %c0_23 = arith.constant 0 : index
    %c0_24 = arith.constant 0 : index
    %27 = vector.load %arg7[%c0_23, %c0_24] : memref<4x32xbf16, #tpu.memory_space<vmem>>, vector<4x32xbf16>
    %c0_25 = arith.constant 0 : index
    %c0_26 = arith.constant 0 : index
    %28 = vector.load %arg8[%c0_25, %c0_26] : memref<32x8xbf16, #tpu.memory_space<vmem>>, vector<32x8xbf16>
    %c0_27 = arith.constant 0 : index
    %c0_28 = arith.constant 0 : index
    %29 = vector.load %arg9[%c0_27, %c0_28] : memref<32x4xbf16, #tpu.memory_space<vmem>>, vector<32x4xbf16>
    %cst_29 = arith.constant 0.000000e+00 : bf16
    %30 = vector.broadcast %cst_29 : bf16 to vector<8x32xbf16>
    %31 = arith.cmpf ogt, %26, %30 : vector<8x32xbf16>
    %32 = vector.broadcast %25 : vector<1x32xi1> to vector<8x32xi1>
    %33 = arith.andi %31, %32 : vector<8x32xi1>
    %cst_30 = arith.constant 0.000000e+00 : f32
    %cst_31 = arith.constant -1.000000e+10 : f32
    %34 = vector.broadcast %cst_30 : f32 to vector<8x32xf32>
    %35 = vector.broadcast %cst_31 : f32 to vector<8x32xf32>
    %36 = arith.select %33, %34, %35 : vector<8x32xi1>, vector<8x32xf32>
    %cst_32 = arith.constant 0.000000e+00 : bf16
    %37 = vector.broadcast %cst_32 : bf16 to vector<4x32xbf16>
    %38 = arith.cmpf ogt, %27, %37 : vector<4x32xbf16>
    %39 = vector.broadcast %25 : vector<1x32xi1> to vector<4x32xi1>
    %40 = arith.andi %38, %39 : vector<4x32xi1>
    %cst_33 = arith.constant 0.000000e+00 : f32
    %cst_34 = arith.constant -1.000000e+10 : f32
    %41 = vector.broadcast %cst_33 : f32 to vector<4x32xf32>
    %42 = vector.broadcast %cst_34 : f32 to vector<4x32xf32>
    %43 = arith.select %40, %41, %42 : vector<4x32xi1>, vector<4x32xf32>
    %44 = arith.truncf %1 : vector<8x32xf32> to vector<8x32xbf16>
    %45 = arith.truncf %3 : vector<4x32xf32> to vector<4x32xbf16>
    %46 = arith.truncf %21 : vector<32x32xf32> to vector<32x32xbf16>
    %c0_35 = arith.constant 0 : index
    %c0_36 = arith.constant 0 : index
    %47 = vector.load %arg13[%c0_35, %c0_36] : memref<32x96xbf16, #tpu.memory_space<vmem>>, vector<32x96xbf16>
    %cst_37 = arith.constant dense<0.000000e+00> : vector<4x96xf32>
    %48 = tpu.matmul %45, %47, %cst_37 {dimension_numbers = #tpu.dot_dimension_numbers<[1], [0], [0], [1], [0, 0, 1, 1], [], []>} : vector<4x32xbf16>, vector<32x96xbf16>, vector<4x96xf32> -> vector<4x96xf32>
    %c0_38 = arith.constant 0 : index
    %c0_39 = arith.constant 0 : index
    %49 = vector.load %arg14[%c0_38, %c0_39] : memref<32x96xbf16, #tpu.memory_space<vmem>>, vector<32x96xbf16>
    %cst_40 = arith.constant dense<0.000000e+00> : vector<8x96xf32>
    %50 = tpu.matmul %44, %49, %cst_40 {dimension_numbers = #tpu.dot_dimension_numbers<[1], [0], [0], [1], [0, 0, 1, 1], [], []>} : vector<8x32xbf16>, vector<32x96xbf16>, vector<8x96xf32> -> vector<8x96xf32>
    %c0_41 = arith.constant 0 : index
    %c0_42 = arith.constant 0 : index
    %51 = vector.load %arg15[%c0_41, %c0_42] : memref<32x160xbf16, #tpu.memory_space<vmem>>, vector<32x160xbf16>
    %cst_43 = arith.constant dense<0.000000e+00> : vector<32x160xf32>
    %52 = tpu.matmul %46, %51, %cst_43 {dimension_numbers = #tpu.dot_dimension_numbers<[1], [0], [0], [1], [0, 0, 1, 1], [], []>} : vector<32x32xbf16>, vector<32x160xbf16>, vector<32x160xf32> -> vector<32x160xf32>
    %53 = vector.extract_strided_slice %48 {offsets = [0, 0], sizes = [4, 32], strides = [1, 1]} : vector<4x96xf32> to vector<4x32xf32>
    %c0_44 = arith.constant 0 : index
    %c0_45 = arith.constant 0 : index
    %54 = vector.load %arg16[%c0_44, %c0_45] : memref<1x32xf32, #tpu.memory_space<vmem>>, vector<1x32xf32>
    %55 = vector.broadcast %54 : vector<1x32xf32> to vector<4x32xf32>
    %56 = arith.addf %53, %55 : vector<4x32xf32>
    %57 = vector.extract_strided_slice %48 {offsets = [0, 32], sizes = [4, 64], strides = [1, 1]} : vector<4x96xf32> to vector<4x64xf32>
    %58 = arith.truncf %57 : vector<4x64xf32> to vector<4x64xbf16>
    %59 = vector.extract_strided_slice %50 {offsets = [0, 0], sizes = [8, 32], strides = [1, 1]} : vector<8x96xf32> to vector<8x32xf32>
    %c0_46 = arith.constant 0 : index
    %c0_47 = arith.constant 0 : index
    %60 = vector.load %arg20[%c0_46, %c0_47] : memref<1x32xf32, #tpu.memory_space<vmem>>, vector<1x32xf32>
    %61 = vector.broadcast %60 : vector<1x32xf32> to vector<8x32xf32>
    %62 = arith.addf %59, %61 : vector<8x32xf32>
    %63 = vector.extract_strided_slice %50 {offsets = [0, 32], sizes = [8, 64], strides = [1, 1]} : vector<8x96xf32> to vector<8x64xf32>
    %64 = arith.truncf %63 : vector<8x64xf32> to vector<8x64xbf16>
    %65 = vector.extract_strided_slice %52 {offsets = [0, 0], sizes = [32, 64], strides = [1, 1]} : vector<32x160xf32> to vector<32x64xf32>
    %66 = vector.extract_strided_slice %52 {offsets = [0, 64], sizes = [32, 64], strides = [1, 1]} : vector<32x160xf32> to vector<32x64xf32>
    %67 = vector.extract_strided_slice %52 {offsets = [0, 128], sizes = [32, 32], strides = [1, 1]} : vector<32x160xf32> to vector<32x32xf32>
    %cst_48 = arith.constant dense<0.000000e+00> : vector<32x64xf32>
    %68 = tpu.matmul %28, %64, %cst_48 {dimension_numbers = #tpu.dot_dimension_numbers<[1], [0], [0], [1], [0, 0, 1, 1], [], []>} : vector<32x8xbf16>, vector<8x64xbf16>, vector<32x64xf32> -> vector<32x64xf32>
    %69 = arith.addf %68, %65 : vector<32x64xf32>
    %c0_49 = arith.constant 0 : index
    %c0_50 = arith.constant 0 : index
    %70 = vector.load %arg17[%c0_49, %c0_50] : memref<1x64xf32, #tpu.memory_space<vmem>>, vector<1x64xf32>
    %71 = vector.broadcast %70 : vector<1x64xf32> to vector<32x64xf32>
    %72 = arith.addf %69, %71 : vector<32x64xf32>
    %73 = vector.extract_strided_slice %72 {offsets = [0, 0], sizes = [32, 32], strides = [1, 1]} : vector<32x64xf32> to vector<32x32xf32>
    %74 = vector.extract_strided_slice %72 {offsets = [0, 32], sizes = [32, 32], strides = [1, 1]} : vector<32x64xf32> to vector<32x32xf32>
    %c0_51 = arith.constant 0 : index
    %c0_52 = arith.constant 0 : index
    %75 = vector.load %arg18[%c0_51, %c0_52] : memref<32x32xbf16, #tpu.memory_space<vmem>>, vector<32x32xbf16>
    %c0_53 = arith.constant 0 : index
    %c0_54 = arith.constant 0 : index
    %76 = vector.load %arg19[%c0_53, %c0_54] : memref<1x32xf32, #tpu.memory_space<vmem>>, vector<1x32xf32>
    %cst_55 = arith.constant 0.176776692 : f32
    %77 = vector.broadcast %cst_55 : f32 to vector<4x32xf32>
    %78 = arith.mulf %56, %77 : vector<4x32xf32>
    %79 = arith.truncf %78 : vector<4x32xf32> to vector<4x32xbf16>
    %80 = arith.truncf %73 : vector<32x32xf32> to vector<32x32xbf16>
    %81 = arith.truncf %74 : vector<32x32xf32> to vector<32x32xbf16>
    %82 = vector.extract_strided_slice %79 {offsets = [0, 0], sizes = [4, 8], strides = [1, 1]} : vector<4x32xbf16> to vector<4x8xbf16>
    %83 = vector.extract_strided_slice %80 {offsets = [0, 0], sizes = [32, 8], strides = [1, 1]} : vector<32x32xbf16> to vector<32x8xbf16>
    %cst_56 = arith.constant dense<0.000000e+00> : vector<4x32xf32>
    %84 = tpu.matmul %82, %83, %cst_56 {dimension_numbers = #tpu.dot_dimension_numbers<[1], [1], [0], [0], [0, 0, 1, 0], [], []>} : vector<4x8xbf16>, vector<32x8xbf16>, vector<4x32xf32> -> vector<4x32xf32>
    %85 = arith.addf %84, %43 : vector<4x32xf32>
    %cst_57 = arith.constant dense<0xFF800000> : vector<4xf32>
    %86 = vector.multi_reduction <maximumf>, %85, %cst_57 [1] : vector<4x32xf32> to vector<4xf32>
    %87 = vector.shape_cast %86 : vector<4xf32> to vector<4x1xf32>
    %88 = vector.broadcast %87 : vector<4x1xf32> to vector<4x32xf32>
    %89 = arith.subf %85, %88 : vector<4x32xf32>
    %90 = math.exp %89 : vector<4x32xf32>
    %cst_58 = arith.constant dense<0.000000e+00> : vector<4xf32>
    %91 = vector.multi_reduction <add>, %90, %cst_58 [1] : vector<4x32xf32> to vector<4xf32>
    %92 = vector.shape_cast %91 : vector<4xf32> to vector<4x1xf32>
    %93 = tpu.reciprocal %92 {approx = true} : vector<4x1xf32> -> vector<4x1xf32>
    %94 = vector.broadcast %93 : vector<4x1xf32> to vector<4x32xf32>
    %95 = arith.mulf %90, %94 : vector<4x32xf32>
    %96 = arith.truncf %95 : vector<4x32xf32> to vector<4x32xbf16>
    %97 = vector.extract_strided_slice %81 {offsets = [0, 0], sizes = [32, 8], strides = [1, 1]} : vector<32x32xbf16> to vector<32x8xbf16>
    %cst_59 = arith.constant dense<0.000000e+00> : vector<4x8xf32>
    %98 = tpu.matmul %96, %97, %cst_59 {dimension_numbers = #tpu.dot_dimension_numbers<[1], [0], [0], [1], [0, 0, 1, 1], [], []>} : vector<4x32xbf16>, vector<32x8xbf16>, vector<4x8xf32> -> vector<4x8xf32>
    %99 = vector.extract_strided_slice %79 {offsets = [0, 8], sizes = [4, 8], strides = [1, 1]} : vector<4x32xbf16> to vector<4x8xbf16>
    %100 = vector.extract_strided_slice %80 {offsets = [0, 8], sizes = [32, 8], strides = [1, 1]} : vector<32x32xbf16> to vector<32x8xbf16>
    %cst_60 = arith.constant dense<0.000000e+00> : vector<4x32xf32>
    %101 = tpu.matmul %99, %100, %cst_60 {dimension_numbers = #tpu.dot_dimension_numbers<[1], [1], [0], [0], [0, 0, 1, 0], [], []>} : vector<4x8xbf16>, vector<32x8xbf16>, vector<4x32xf32> -> vector<4x32xf32>
    %102 = arith.addf %101, %43 : vector<4x32xf32>
    %cst_61 = arith.constant dense<0xFF800000> : vector<4xf32>
    %103 = vector.multi_reduction <maximumf>, %102, %cst_61 [1] : vector<4x32xf32> to vector<4xf32>
    %104 = vector.shape_cast %103 : vector<4xf32> to vector<4x1xf32>
    %105 = vector.broadcast %104 : vector<4x1xf32> to vector<4x32xf32>
    %106 = arith.subf %102, %105 : vector<4x32xf32>
    %107 = math.exp %106 : vector<4x32xf32>
    %cst_62 = arith.constant dense<0.000000e+00> : vector<4xf32>
    %108 = vector.multi_reduction <add>, %107, %cst_62 [1] : vector<4x32xf32> to vector<4xf32>
    %109 = vector.shape_cast %108 : vector<4xf32> to vector<4x1xf32>
    %110 = tpu.reciprocal %109 {approx = true} : vector<4x1xf32> -> vector<4x1xf32>
    %111 = vector.broadcast %110 : vector<4x1xf32> to vector<4x32xf32>
    %112 = arith.mulf %107, %111 : vector<4x32xf32>
    %113 = arith.truncf %112 : vector<4x32xf32> to vector<4x32xbf16>
    %114 = vector.extract_strided_slice %81 {offsets = [0, 8], sizes = [32, 8], strides = [1, 1]} : vector<32x32xbf16> to vector<32x8xbf16>
    %cst_63 = arith.constant dense<0.000000e+00> : vector<4x8xf32>
    %115 = tpu.matmul %113, %114, %cst_63 {dimension_numbers = #tpu.dot_dimension_numbers<[1], [0], [0], [1], [0, 0, 1, 1], [], []>} : vector<4x32xbf16>, vector<32x8xbf16>, vector<4x8xf32> -> vector<4x8xf32>
    %116 = vector.extract_strided_slice %79 {offsets = [0, 16], sizes = [4, 8], strides = [1, 1]} : vector<4x32xbf16> to vector<4x8xbf16>
    %117 = vector.extract_strided_slice %80 {offsets = [0, 16], sizes = [32, 8], strides = [1, 1]} : vector<32x32xbf16> to vector<32x8xbf16>
    %cst_64 = arith.constant dense<0.000000e+00> : vector<4x32xf32>
    %118 = tpu.matmul %116, %117, %cst_64 {dimension_numbers = #tpu.dot_dimension_numbers<[1], [1], [0], [0], [0, 0, 1, 0], [], []>} : vector<4x8xbf16>, vector<32x8xbf16>, vector<4x32xf32> -> vector<4x32xf32>
    %119 = arith.addf %118, %43 : vector<4x32xf32>
    %cst_65 = arith.constant dense<0xFF800000> : vector<4xf32>
    %120 = vector.multi_reduction <maximumf>, %119, %cst_65 [1] : vector<4x32xf32> to vector<4xf32>
    %121 = vector.shape_cast %120 : vector<4xf32> to vector<4x1xf32>
    %122 = vector.broadcast %121 : vector<4x1xf32> to vector<4x32xf32>
    %123 = arith.subf %119, %122 : vector<4x32xf32>
    %124 = math.exp %123 : vector<4x32xf32>
    %cst_66 = arith.constant dense<0.000000e+00> : vector<4xf32>
    %125 = vector.multi_reduction <add>, %124, %cst_66 [1] : vector<4x32xf32> to vector<4xf32>
    %126 = vector.shape_cast %125 : vector<4xf32> to vector<4x1xf32>
    %127 = tpu.reciprocal %126 {approx = true} : vector<4x1xf32> -> vector<4x1xf32>
    %128 = vector.broadcast %127 : vector<4x1xf32> to vector<4x32xf32>
    %129 = arith.mulf %124, %128 : vector<4x32xf32>
    %130 = arith.truncf %129 : vector<4x32xf32> to vector<4x32xbf16>
    %131 = vector.extract_strided_slice %81 {offsets = [0, 16], sizes = [32, 8], strides = [1, 1]} : vector<32x32xbf16> to vector<32x8xbf16>
    %cst_67 = arith.constant dense<0.000000e+00> : vector<4x8xf32>
    %132 = tpu.matmul %130, %131, %cst_67 {dimension_numbers = #tpu.dot_dimension_numbers<[1], [0], [0], [1], [0, 0, 1, 1], [], []>} : vector<4x32xbf16>, vector<32x8xbf16>, vector<4x8xf32> -> vector<4x8xf32>
    %133 = vector.extract_strided_slice %79 {offsets = [0, 24], sizes = [4, 8], strides = [1, 1]} : vector<4x32xbf16> to vector<4x8xbf16>
    %134 = vector.extract_strided_slice %80 {offsets = [0, 24], sizes = [32, 8], strides = [1, 1]} : vector<32x32xbf16> to vector<32x8xbf16>
    %cst_68 = arith.constant dense<0.000000e+00> : vector<4x32xf32>
    %135 = tpu.matmul %133, %134, %cst_68 {dimension_numbers = #tpu.dot_dimension_numbers<[1], [1], [0], [0], [0, 0, 1, 0], [], []>} : vector<4x8xbf16>, vector<32x8xbf16>, vector<4x32xf32> -> vector<4x32xf32>
    %136 = arith.addf %135, %43 : vector<4x32xf32>
    %cst_69 = arith.constant dense<0xFF800000> : vector<4xf32>
    %137 = vector.multi_reduction <maximumf>, %136, %cst_69 [1] : vector<4x32xf32> to vector<4xf32>
    %138 = vector.shape_cast %137 : vector<4xf32> to vector<4x1xf32>
    %139 = vector.broadcast %138 : vector<4x1xf32> to vector<4x32xf32>
    %140 = arith.subf %136, %139 : vector<4x32xf32>
    %141 = math.exp %140 : vector<4x32xf32>
    %cst_70 = arith.constant dense<0.000000e+00> : vector<4xf32>
    %142 = vector.multi_reduction <add>, %141, %cst_70 [1] : vector<4x32xf32> to vector<4xf32>
    %143 = vector.shape_cast %142 : vector<4xf32> to vector<4x1xf32>
    %144 = tpu.reciprocal %143 {approx = true} : vector<4x1xf32> -> vector<4x1xf32>
    %145 = vector.broadcast %144 : vector<4x1xf32> to vector<4x32xf32>
    %146 = arith.mulf %141, %145 : vector<4x32xf32>
    %147 = arith.truncf %146 : vector<4x32xf32> to vector<4x32xbf16>
    %148 = vector.extract_strided_slice %81 {offsets = [0, 24], sizes = [32, 8], strides = [1, 1]} : vector<32x32xbf16> to vector<32x8xbf16>
    %cst_71 = arith.constant dense<0.000000e+00> : vector<4x8xf32>
    %149 = tpu.matmul %147, %148, %cst_71 {dimension_numbers = #tpu.dot_dimension_numbers<[1], [0], [0], [1], [0, 0, 1, 1], [], []>} : vector<4x32xbf16>, vector<32x8xbf16>, vector<4x8xf32> -> vector<4x8xf32>
    %150 = tpu.concatenate %98, %115, %132, %149 in 1 : vector<4x8xf32>, vector<4x8xf32>, vector<4x8xf32>, vector<4x8xf32> -> vector<4x32xf32>
    %151 = arith.addf %56, %150 : vector<4x32xf32>
    %152 = arith.truncf %151 : vector<4x32xf32> to vector<4x32xbf16>
    %cst_72 = arith.constant dense<0.000000e+00> : vector<4x32xf32>
    %153 = tpu.matmul %152, %75, %cst_72 {dimension_numbers = #tpu.dot_dimension_numbers<[1], [0], [0], [1], [0, 0, 1, 1], [], []>} : vector<4x32xbf16>, vector<32x32xbf16>, vector<4x32xf32> -> vector<4x32xf32>
    %154 = vector.broadcast %76 : vector<1x32xf32> to vector<4x32xf32>
    %155 = arith.addf %153, %154 : vector<4x32xf32>
    %cst_73 = arith.constant 0.000000e+00 : f32
    %156 = vector.broadcast %cst_73 : f32 to vector<4x32xf32>
    %157 = arith.maximumf %155, %156 : vector<4x32xf32>
    %158 = arith.addf %151, %157 : vector<4x32xf32>
    %cst_74 = arith.constant dense<0.000000e+00> : vector<32x64xf32>
    %159 = tpu.matmul %29, %58, %cst_74 {dimension_numbers = #tpu.dot_dimension_numbers<[1], [0], [0], [1], [0, 0, 1, 1], [], []>} : vector<32x4xbf16>, vector<4x64xbf16>, vector<32x64xf32> -> vector<32x64xf32>
    %160 = arith.addf %159, %66 : vector<32x64xf32>
    %c0_75 = arith.constant 0 : index
    %c0_76 = arith.constant 0 : index
    %161 = vector.load %arg21[%c0_75, %c0_76] : memref<1x64xf32, #tpu.memory_space<vmem>>, vector<1x64xf32>
    %162 = vector.broadcast %161 : vector<1x64xf32> to vector<32x64xf32>
    %163 = arith.addf %160, %162 : vector<32x64xf32>
    %164 = vector.extract_strided_slice %163 {offsets = [0, 0], sizes = [32, 32], strides = [1, 1]} : vector<32x64xf32> to vector<32x32xf32>
    %165 = vector.extract_strided_slice %163 {offsets = [0, 32], sizes = [32, 32], strides = [1, 1]} : vector<32x64xf32> to vector<32x32xf32>
    %c0_77 = arith.constant 0 : index
    %c0_78 = arith.constant 0 : index
    %166 = vector.load %arg22[%c0_77, %c0_78] : memref<32x32xbf16, #tpu.memory_space<vmem>>, vector<32x32xbf16>
    %c0_79 = arith.constant 0 : index
    %c0_80 = arith.constant 0 : index
    %167 = vector.load %arg23[%c0_79, %c0_80] : memref<1x32xf32, #tpu.memory_space<vmem>>, vector<1x32xf32>
    %cst_81 = arith.constant 0.176776692 : f32
    %168 = vector.broadcast %cst_81 : f32 to vector<8x32xf32>
    %169 = arith.mulf %62, %168 : vector<8x32xf32>
    %170 = arith.truncf %169 : vector<8x32xf32> to vector<8x32xbf16>
    %171 = arith.truncf %164 : vector<32x32xf32> to vector<32x32xbf16>
    %172 = arith.truncf %165 : vector<32x32xf32> to vector<32x32xbf16>
    %173 = vector.extract_strided_slice %170 {offsets = [0, 0], sizes = [8, 8], strides = [1, 1]} : vector<8x32xbf16> to vector<8x8xbf16>
    %174 = vector.extract_strided_slice %171 {offsets = [0, 0], sizes = [32, 8], strides = [1, 1]} : vector<32x32xbf16> to vector<32x8xbf16>
    %cst_82 = arith.constant dense<0.000000e+00> : vector<8x32xf32>
    %175 = tpu.matmul %173, %174, %cst_82 {dimension_numbers = #tpu.dot_dimension_numbers<[1], [1], [0], [0], [0, 0, 1, 0], [], []>} : vector<8x8xbf16>, vector<32x8xbf16>, vector<8x32xf32> -> vector<8x32xf32>
    %176 = arith.addf %175, %36 : vector<8x32xf32>
    %cst_83 = arith.constant dense<0xFF800000> : vector<8xf32>
    %177 = vector.multi_reduction <maximumf>, %176, %cst_83 [1] : vector<8x32xf32> to vector<8xf32>
    %178 = vector.shape_cast %177 : vector<8xf32> to vector<8x1xf32>
    %179 = vector.broadcast %178 : vector<8x1xf32> to vector<8x32xf32>
    %180 = arith.subf %176, %179 : vector<8x32xf32>
    %181 = math.exp %180 : vector<8x32xf32>
    %cst_84 = arith.constant dense<0.000000e+00> : vector<8xf32>
    %182 = vector.multi_reduction <add>, %181, %cst_84 [1] : vector<8x32xf32> to vector<8xf32>
    %183 = vector.shape_cast %182 : vector<8xf32> to vector<8x1xf32>
    %184 = tpu.reciprocal %183 {approx = true} : vector<8x1xf32> -> vector<8x1xf32>
    %185 = vector.broadcast %184 : vector<8x1xf32> to vector<8x32xf32>
    %186 = arith.mulf %181, %185 : vector<8x32xf32>
    %187 = arith.truncf %186 : vector<8x32xf32> to vector<8x32xbf16>
    %188 = vector.extract_strided_slice %172 {offsets = [0, 0], sizes = [32, 8], strides = [1, 1]} : vector<32x32xbf16> to vector<32x8xbf16>
    %cst_85 = arith.constant dense<0.000000e+00> : vector<8x8xf32>
    %189 = tpu.matmul %187, %188, %cst_85 {dimension_numbers = #tpu.dot_dimension_numbers<[1], [0], [0], [1], [0, 0, 1, 1], [], []>} : vector<8x32xbf16>, vector<32x8xbf16>, vector<8x8xf32> -> vector<8x8xf32>
    %190 = vector.extract_strided_slice %170 {offsets = [0, 8], sizes = [8, 8], strides = [1, 1]} : vector<8x32xbf16> to vector<8x8xbf16>
    %191 = vector.extract_strided_slice %171 {offsets = [0, 8], sizes = [32, 8], strides = [1, 1]} : vector<32x32xbf16> to vector<32x8xbf16>
    %cst_86 = arith.constant dense<0.000000e+00> : vector<8x32xf32>
    %192 = tpu.matmul %190, %191, %cst_86 {dimension_numbers = #tpu.dot_dimension_numbers<[1], [1], [0], [0], [0, 0, 1, 0], [], []>} : vector<8x8xbf16>, vector<32x8xbf16>, vector<8x32xf32> -> vector<8x32xf32>
    %193 = arith.addf %192, %36 : vector<8x32xf32>
    %cst_87 = arith.constant dense<0xFF800000> : vector<8xf32>
    %194 = vector.multi_reduction <maximumf>, %193, %cst_87 [1] : vector<8x32xf32> to vector<8xf32>
    %195 = vector.shape_cast %194 : vector<8xf32> to vector<8x1xf32>
    %196 = vector.broadcast %195 : vector<8x1xf32> to vector<8x32xf32>
    %197 = arith.subf %193, %196 : vector<8x32xf32>
    %198 = math.exp %197 : vector<8x32xf32>
    %cst_88 = arith.constant dense<0.000000e+00> : vector<8xf32>
    %199 = vector.multi_reduction <add>, %198, %cst_88 [1] : vector<8x32xf32> to vector<8xf32>
    %200 = vector.shape_cast %199 : vector<8xf32> to vector<8x1xf32>
    %201 = tpu.reciprocal %200 {approx = true} : vector<8x1xf32> -> vector<8x1xf32>
    %202 = vector.broadcast %201 : vector<8x1xf32> to vector<8x32xf32>
    %203 = arith.mulf %198, %202 : vector<8x32xf32>
    %204 = arith.truncf %203 : vector<8x32xf32> to vector<8x32xbf16>
    %205 = vector.extract_strided_slice %172 {offsets = [0, 8], sizes = [32, 8], strides = [1, 1]} : vector<32x32xbf16> to vector<32x8xbf16>
    %cst_89 = arith.constant dense<0.000000e+00> : vector<8x8xf32>
    %206 = tpu.matmul %204, %205, %cst_89 {dimension_numbers = #tpu.dot_dimension_numbers<[1], [0], [0], [1], [0, 0, 1, 1], [], []>} : vector<8x32xbf16>, vector<32x8xbf16>, vector<8x8xf32> -> vector<8x8xf32>
    %207 = vector.extract_strided_slice %170 {offsets = [0, 16], sizes = [8, 8], strides = [1, 1]} : vector<8x32xbf16> to vector<8x8xbf16>
    %208 = vector.extract_strided_slice %171 {offsets = [0, 16], sizes = [32, 8], strides = [1, 1]} : vector<32x32xbf16> to vector<32x8xbf16>
    %cst_90 = arith.constant dense<0.000000e+00> : vector<8x32xf32>
    %209 = tpu.matmul %207, %208, %cst_90 {dimension_numbers = #tpu.dot_dimension_numbers<[1], [1], [0], [0], [0, 0, 1, 0], [], []>} : vector<8x8xbf16>, vector<32x8xbf16>, vector<8x32xf32> -> vector<8x32xf32>
    %210 = arith.addf %209, %36 : vector<8x32xf32>
    %cst_91 = arith.constant dense<0xFF800000> : vector<8xf32>
    %211 = vector.multi_reduction <maximumf>, %210, %cst_91 [1] : vector<8x32xf32> to vector<8xf32>
    %212 = vector.shape_cast %211 : vector<8xf32> to vector<8x1xf32>
    %213 = vector.broadcast %212 : vector<8x1xf32> to vector<8x32xf32>
    %214 = arith.subf %210, %213 : vector<8x32xf32>
    %215 = math.exp %214 : vector<8x32xf32>
    %cst_92 = arith.constant dense<0.000000e+00> : vector<8xf32>
    %216 = vector.multi_reduction <add>, %215, %cst_92 [1] : vector<8x32xf32> to vector<8xf32>
    %217 = vector.shape_cast %216 : vector<8xf32> to vector<8x1xf32>
    %218 = tpu.reciprocal %217 {approx = true} : vector<8x1xf32> -> vector<8x1xf32>
    %219 = vector.broadcast %218 : vector<8x1xf32> to vector<8x32xf32>
    %220 = arith.mulf %215, %219 : vector<8x32xf32>
    %221 = arith.truncf %220 : vector<8x32xf32> to vector<8x32xbf16>
    %222 = vector.extract_strided_slice %172 {offsets = [0, 16], sizes = [32, 8], strides = [1, 1]} : vector<32x32xbf16> to vector<32x8xbf16>
    %cst_93 = arith.constant dense<0.000000e+00> : vector<8x8xf32>
    %223 = tpu.matmul %221, %222, %cst_93 {dimension_numbers = #tpu.dot_dimension_numbers<[1], [0], [0], [1], [0, 0, 1, 1], [], []>} : vector<8x32xbf16>, vector<32x8xbf16>, vector<8x8xf32> -> vector<8x8xf32>
    %224 = vector.extract_strided_slice %170 {offsets = [0, 24], sizes = [8, 8], strides = [1, 1]} : vector<8x32xbf16> to vector<8x8xbf16>
    %225 = vector.extract_strided_slice %171 {offsets = [0, 24], sizes = [32, 8], strides = [1, 1]} : vector<32x32xbf16> to vector<32x8xbf16>
    %cst_94 = arith.constant dense<0.000000e+00> : vector<8x32xf32>
    %226 = tpu.matmul %224, %225, %cst_94 {dimension_numbers = #tpu.dot_dimension_numbers<[1], [1], [0], [0], [0, 0, 1, 0], [], []>} : vector<8x8xbf16>, vector<32x8xbf16>, vector<8x32xf32> -> vector<8x32xf32>
    %227 = arith.addf %226, %36 : vector<8x32xf32>
    %cst_95 = arith.constant dense<0xFF800000> : vector<8xf32>
    %228 = vector.multi_reduction <maximumf>, %227, %cst_95 [1] : vector<8x32xf32> to vector<8xf32>
    %229 = vector.shape_cast %228 : vector<8xf32> to vector<8x1xf32>
    %230 = vector.broadcast %229 : vector<8x1xf32> to vector<8x32xf32>
    %231 = arith.subf %227, %230 : vector<8x32xf32>
    %232 = math.exp %231 : vector<8x32xf32>
    %cst_96 = arith.constant dense<0.000000e+00> : vector<8xf32>
    %233 = vector.multi_reduction <add>, %232, %cst_96 [1] : vector<8x32xf32> to vector<8xf32>
    %234 = vector.shape_cast %233 : vector<8xf32> to vector<8x1xf32>
    %235 = tpu.reciprocal %234 {approx = true} : vector<8x1xf32> -> vector<8x1xf32>
    %236 = vector.broadcast %235 : vector<8x1xf32> to vector<8x32xf32>
    %237 = arith.mulf %232, %236 : vector<8x32xf32>
    %238 = arith.truncf %237 : vector<8x32xf32> to vector<8x32xbf16>
    %239 = vector.extract_strided_slice %172 {offsets = [0, 24], sizes = [32, 8], strides = [1, 1]} : vector<32x32xbf16> to vector<32x8xbf16>
    %cst_97 = arith.constant dense<0.000000e+00> : vector<8x8xf32>
    %240 = tpu.matmul %238, %239, %cst_97 {dimension_numbers = #tpu.dot_dimension_numbers<[1], [0], [0], [1], [0, 0, 1, 1], [], []>} : vector<8x32xbf16>, vector<32x8xbf16>, vector<8x8xf32> -> vector<8x8xf32>
    %241 = tpu.concatenate %189, %206, %223, %240 in 1 : vector<8x8xf32>, vector<8x8xf32>, vector<8x8xf32>, vector<8x8xf32> -> vector<8x32xf32>
    %242 = arith.addf %62, %241 : vector<8x32xf32>
    %243 = arith.truncf %242 : vector<8x32xf32> to vector<8x32xbf16>
    %cst_98 = arith.constant dense<0.000000e+00> : vector<8x32xf32>
    %244 = tpu.matmul %243, %166, %cst_98 {dimension_numbers = #tpu.dot_dimension_numbers<[1], [0], [0], [1], [0, 0, 1, 1], [], []>} : vector<8x32xbf16>, vector<32x32xbf16>, vector<8x32xf32> -> vector<8x32xf32>
    %245 = vector.broadcast %167 : vector<1x32xf32> to vector<8x32xf32>
    %246 = arith.addf %244, %245 : vector<8x32xf32>
    %cst_99 = arith.constant 0.000000e+00 : f32
    %247 = vector.broadcast %cst_99 : f32 to vector<8x32xf32>
    %248 = arith.maximumf %246, %247 : vector<8x32xf32>
    %249 = arith.addf %242, %248 : vector<8x32xf32>
    %250 = arith.truncf %158 : vector<4x32xf32> to vector<4x32xbf16>
    %c0_100 = arith.constant 0 : index
    %c0_101 = arith.constant 0 : index
    %251 = vector.load %arg24[%c0_100, %c0_101] : memref<32x32xbf16, #tpu.memory_space<vmem>>, vector<32x32xbf16>
    %cst_102 = arith.constant dense<0.000000e+00> : vector<4x32xf32>
    %252 = tpu.matmul %250, %251, %cst_102 {dimension_numbers = #tpu.dot_dimension_numbers<[1], [0], [0], [1], [0, 0, 1, 1], [], []>} : vector<4x32xbf16>, vector<32x32xbf16>, vector<4x32xf32> -> vector<4x32xf32>
    %253 = arith.truncf %252 : vector<4x32xf32> to vector<4x32xbf16>
    %254 = arith.truncf %249 : vector<8x32xf32> to vector<8x32xbf16>
    %c0_103 = arith.constant 0 : index
    %c0_104 = arith.constant 0 : index
    %255 = vector.load %arg25[%c0_103, %c0_104] : memref<32x32xbf16, #tpu.memory_space<vmem>>, vector<32x32xbf16>
    %cst_105 = arith.constant dense<0.000000e+00> : vector<8x32xf32>
    %256 = tpu.matmul %254, %255, %cst_105 {dimension_numbers = #tpu.dot_dimension_numbers<[1], [0], [0], [1], [0, 0, 1, 1], [], []>} : vector<8x32xbf16>, vector<32x32xbf16>, vector<8x32xf32> -> vector<8x32xf32>
    %257 = arith.truncf %256 : vector<8x32xf32> to vector<8x32xbf16>
    %cst_106 = arith.constant dense<0.000000e+00> : vector<32x32xf32>
    %258 = tpu.matmul %29, %253, %cst_106 {dimension_numbers = #tpu.dot_dimension_numbers<[1], [0], [0], [1], [0, 0, 1, 1], [], []>} : vector<32x4xbf16>, vector<4x32xbf16>, vector<32x32xf32> -> vector<32x32xf32>
    %cst_107 = arith.constant dense<0.000000e+00> : vector<32x32xf32>
    %259 = tpu.matmul %28, %257, %cst_107 {dimension_numbers = #tpu.dot_dimension_numbers<[1], [0], [0], [1], [0, 0, 1, 1], [], []>} : vector<32x8xbf16>, vector<8x32xbf16>, vector<32x32xf32> -> vector<32x32xf32>
    %260 = arith.addf %258, %259 : vector<32x32xf32>
    %261 = arith.addf %260, %67 : vector<32x32xf32>
    %c0_108 = arith.constant 0 : index
    %c0_109 = arith.constant 0 : index
    %262 = vector.load %arg26[%c0_108, %c0_109] : memref<1x32xf32, #tpu.memory_space<vmem>>, vector<1x32xf32>
    %263 = vector.broadcast %262 : vector<1x32xf32> to vector<32x32xf32>
    %264 = arith.addf %261, %263 : vector<32x32xf32>
    %cst_110 = arith.constant 0.000000e+00 : f32
    %265 = vector.broadcast %cst_110 : f32 to vector<32x32xf32>
    %266 = arith.maximumf %264, %265 : vector<32x32xf32>
    %267 = arith.addf %266, %21 : vector<32x32xf32>
    %c0_111 = arith.constant 0 : index
    %c0_112 = arith.constant 0 : index
    %c0_113 = arith.constant 0 : index
    %268 = vector.load %arg27[%c0_111, %c0_112, %c0_113] : memref<1x8x32xf32, #tpu.memory_space<vmem>>, vector<1x8x32xf32>
    %269 = vector.shape_cast %268 : vector<1x8x32xf32> to vector<8x32xf32>
    %270 = vector.shape_cast %249 : vector<8x32xf32> to vector<1x8x32xf32>
    tpu.vector_store %arg27[%c0_111, %c0_112, %c0_113], %270 {strides = array<i32>} : memref<1x8x32xf32, #tpu.memory_space<vmem>>, vector<1x8x32xf32>,
    %c0_114 = arith.constant 0 : index
    %c0_115 = arith.constant 0 : index
    %c0_116 = arith.constant 0 : index
    %271 = vector.load %arg28[%c0_114, %c0_115, %c0_116] : memref<1x4x32xf32, #tpu.memory_space<vmem>>, vector<1x4x32xf32>
    %272 = vector.shape_cast %271 : vector<1x4x32xf32> to vector<4x32xf32>
    %273 = vector.shape_cast %158 : vector<4x32xf32> to vector<1x4x32xf32>
    tpu.vector_store %arg28[%c0_114, %c0_115, %c0_116], %273 {strides = array<i32>} : memref<1x4x32xf32, #tpu.memory_space<vmem>>, vector<1x4x32xf32>,
    %c0_117 = arith.constant 0 : index
    %c0_118 = arith.constant 0 : index
    %c0_119 = arith.constant 0 : index
    %274 = vector.load %arg29[%c0_117, %c0_118, %c0_119] : memref<1x32x32xf32, #tpu.memory_space<vmem>>, vector<1x32x32xf32>
    %275 = vector.shape_cast %274 : vector<1x32x32xf32> to vector<32x32xf32>
    %276 = vector.shape_cast %267 : vector<32x32xf32> to vector<1x32x32xf32>
    tpu.vector_store %arg29[%c0_117, %c0_118, %c0_119], %276 {strides = array<i32>} : memref<1x32x32xf32, #tpu.memory_space<vmem>>, vector<1x32x32xf32>,
    return
  }
  func.func @transform_0(%arg0: i32) -> (i32, i32, i32) {
    %c0_i32 = arith.constant 0 : i32
    %c0_i32_0 = arith.constant 0 : i32
    %c0_i32_1 = arith.constant 0 : i32
    return %arg0, %c0_i32, %c0_i32_0 : i32, i32, i32
  }
  func.func @transform_1(%arg0: i32) -> (i32, i32, i32) {
    %c0_i32 = arith.constant 0 : i32
    %c0_i32_0 = arith.constant 0 : i32
    %c0_i32_1 = arith.constant 0 : i32
    return %arg0, %c0_i32, %c0_i32_0 : i32, i32, i32
  }
  func.func @transform_2(%arg0: i32) -> (i32, i32, i32) {
    %c0_i32 = arith.constant 0 : i32
    %c0_i32_0 = arith.constant 0 : i32
    %c0_i32_1 = arith.constant 0 : i32
    return %arg0, %c0_i32, %c0_i32_0 : i32, i32, i32
  }
  func.func @transform_3(%arg0: i32) -> (i32, i32, i32) {
    %c0_i32 = arith.constant 0 : i32
    %c0_i32_0 = arith.constant 0 : i32
    %c0_i32_1 = arith.constant 0 : i32
    return %arg0, %c0_i32, %c0_i32_0 : i32, i32, i32
  }
  func.func @transform_4(%arg0: i32) -> (i32, i32, i32) {
    %c0_i32 = arith.constant 0 : i32
    %c0_i32_0 = arith.constant 0 : i32
    %c0_i32_1 = arith.constant 0 : i32
    return %arg0, %c0_i32, %c0_i32_0 : i32, i32, i32
  }
  func.func @transform_5(%arg0: i32) -> (i32, i32) {
    %c0_i32 = arith.constant 0 : i32
    %c0_i32_0 = arith.constant 0 : i32
    %c0_i32_1 = arith.constant 0 : i32
    return %c0_i32, %c0_i32_0 : i32, i32
  }
  func.func @transform_6(%arg0: i32) -> (i32, i32) {
    %c0_i32 = arith.constant 0 : i32
    %c0_i32_0 = arith.constant 0 : i32
    %c0_i32_1 = arith.constant 0 : i32
    return %c0_i32, %c0_i32_0 : i32, i32
  }
  func.func @transform_7(%arg0: i32) -> (i32, i32) {
    %c0_i32 = arith.constant 0 : i32
    %c0_i32_0 = arith.constant 0 : i32
    %c0_i32_1 = arith.constant 0 : i32
    return %c0_i32, %c0_i32_0 : i32, i32
  }
  func.func @transform_8(%arg0: i32) -> (i32, i32) {
    %c0_i32 = arith.constant 0 : i32
    %c0_i32_0 = arith.constant 0 : i32
    %c0_i32_1 = arith.constant 0 : i32
    return %c0_i32, %c0_i32_0 : i32, i32
  }
  func.func @transform_9(%arg0: i32) -> (i32, i32) {
    %c0_i32 = arith.constant 0 : i32
    %c0_i32_0 = arith.constant 0 : i32
    %c0_i32_1 = arith.constant 0 : i32
    return %c0_i32, %c0_i32_0 : i32, i32
  }
  func.func @transform_10(%arg0: i32) -> (i32, i32) {
    %c0_i32 = arith.constant 0 : i32
    %c0_i32_0 = arith.constant 0 : i32
    %c0_i32_1 = arith.constant 0 : i32
    return %c0_i32, %c0_i32_0 : i32, i32
  }
  func.func @transform_11(%arg0: i32) -> (i32, i32) {
    %c0_i32 = arith.constant 0 : i32
    %c0_i32_0 = arith.constant 0 : i32
    %c0_i32_1 = arith.constant 0 : i32
    return %c0_i32, %c0_i32_0 : i32, i32
  }
  func.func @transform_12(%arg0: i32) -> (i32, i32) {
    %c0_i32 = arith.constant 0 : i32
    %c0_i32_0 = arith.constant 0 : i32
    %c0_i32_1 = arith.constant 0 : i32
    return %c0_i32, %c0_i32_0 : i32, i32
  }
  func.func @transform_13(%arg0: i32) -> (i32, i32) {
    %c0_i32 = arith.constant 0 : i32
    %c0_i32_0 = arith.constant 0 : i32
    %c0_i32_1 = arith.constant 0 : i32
    return %c0_i32, %c0_i32_0 : i32, i32
  }
  func.func @transform_14(%arg0: i32) -> (i32, i32) {
    %c0_i32 = arith.constant 0 : i32
    %c0_i32_0 = arith.constant 0 : i32
    %c0_i32_1 = arith.constant 0 : i32
    return %c0_i32, %c0_i32_0 : i32, i32
  }
  func.func @transform_15(%arg0: i32) -> (i32, i32) {
    %c0_i32 = arith.constant 0 : i32
    %c0_i32_0 = arith.constant 0 : i32
    %c0_i32_1 = arith.constant 0 : i32
    return %c0_i32, %c0_i32_0 : i32, i32
  }
  func.func @transform_16(%arg0: i32) -> (i32, i32) {
    %c0_i32 = arith.constant 0 : i32
    %c0_i32_0 = arith.constant 0 : i32
    %c0_i32_1 = arith.constant 0 : i32
    return %c0_i32, %c0_i32_0 : i32, i32
  }
  func.func @transform_17(%arg0: i32) -> (i32, i32) {
    %c0_i32 = arith.constant 0 : i32
    %c0_i32_0 = arith.constant 0 : i32
    %c0_i32_1 = arith.constant 0 : i32
    return %c0_i32, %c0_i32_0 : i32, i32
  }
  func.func @transform_18(%arg0: i32) -> (i32, i32) {
    %c0_i32 = arith.constant 0 : i32
    %c0_i32_0 = arith.constant 0 : i32
    %c0_i32_1 = arith.constant 0 : i32
    return %c0_i32, %c0_i32_0 : i32, i32
  }
  func.func @transform_19(%arg0: i32) -> (i32, i32) {
    %c0_i32 = arith.constant 0 : i32
    %c0_i32_0 = arith.constant 0 : i32
    %c0_i32_1 = arith.constant 0 : i32
    return %c0_i32, %c0_i32_0 : i32, i32
  }
  func.func @transform_20(%arg0: i32) -> (i32, i32) {
    %c0_i32 = arith.constant 0 : i32
    %c0_i32_0 = arith.constant 0 : i32
    %c0_i32_1 = arith.constant 0 : i32
    return %c0_i32, %c0_i32_0 : i32, i32
  }
  func.func @transform_21(%arg0: i32) -> (i32, i32) {
    %c0_i32 = arith.constant 0 : i32
    %c0_i32_0 = arith.constant 0 : i32
    %c0_i32_1 = arith.constant 0 : i32
    return %c0_i32, %c0_i32_0 : i32, i32
  }
  func.func @transform_22(%arg0: i32) -> (i32, i32) {
    %c0_i32 = arith.constant 0 : i32
    %c0_i32_0 = arith.constant 0 : i32
    %c0_i32_1 = arith.constant 0 : i32
    return %c0_i32, %c0_i32_0 : i32, i32
  }
  func.func @transform_23(%arg0: i32) -> (i32, i32) {
    %c0_i32 = arith.constant 0 : i32
    %c0_i32_0 = arith.constant 0 : i32
    %c0_i32_1 = arith.constant 0 : i32
    return %c0_i32, %c0_i32_0 : i32, i32
  }
  func.func @transform_24(%arg0: i32) -> (i32, i32) {
    %c0_i32 = arith.constant 0 : i32
    %c0_i32_0 = arith.constant 0 : i32
    %c0_i32_1 = arith.constant 0 : i32
    return %c0_i32, %c0_i32_0 : i32, i32
  }
  func.func @transform_25(%arg0: i32) -> (i32, i32) {
    %c0_i32 = arith.constant 0 : i32
    %c0_i32_0 = arith.constant 0 : i32
    %c0_i32_1 = arith.constant 0 : i32
    return %c0_i32, %c0_i32_0 : i32, i32
  }
  func.func @transform_26(%arg0: i32) -> (i32, i32, i32) {
    %c0_i32 = arith.constant 0 : i32
    %c0_i32_0 = arith.constant 0 : i32
    %c0_i32_1 = arith.constant 0 : i32
    return %arg0, %c0_i32, %c0_i32_0 : i32, i32, i32
  }
  func.func @transform_27(%arg0: i32) -> (i32, i32, i32) {
    %c0_i32 = arith.constant 0 : i32
    %c0_i32_0 = arith.constant 0 : i32
    %c0_i32_1 = arith.constant 0 : i32
    return %arg0, %c0_i32, %c0_i32_0 : i32, i32, i32
  }
  func.func @transform_28(%arg0: i32) -> (i32, i32, i32) {
    %c0_i32 = arith.constant 0 : i32
    %c0_i32_0 = arith.constant 0 : i32
    %c0_i32_1 = arith.constant 0 : i32
    return %arg0, %c0_i32, %c0_i32_0 : i32, i32, i32
  }
}

module attributes {stable_mosaic.version = 11 : i64} {
  func.func @_layer_kernel(%arg0: i32, %arg1: memref<1x8x32xf32, #tpu.memory_space<vmem>>, %arg2: memref<1x4x32xf32, #tpu.memory_space<vmem>>, %arg3: memref<1x32x32xf32, #tpu.memory_space<vmem>>, %arg4: memref<1x1x32xf32, #tpu.memory_space<vmem>>, %arg5: memref<8x32xbf16, #tpu.memory_space<vmem>>, %arg6: memref<4x32xbf16, #tpu.memory_space<vmem>>, %arg7: memref<32x8xbf16, #tpu.memory_space<vmem>>, %arg8: memref<32x4xbf16, #tpu.memory_space<vmem>>, %arg9: memref<32x96xbf16, #tpu.memory_space<vmem>>, %arg10: memref<32x96xbf16, #tpu.memory_space<vmem>>, %arg11: memref<32x160xbf16, #tpu.memory_space<vmem>>, %arg12: memref<1x32xf32, #tpu.memory_space<vmem>>, %arg13: memref<1x64xf32, #tpu.memory_space<vmem>>, %arg14: memref<32x32xbf16, #tpu.memory_space<vmem>>, %arg15: memref<1x32xf32, #tpu.memory_space<vmem>>, %arg16: memref<1x32xf32, #tpu.memory_space<vmem>>, %arg17: memref<1x64xf32, #tpu.memory_space<vmem>>, %arg18: memref<32x32xbf16, #tpu.memory_space<vmem>>, %arg19: memref<1x32xf32, #tpu.memory_space<vmem>>, %arg20: memref<32x32xbf16, #tpu.memory_space<vmem>>, %arg21: memref<32x32xbf16, #tpu.memory_space<vmem>>, %arg22: memref<1x32xf32, #tpu.memory_space<vmem>>, %arg23: memref<1x32xbf16, #tpu.memory_space<vmem>>, %arg24: memref<1x32xbf16, #tpu.memory_space<vmem>>, %arg25: memref<1x32xbf16, #tpu.memory_space<vmem>>, %arg26: memref<1x1xf32, #tpu.memory_space<vmem>>, %arg27: memref<1x8x32xf32, #tpu.memory_space<vmem>>, %arg28: memref<1x4x32xf32, #tpu.memory_space<vmem>>, %arg29: memref<1x32x32xf32, #tpu.memory_space<vmem>>, %arg30: memref<1x1x32xf32, #tpu.memory_space<vmem>>) attributes {dimension_semantics = [#tpu.dimension_semantics<parallel>], iteration_bounds = array<i64: 2>, scalar_prefetch = 0 : i64, scratch_operands = 0 : i64, tpu.core_type = #tpu.core_type<tc>, window_params = [{transform_indices = @transform_0, window_bounds = array<i64: 1, 8, 32>}, {transform_indices = @transform_1, window_bounds = array<i64: 1, 4, 32>}, {transform_indices = @transform_2, window_bounds = array<i64: 1, 32, 32>}, {transform_indices = @transform_3, window_bounds = array<i64: 1, 1, 32>}, {pipeline_mode = #tpu.pipeline_mode<synchronous>, transform_indices = @transform_4, window_bounds = array<i64: 8, 32>}, {pipeline_mode = #tpu.pipeline_mode<synchronous>, transform_indices = @transform_5, window_bounds = array<i64: 4, 32>}, {pipeline_mode = #tpu.pipeline_mode<synchronous>, transform_indices = @transform_6, window_bounds = array<i64: 32, 8>}, {pipeline_mode = #tpu.pipeline_mode<synchronous>, transform_indices = @transform_7, window_bounds = array<i64: 32, 4>}, {pipeline_mode = #tpu.pipeline_mode<synchronous>, transform_indices = @transform_8, window_bounds = array<i64: 32, 96>}, {pipeline_mode = #tpu.pipeline_mode<synchronous>, transform_indices = @transform_9, window_bounds = array<i64: 32, 96>}, {pipeline_mode = #tpu.pipeline_mode<synchronous>, transform_indices = @transform_10, window_bounds = array<i64: 32, 160>}, {pipeline_mode = #tpu.pipeline_mode<synchronous>, transform_indices = @transform_11, window_bounds = array<i64: 1, 32>}, {pipeline_mode = #tpu.pipeline_mode<synchronous>, transform_indices = @transform_12, window_bounds = array<i64: 1, 64>}, {pipeline_mode = #tpu.pipeline_mode<synchronous>, transform_indices = @transform_13, window_bounds = array<i64: 32, 32>}, {pipeline_mode = #tpu.pipeline_mode<synchronous>, transform_indices = @transform_14, window_bounds = array<i64: 1, 32>}, {pipeline_mode = #tpu.pipeline_mode<synchronous>, transform_indices = @transform_15, window_bounds = array<i64: 1, 32>}, {pipeline_mode = #tpu.pipeline_mode<synchronous>, transform_indices = @transform_16, window_bounds = array<i64: 1, 64>}, {pipeline_mode = #tpu.pipeline_mode<synchronous>, transform_indices = @transform_17, window_bounds = array<i64: 32, 32>}, {pipeline_mode = #tpu.pipeline_mode<synchronous>, transform_indices = @transform_18, window_bounds = array<i64: 1, 32>}, {pipeline_mode = #tpu.pipeline_mode<synchronous>, transform_indices = @transform_19, window_bounds = array<i64: 32, 32>}, {pipeline_mode = #tpu.pipeline_mode<synchronous>, transform_indices = @transform_20, window_bounds = array<i64: 32, 32>}, {pipeline_mode = #tpu.pipeline_mode<synchronous>, transform_indices = @transform_21, window_bounds = array<i64: 1, 32>}, {pipeline_mode = #tpu.pipeline_mode<synchronous>, transform_indices = @transform_22, window_bounds = array<i64: 1, 32>}, {pipeline_mode = #tpu.pipeline_mode<synchronous>, transform_indices = @transform_23, window_bounds = array<i64: 1, 32>}, {pipeline_mode = #tpu.pipeline_mode<synchronous>, transform_indices = @transform_24, window_bounds = array<i64: 1, 32>}, {pipeline_mode = #tpu.pipeline_mode<synchronous>, transform_indices = @transform_25, window_bounds = array<i64: 1, 1>}, {transform_indices = @transform_26, window_bounds = array<i64: 1, 8, 32>}, {transform_indices = @transform_27, window_bounds = array<i64: 1, 4, 32>}, {transform_indices = @transform_28, window_bounds = array<i64: 1, 32, 32>}, {transform_indices = @transform_29, window_bounds = array<i64: 1, 1, 32>}]} {
    %c0 = arith.constant 0 : index
    %c0_0 = arith.constant 0 : index
    %c0_1 = arith.constant 0 : index
    %0 = vector.load %arg1[%c0, %c0_0, %c0_1] : memref<1x8x32xf32, #tpu.memory_space<vmem>>, vector<1x8x32xf32>
    %1 = vector.shape_cast %0 : vector<1x8x32xf32> to vector<8x32xf32>
    %c0_2 = arith.constant 0 : index
    %c0_3 = arith.constant 0 : index
    %c0_4 = arith.constant 0 : index
    %2 = vector.load %arg2[%c0_2, %c0_3, %c0_4] : memref<1x4x32xf32, #tpu.memory_space<vmem>>, vector<1x4x32xf32>
    %3 = vector.shape_cast %2 : vector<1x4x32xf32> to vector<4x32xf32>
    %c0_5 = arith.constant 0 : index
    %c0_6 = arith.constant 0 : index
    %c0_7 = arith.constant 0 : index
    %4 = vector.load %arg3[%c0_5, %c0_6, %c0_7] : memref<1x32x32xf32, #tpu.memory_space<vmem>>, vector<1x32x32xf32>
    %5 = vector.shape_cast %4 : vector<1x32x32xf32> to vector<32x32xf32>
    %c0_8 = arith.constant 0 : index
    %c0_9 = arith.constant 0 : index
    %c0_10 = arith.constant 0 : index
    %6 = vector.load %arg4[%c0_8, %c0_9, %c0_10] : memref<1x1x32xf32, #tpu.memory_space<vmem>>, vector<1x1x32xf32>
    %7 = vector.shape_cast %6 : vector<1x1x32xf32> to vector<1x32xf32>
    %cst = arith.constant 0.000000e+00 : f32
    %8 = vector.broadcast %cst : f32 to vector<1x32xf32>
    %9 = arith.cmpf ogt, %7, %8 : vector<1x32xf32>
    %c0_11 = arith.constant 0 : index
    %c0_12 = arith.constant 0 : index
    %10 = vector.load %arg5[%c0_11, %c0_12] : memref<8x32xbf16, #tpu.memory_space<vmem>>, vector<8x32xbf16>
    %c0_13 = arith.constant 0 : index
    %c0_14 = arith.constant 0 : index
    %11 = vector.load %arg6[%c0_13, %c0_14] : memref<4x32xbf16, #tpu.memory_space<vmem>>, vector<4x32xbf16>
    %c0_15 = arith.constant 0 : index
    %c0_16 = arith.constant 0 : index
    %12 = vector.load %arg7[%c0_15, %c0_16] : memref<32x8xbf16, #tpu.memory_space<vmem>>, vector<32x8xbf16>
    %c0_17 = arith.constant 0 : index
    %c0_18 = arith.constant 0 : index
    %13 = vector.load %arg8[%c0_17, %c0_18] : memref<32x4xbf16, #tpu.memory_space<vmem>>, vector<32x4xbf16>
    %cst_19 = arith.constant 0.000000e+00 : bf16
    %14 = vector.broadcast %cst_19 : bf16 to vector<8x32xbf16>
    %15 = arith.cmpf ogt, %10, %14 : vector<8x32xbf16>
    %16 = vector.broadcast %9 : vector<1x32xi1> to vector<8x32xi1>
    %17 = arith.andi %15, %16 : vector<8x32xi1>
    %cst_20 = arith.constant 0.000000e+00 : f32
    %cst_21 = arith.constant -1.000000e+10 : f32
    %18 = vector.broadcast %cst_20 : f32 to vector<8x32xf32>
    %19 = vector.broadcast %cst_21 : f32 to vector<8x32xf32>
    %20 = arith.select %17, %18, %19 : vector<8x32xi1>, vector<8x32xf32>
    %cst_22 = arith.constant 0.000000e+00 : bf16
    %21 = vector.broadcast %cst_22 : bf16 to vector<4x32xbf16>
    %22 = arith.cmpf ogt, %11, %21 : vector<4x32xbf16>
    %23 = vector.broadcast %9 : vector<1x32xi1> to vector<4x32xi1>
    %24 = arith.andi %22, %23 : vector<4x32xi1>
    %cst_23 = arith.constant 0.000000e+00 : f32
    %cst_24 = arith.constant -1.000000e+10 : f32
    %25 = vector.broadcast %cst_23 : f32 to vector<4x32xf32>
    %26 = vector.broadcast %cst_24 : f32 to vector<4x32xf32>
    %27 = arith.select %24, %25, %26 : vector<4x32xi1>, vector<4x32xf32>
    %28 = arith.truncf %1 : vector<8x32xf32> to vector<8x32xbf16>
    %29 = arith.truncf %3 : vector<4x32xf32> to vector<4x32xbf16>
    %30 = arith.truncf %5 : vector<32x32xf32> to vector<32x32xbf16>
    %c0_25 = arith.constant 0 : index
    %c0_26 = arith.constant 0 : index
    %31 = vector.load %arg9[%c0_25, %c0_26] : memref<32x96xbf16, #tpu.memory_space<vmem>>, vector<32x96xbf16>
    %cst_27 = arith.constant dense<0.000000e+00> : vector<4x96xf32>
    %32 = tpu.matmul %29, %31, %cst_27 {dimension_numbers = #tpu.dot_dimension_numbers<[1], [0], [0], [1], [0, 0, 1, 1], [], []>} : vector<4x32xbf16>, vector<32x96xbf16>, vector<4x96xf32> -> vector<4x96xf32>
    %c0_28 = arith.constant 0 : index
    %c0_29 = arith.constant 0 : index
    %33 = vector.load %arg10[%c0_28, %c0_29] : memref<32x96xbf16, #tpu.memory_space<vmem>>, vector<32x96xbf16>
    %cst_30 = arith.constant dense<0.000000e+00> : vector<8x96xf32>
    %34 = tpu.matmul %28, %33, %cst_30 {dimension_numbers = #tpu.dot_dimension_numbers<[1], [0], [0], [1], [0, 0, 1, 1], [], []>} : vector<8x32xbf16>, vector<32x96xbf16>, vector<8x96xf32> -> vector<8x96xf32>
    %c0_31 = arith.constant 0 : index
    %c0_32 = arith.constant 0 : index
    %35 = vector.load %arg11[%c0_31, %c0_32] : memref<32x160xbf16, #tpu.memory_space<vmem>>, vector<32x160xbf16>
    %cst_33 = arith.constant dense<0.000000e+00> : vector<32x160xf32>
    %36 = tpu.matmul %30, %35, %cst_33 {dimension_numbers = #tpu.dot_dimension_numbers<[1], [0], [0], [1], [0, 0, 1, 1], [], []>} : vector<32x32xbf16>, vector<32x160xbf16>, vector<32x160xf32> -> vector<32x160xf32>
    %37 = vector.extract_strided_slice %32 {offsets = [0, 0], sizes = [4, 32], strides = [1, 1]} : vector<4x96xf32> to vector<4x32xf32>
    %c0_34 = arith.constant 0 : index
    %c0_35 = arith.constant 0 : index
    %38 = vector.load %arg12[%c0_34, %c0_35] : memref<1x32xf32, #tpu.memory_space<vmem>>, vector<1x32xf32>
    %39 = vector.broadcast %38 : vector<1x32xf32> to vector<4x32xf32>
    %40 = arith.addf %37, %39 : vector<4x32xf32>
    %41 = vector.extract_strided_slice %32 {offsets = [0, 32], sizes = [4, 64], strides = [1, 1]} : vector<4x96xf32> to vector<4x64xf32>
    %42 = arith.truncf %41 : vector<4x64xf32> to vector<4x64xbf16>
    %43 = vector.extract_strided_slice %34 {offsets = [0, 0], sizes = [8, 32], strides = [1, 1]} : vector<8x96xf32> to vector<8x32xf32>
    %c0_36 = arith.constant 0 : index
    %c0_37 = arith.constant 0 : index
    %44 = vector.load %arg16[%c0_36, %c0_37] : memref<1x32xf32, #tpu.memory_space<vmem>>, vector<1x32xf32>
    %45 = vector.broadcast %44 : vector<1x32xf32> to vector<8x32xf32>
    %46 = arith.addf %43, %45 : vector<8x32xf32>
    %47 = vector.extract_strided_slice %34 {offsets = [0, 32], sizes = [8, 64], strides = [1, 1]} : vector<8x96xf32> to vector<8x64xf32>
    %48 = arith.truncf %47 : vector<8x64xf32> to vector<8x64xbf16>
    %49 = vector.extract_strided_slice %36 {offsets = [0, 0], sizes = [32, 64], strides = [1, 1]} : vector<32x160xf32> to vector<32x64xf32>
    %50 = vector.extract_strided_slice %36 {offsets = [0, 64], sizes = [32, 64], strides = [1, 1]} : vector<32x160xf32> to vector<32x64xf32>
    %51 = vector.extract_strided_slice %36 {offsets = [0, 128], sizes = [32, 32], strides = [1, 1]} : vector<32x160xf32> to vector<32x32xf32>
    %cst_38 = arith.constant dense<0.000000e+00> : vector<32x64xf32>
    %52 = tpu.matmul %12, %48, %cst_38 {dimension_numbers = #tpu.dot_dimension_numbers<[1], [0], [0], [1], [0, 0, 1, 1], [], []>} : vector<32x8xbf16>, vector<8x64xbf16>, vector<32x64xf32> -> vector<32x64xf32>
    %53 = arith.addf %52, %49 : vector<32x64xf32>
    %c0_39 = arith.constant 0 : index
    %c0_40 = arith.constant 0 : index
    %54 = vector.load %arg13[%c0_39, %c0_40] : memref<1x64xf32, #tpu.memory_space<vmem>>, vector<1x64xf32>
    %55 = vector.broadcast %54 : vector<1x64xf32> to vector<32x64xf32>
    %56 = arith.addf %53, %55 : vector<32x64xf32>
    %57 = vector.extract_strided_slice %56 {offsets = [0, 0], sizes = [32, 32], strides = [1, 1]} : vector<32x64xf32> to vector<32x32xf32>
    %58 = vector.extract_strided_slice %56 {offsets = [0, 32], sizes = [32, 32], strides = [1, 1]} : vector<32x64xf32> to vector<32x32xf32>
    %c0_41 = arith.constant 0 : index
    %c0_42 = arith.constant 0 : index
    %59 = vector.load %arg14[%c0_41, %c0_42] : memref<32x32xbf16, #tpu.memory_space<vmem>>, vector<32x32xbf16>
    %c0_43 = arith.constant 0 : index
    %c0_44 = arith.constant 0 : index
    %60 = vector.load %arg15[%c0_43, %c0_44] : memref<1x32xf32, #tpu.memory_space<vmem>>, vector<1x32xf32>
    %cst_45 = arith.constant 0.176776692 : f32
    %61 = vector.broadcast %cst_45 : f32 to vector<4x32xf32>
    %62 = arith.mulf %40, %61 : vector<4x32xf32>
    %63 = arith.truncf %62 : vector<4x32xf32> to vector<4x32xbf16>
    %64 = arith.truncf %57 : vector<32x32xf32> to vector<32x32xbf16>
    %65 = arith.truncf %58 : vector<32x32xf32> to vector<32x32xbf16>
    %66 = vector.extract_strided_slice %63 {offsets = [0, 0], sizes = [4, 8], strides = [1, 1]} : vector<4x32xbf16> to vector<4x8xbf16>
    %67 = vector.extract_strided_slice %64 {offsets = [0, 0], sizes = [32, 8], strides = [1, 1]} : vector<32x32xbf16> to vector<32x8xbf16>
    %cst_46 = arith.constant dense<0.000000e+00> : vector<4x32xf32>
    %68 = tpu.matmul %66, %67, %cst_46 {dimension_numbers = #tpu.dot_dimension_numbers<[1], [1], [0], [0], [0, 0, 1, 0], [], []>} : vector<4x8xbf16>, vector<32x8xbf16>, vector<4x32xf32> -> vector<4x32xf32>
    %69 = arith.addf %68, %27 : vector<4x32xf32>
    %cst_47 = arith.constant dense<0xFF800000> : vector<4xf32>
    %70 = vector.multi_reduction <maximumf>, %69, %cst_47 [1] : vector<4x32xf32> to vector<4xf32>
    %71 = vector.shape_cast %70 : vector<4xf32> to vector<4x1xf32>
    %72 = vector.broadcast %71 : vector<4x1xf32> to vector<4x32xf32>
    %73 = arith.subf %69, %72 : vector<4x32xf32>
    %74 = math.exp %73 : vector<4x32xf32>
    %cst_48 = arith.constant dense<0.000000e+00> : vector<4xf32>
    %75 = vector.multi_reduction <add>, %74, %cst_48 [1] : vector<4x32xf32> to vector<4xf32>
    %76 = vector.shape_cast %75 : vector<4xf32> to vector<4x1xf32>
    %77 = tpu.reciprocal %76 {approx = true} : vector<4x1xf32> -> vector<4x1xf32>
    %78 = vector.broadcast %77 : vector<4x1xf32> to vector<4x32xf32>
    %79 = arith.mulf %74, %78 : vector<4x32xf32>
    %80 = arith.truncf %79 : vector<4x32xf32> to vector<4x32xbf16>
    %81 = vector.extract_strided_slice %65 {offsets = [0, 0], sizes = [32, 8], strides = [1, 1]} : vector<32x32xbf16> to vector<32x8xbf16>
    %cst_49 = arith.constant dense<0.000000e+00> : vector<4x8xf32>
    %82 = tpu.matmul %80, %81, %cst_49 {dimension_numbers = #tpu.dot_dimension_numbers<[1], [0], [0], [1], [0, 0, 1, 1], [], []>} : vector<4x32xbf16>, vector<32x8xbf16>, vector<4x8xf32> -> vector<4x8xf32>
    %83 = vector.extract_strided_slice %63 {offsets = [0, 8], sizes = [4, 8], strides = [1, 1]} : vector<4x32xbf16> to vector<4x8xbf16>
    %84 = vector.extract_strided_slice %64 {offsets = [0, 8], sizes = [32, 8], strides = [1, 1]} : vector<32x32xbf16> to vector<32x8xbf16>
    %cst_50 = arith.constant dense<0.000000e+00> : vector<4x32xf32>
    %85 = tpu.matmul %83, %84, %cst_50 {dimension_numbers = #tpu.dot_dimension_numbers<[1], [1], [0], [0], [0, 0, 1, 0], [], []>} : vector<4x8xbf16>, vector<32x8xbf16>, vector<4x32xf32> -> vector<4x32xf32>
    %86 = arith.addf %85, %27 : vector<4x32xf32>
    %cst_51 = arith.constant dense<0xFF800000> : vector<4xf32>
    %87 = vector.multi_reduction <maximumf>, %86, %cst_51 [1] : vector<4x32xf32> to vector<4xf32>
    %88 = vector.shape_cast %87 : vector<4xf32> to vector<4x1xf32>
    %89 = vector.broadcast %88 : vector<4x1xf32> to vector<4x32xf32>
    %90 = arith.subf %86, %89 : vector<4x32xf32>
    %91 = math.exp %90 : vector<4x32xf32>
    %cst_52 = arith.constant dense<0.000000e+00> : vector<4xf32>
    %92 = vector.multi_reduction <add>, %91, %cst_52 [1] : vector<4x32xf32> to vector<4xf32>
    %93 = vector.shape_cast %92 : vector<4xf32> to vector<4x1xf32>
    %94 = tpu.reciprocal %93 {approx = true} : vector<4x1xf32> -> vector<4x1xf32>
    %95 = vector.broadcast %94 : vector<4x1xf32> to vector<4x32xf32>
    %96 = arith.mulf %91, %95 : vector<4x32xf32>
    %97 = arith.truncf %96 : vector<4x32xf32> to vector<4x32xbf16>
    %98 = vector.extract_strided_slice %65 {offsets = [0, 8], sizes = [32, 8], strides = [1, 1]} : vector<32x32xbf16> to vector<32x8xbf16>
    %cst_53 = arith.constant dense<0.000000e+00> : vector<4x8xf32>
    %99 = tpu.matmul %97, %98, %cst_53 {dimension_numbers = #tpu.dot_dimension_numbers<[1], [0], [0], [1], [0, 0, 1, 1], [], []>} : vector<4x32xbf16>, vector<32x8xbf16>, vector<4x8xf32> -> vector<4x8xf32>
    %100 = vector.extract_strided_slice %63 {offsets = [0, 16], sizes = [4, 8], strides = [1, 1]} : vector<4x32xbf16> to vector<4x8xbf16>
    %101 = vector.extract_strided_slice %64 {offsets = [0, 16], sizes = [32, 8], strides = [1, 1]} : vector<32x32xbf16> to vector<32x8xbf16>
    %cst_54 = arith.constant dense<0.000000e+00> : vector<4x32xf32>
    %102 = tpu.matmul %100, %101, %cst_54 {dimension_numbers = #tpu.dot_dimension_numbers<[1], [1], [0], [0], [0, 0, 1, 0], [], []>} : vector<4x8xbf16>, vector<32x8xbf16>, vector<4x32xf32> -> vector<4x32xf32>
    %103 = arith.addf %102, %27 : vector<4x32xf32>
    %cst_55 = arith.constant dense<0xFF800000> : vector<4xf32>
    %104 = vector.multi_reduction <maximumf>, %103, %cst_55 [1] : vector<4x32xf32> to vector<4xf32>
    %105 = vector.shape_cast %104 : vector<4xf32> to vector<4x1xf32>
    %106 = vector.broadcast %105 : vector<4x1xf32> to vector<4x32xf32>
    %107 = arith.subf %103, %106 : vector<4x32xf32>
    %108 = math.exp %107 : vector<4x32xf32>
    %cst_56 = arith.constant dense<0.000000e+00> : vector<4xf32>
    %109 = vector.multi_reduction <add>, %108, %cst_56 [1] : vector<4x32xf32> to vector<4xf32>
    %110 = vector.shape_cast %109 : vector<4xf32> to vector<4x1xf32>
    %111 = tpu.reciprocal %110 {approx = true} : vector<4x1xf32> -> vector<4x1xf32>
    %112 = vector.broadcast %111 : vector<4x1xf32> to vector<4x32xf32>
    %113 = arith.mulf %108, %112 : vector<4x32xf32>
    %114 = arith.truncf %113 : vector<4x32xf32> to vector<4x32xbf16>
    %115 = vector.extract_strided_slice %65 {offsets = [0, 16], sizes = [32, 8], strides = [1, 1]} : vector<32x32xbf16> to vector<32x8xbf16>
    %cst_57 = arith.constant dense<0.000000e+00> : vector<4x8xf32>
    %116 = tpu.matmul %114, %115, %cst_57 {dimension_numbers = #tpu.dot_dimension_numbers<[1], [0], [0], [1], [0, 0, 1, 1], [], []>} : vector<4x32xbf16>, vector<32x8xbf16>, vector<4x8xf32> -> vector<4x8xf32>
    %117 = vector.extract_strided_slice %63 {offsets = [0, 24], sizes = [4, 8], strides = [1, 1]} : vector<4x32xbf16> to vector<4x8xbf16>
    %118 = vector.extract_strided_slice %64 {offsets = [0, 24], sizes = [32, 8], strides = [1, 1]} : vector<32x32xbf16> to vector<32x8xbf16>
    %cst_58 = arith.constant dense<0.000000e+00> : vector<4x32xf32>
    %119 = tpu.matmul %117, %118, %cst_58 {dimension_numbers = #tpu.dot_dimension_numbers<[1], [1], [0], [0], [0, 0, 1, 0], [], []>} : vector<4x8xbf16>, vector<32x8xbf16>, vector<4x32xf32> -> vector<4x32xf32>
    %120 = arith.addf %119, %27 : vector<4x32xf32>
    %cst_59 = arith.constant dense<0xFF800000> : vector<4xf32>
    %121 = vector.multi_reduction <maximumf>, %120, %cst_59 [1] : vector<4x32xf32> to vector<4xf32>
    %122 = vector.shape_cast %121 : vector<4xf32> to vector<4x1xf32>
    %123 = vector.broadcast %122 : vector<4x1xf32> to vector<4x32xf32>
    %124 = arith.subf %120, %123 : vector<4x32xf32>
    %125 = math.exp %124 : vector<4x32xf32>
    %cst_60 = arith.constant dense<0.000000e+00> : vector<4xf32>
    %126 = vector.multi_reduction <add>, %125, %cst_60 [1] : vector<4x32xf32> to vector<4xf32>
    %127 = vector.shape_cast %126 : vector<4xf32> to vector<4x1xf32>
    %128 = tpu.reciprocal %127 {approx = true} : vector<4x1xf32> -> vector<4x1xf32>
    %129 = vector.broadcast %128 : vector<4x1xf32> to vector<4x32xf32>
    %130 = arith.mulf %125, %129 : vector<4x32xf32>
    %131 = arith.truncf %130 : vector<4x32xf32> to vector<4x32xbf16>
    %132 = vector.extract_strided_slice %65 {offsets = [0, 24], sizes = [32, 8], strides = [1, 1]} : vector<32x32xbf16> to vector<32x8xbf16>
    %cst_61 = arith.constant dense<0.000000e+00> : vector<4x8xf32>
    %133 = tpu.matmul %131, %132, %cst_61 {dimension_numbers = #tpu.dot_dimension_numbers<[1], [0], [0], [1], [0, 0, 1, 1], [], []>} : vector<4x32xbf16>, vector<32x8xbf16>, vector<4x8xf32> -> vector<4x8xf32>
    %134 = tpu.concatenate %82, %99, %116, %133 in 1 : vector<4x8xf32>, vector<4x8xf32>, vector<4x8xf32>, vector<4x8xf32> -> vector<4x32xf32>
    %135 = arith.addf %40, %134 : vector<4x32xf32>
    %136 = arith.truncf %135 : vector<4x32xf32> to vector<4x32xbf16>
    %cst_62 = arith.constant dense<0.000000e+00> : vector<4x32xf32>
    %137 = tpu.matmul %136, %59, %cst_62 {dimension_numbers = #tpu.dot_dimension_numbers<[1], [0], [0], [1], [0, 0, 1, 1], [], []>} : vector<4x32xbf16>, vector<32x32xbf16>, vector<4x32xf32> -> vector<4x32xf32>
    %138 = vector.broadcast %60 : vector<1x32xf32> to vector<4x32xf32>
    %139 = arith.addf %137, %138 : vector<4x32xf32>
    %cst_63 = arith.constant 0.000000e+00 : f32
    %140 = vector.broadcast %cst_63 : f32 to vector<4x32xf32>
    %141 = arith.maximumf %139, %140 : vector<4x32xf32>
    %142 = arith.addf %135, %141 : vector<4x32xf32>
    %cst_64 = arith.constant dense<0.000000e+00> : vector<32x64xf32>
    %143 = tpu.matmul %13, %42, %cst_64 {dimension_numbers = #tpu.dot_dimension_numbers<[1], [0], [0], [1], [0, 0, 1, 1], [], []>} : vector<32x4xbf16>, vector<4x64xbf16>, vector<32x64xf32> -> vector<32x64xf32>
    %144 = arith.addf %143, %50 : vector<32x64xf32>
    %c0_65 = arith.constant 0 : index
    %c0_66 = arith.constant 0 : index
    %145 = vector.load %arg17[%c0_65, %c0_66] : memref<1x64xf32, #tpu.memory_space<vmem>>, vector<1x64xf32>
    %146 = vector.broadcast %145 : vector<1x64xf32> to vector<32x64xf32>
    %147 = arith.addf %144, %146 : vector<32x64xf32>
    %148 = vector.extract_strided_slice %147 {offsets = [0, 0], sizes = [32, 32], strides = [1, 1]} : vector<32x64xf32> to vector<32x32xf32>
    %149 = vector.extract_strided_slice %147 {offsets = [0, 32], sizes = [32, 32], strides = [1, 1]} : vector<32x64xf32> to vector<32x32xf32>
    %c0_67 = arith.constant 0 : index
    %c0_68 = arith.constant 0 : index
    %150 = vector.load %arg18[%c0_67, %c0_68] : memref<32x32xbf16, #tpu.memory_space<vmem>>, vector<32x32xbf16>
    %c0_69 = arith.constant 0 : index
    %c0_70 = arith.constant 0 : index
    %151 = vector.load %arg19[%c0_69, %c0_70] : memref<1x32xf32, #tpu.memory_space<vmem>>, vector<1x32xf32>
    %cst_71 = arith.constant 0.176776692 : f32
    %152 = vector.broadcast %cst_71 : f32 to vector<8x32xf32>
    %153 = arith.mulf %46, %152 : vector<8x32xf32>
    %154 = arith.truncf %153 : vector<8x32xf32> to vector<8x32xbf16>
    %155 = arith.truncf %148 : vector<32x32xf32> to vector<32x32xbf16>
    %156 = arith.truncf %149 : vector<32x32xf32> to vector<32x32xbf16>
    %157 = vector.extract_strided_slice %154 {offsets = [0, 0], sizes = [8, 8], strides = [1, 1]} : vector<8x32xbf16> to vector<8x8xbf16>
    %158 = vector.extract_strided_slice %155 {offsets = [0, 0], sizes = [32, 8], strides = [1, 1]} : vector<32x32xbf16> to vector<32x8xbf16>
    %cst_72 = arith.constant dense<0.000000e+00> : vector<8x32xf32>
    %159 = tpu.matmul %157, %158, %cst_72 {dimension_numbers = #tpu.dot_dimension_numbers<[1], [1], [0], [0], [0, 0, 1, 0], [], []>} : vector<8x8xbf16>, vector<32x8xbf16>, vector<8x32xf32> -> vector<8x32xf32>
    %160 = arith.addf %159, %20 : vector<8x32xf32>
    %cst_73 = arith.constant dense<0xFF800000> : vector<8xf32>
    %161 = vector.multi_reduction <maximumf>, %160, %cst_73 [1] : vector<8x32xf32> to vector<8xf32>
    %162 = vector.shape_cast %161 : vector<8xf32> to vector<8x1xf32>
    %163 = vector.broadcast %162 : vector<8x1xf32> to vector<8x32xf32>
    %164 = arith.subf %160, %163 : vector<8x32xf32>
    %165 = math.exp %164 : vector<8x32xf32>
    %cst_74 = arith.constant dense<0.000000e+00> : vector<8xf32>
    %166 = vector.multi_reduction <add>, %165, %cst_74 [1] : vector<8x32xf32> to vector<8xf32>
    %167 = vector.shape_cast %166 : vector<8xf32> to vector<8x1xf32>
    %168 = tpu.reciprocal %167 {approx = true} : vector<8x1xf32> -> vector<8x1xf32>
    %169 = vector.broadcast %168 : vector<8x1xf32> to vector<8x32xf32>
    %170 = arith.mulf %165, %169 : vector<8x32xf32>
    %171 = arith.truncf %170 : vector<8x32xf32> to vector<8x32xbf16>
    %172 = vector.extract_strided_slice %156 {offsets = [0, 0], sizes = [32, 8], strides = [1, 1]} : vector<32x32xbf16> to vector<32x8xbf16>
    %cst_75 = arith.constant dense<0.000000e+00> : vector<8x8xf32>
    %173 = tpu.matmul %171, %172, %cst_75 {dimension_numbers = #tpu.dot_dimension_numbers<[1], [0], [0], [1], [0, 0, 1, 1], [], []>} : vector<8x32xbf16>, vector<32x8xbf16>, vector<8x8xf32> -> vector<8x8xf32>
    %174 = vector.extract_strided_slice %154 {offsets = [0, 8], sizes = [8, 8], strides = [1, 1]} : vector<8x32xbf16> to vector<8x8xbf16>
    %175 = vector.extract_strided_slice %155 {offsets = [0, 8], sizes = [32, 8], strides = [1, 1]} : vector<32x32xbf16> to vector<32x8xbf16>
    %cst_76 = arith.constant dense<0.000000e+00> : vector<8x32xf32>
    %176 = tpu.matmul %174, %175, %cst_76 {dimension_numbers = #tpu.dot_dimension_numbers<[1], [1], [0], [0], [0, 0, 1, 0], [], []>} : vector<8x8xbf16>, vector<32x8xbf16>, vector<8x32xf32> -> vector<8x32xf32>
    %177 = arith.addf %176, %20 : vector<8x32xf32>
    %cst_77 = arith.constant dense<0xFF800000> : vector<8xf32>
    %178 = vector.multi_reduction <maximumf>, %177, %cst_77 [1] : vector<8x32xf32> to vector<8xf32>
    %179 = vector.shape_cast %178 : vector<8xf32> to vector<8x1xf32>
    %180 = vector.broadcast %179 : vector<8x1xf32> to vector<8x32xf32>
    %181 = arith.subf %177, %180 : vector<8x32xf32>
    %182 = math.exp %181 : vector<8x32xf32>
    %cst_78 = arith.constant dense<0.000000e+00> : vector<8xf32>
    %183 = vector.multi_reduction <add>, %182, %cst_78 [1] : vector<8x32xf32> to vector<8xf32>
    %184 = vector.shape_cast %183 : vector<8xf32> to vector<8x1xf32>
    %185 = tpu.reciprocal %184 {approx = true} : vector<8x1xf32> -> vector<8x1xf32>
    %186 = vector.broadcast %185 : vector<8x1xf32> to vector<8x32xf32>
    %187 = arith.mulf %182, %186 : vector<8x32xf32>
    %188 = arith.truncf %187 : vector<8x32xf32> to vector<8x32xbf16>
    %189 = vector.extract_strided_slice %156 {offsets = [0, 8], sizes = [32, 8], strides = [1, 1]} : vector<32x32xbf16> to vector<32x8xbf16>
    %cst_79 = arith.constant dense<0.000000e+00> : vector<8x8xf32>
    %190 = tpu.matmul %188, %189, %cst_79 {dimension_numbers = #tpu.dot_dimension_numbers<[1], [0], [0], [1], [0, 0, 1, 1], [], []>} : vector<8x32xbf16>, vector<32x8xbf16>, vector<8x8xf32> -> vector<8x8xf32>
    %191 = vector.extract_strided_slice %154 {offsets = [0, 16], sizes = [8, 8], strides = [1, 1]} : vector<8x32xbf16> to vector<8x8xbf16>
    %192 = vector.extract_strided_slice %155 {offsets = [0, 16], sizes = [32, 8], strides = [1, 1]} : vector<32x32xbf16> to vector<32x8xbf16>
    %cst_80 = arith.constant dense<0.000000e+00> : vector<8x32xf32>
    %193 = tpu.matmul %191, %192, %cst_80 {dimension_numbers = #tpu.dot_dimension_numbers<[1], [1], [0], [0], [0, 0, 1, 0], [], []>} : vector<8x8xbf16>, vector<32x8xbf16>, vector<8x32xf32> -> vector<8x32xf32>
    %194 = arith.addf %193, %20 : vector<8x32xf32>
    %cst_81 = arith.constant dense<0xFF800000> : vector<8xf32>
    %195 = vector.multi_reduction <maximumf>, %194, %cst_81 [1] : vector<8x32xf32> to vector<8xf32>
    %196 = vector.shape_cast %195 : vector<8xf32> to vector<8x1xf32>
    %197 = vector.broadcast %196 : vector<8x1xf32> to vector<8x32xf32>
    %198 = arith.subf %194, %197 : vector<8x32xf32>
    %199 = math.exp %198 : vector<8x32xf32>
    %cst_82 = arith.constant dense<0.000000e+00> : vector<8xf32>
    %200 = vector.multi_reduction <add>, %199, %cst_82 [1] : vector<8x32xf32> to vector<8xf32>
    %201 = vector.shape_cast %200 : vector<8xf32> to vector<8x1xf32>
    %202 = tpu.reciprocal %201 {approx = true} : vector<8x1xf32> -> vector<8x1xf32>
    %203 = vector.broadcast %202 : vector<8x1xf32> to vector<8x32xf32>
    %204 = arith.mulf %199, %203 : vector<8x32xf32>
    %205 = arith.truncf %204 : vector<8x32xf32> to vector<8x32xbf16>
    %206 = vector.extract_strided_slice %156 {offsets = [0, 16], sizes = [32, 8], strides = [1, 1]} : vector<32x32xbf16> to vector<32x8xbf16>
    %cst_83 = arith.constant dense<0.000000e+00> : vector<8x8xf32>
    %207 = tpu.matmul %205, %206, %cst_83 {dimension_numbers = #tpu.dot_dimension_numbers<[1], [0], [0], [1], [0, 0, 1, 1], [], []>} : vector<8x32xbf16>, vector<32x8xbf16>, vector<8x8xf32> -> vector<8x8xf32>
    %208 = vector.extract_strided_slice %154 {offsets = [0, 24], sizes = [8, 8], strides = [1, 1]} : vector<8x32xbf16> to vector<8x8xbf16>
    %209 = vector.extract_strided_slice %155 {offsets = [0, 24], sizes = [32, 8], strides = [1, 1]} : vector<32x32xbf16> to vector<32x8xbf16>
    %cst_84 = arith.constant dense<0.000000e+00> : vector<8x32xf32>
    %210 = tpu.matmul %208, %209, %cst_84 {dimension_numbers = #tpu.dot_dimension_numbers<[1], [1], [0], [0], [0, 0, 1, 0], [], []>} : vector<8x8xbf16>, vector<32x8xbf16>, vector<8x32xf32> -> vector<8x32xf32>
    %211 = arith.addf %210, %20 : vector<8x32xf32>
    %cst_85 = arith.constant dense<0xFF800000> : vector<8xf32>
    %212 = vector.multi_reduction <maximumf>, %211, %cst_85 [1] : vector<8x32xf32> to vector<8xf32>
    %213 = vector.shape_cast %212 : vector<8xf32> to vector<8x1xf32>
    %214 = vector.broadcast %213 : vector<8x1xf32> to vector<8x32xf32>
    %215 = arith.subf %211, %214 : vector<8x32xf32>
    %216 = math.exp %215 : vector<8x32xf32>
    %cst_86 = arith.constant dense<0.000000e+00> : vector<8xf32>
    %217 = vector.multi_reduction <add>, %216, %cst_86 [1] : vector<8x32xf32> to vector<8xf32>
    %218 = vector.shape_cast %217 : vector<8xf32> to vector<8x1xf32>
    %219 = tpu.reciprocal %218 {approx = true} : vector<8x1xf32> -> vector<8x1xf32>
    %220 = vector.broadcast %219 : vector<8x1xf32> to vector<8x32xf32>
    %221 = arith.mulf %216, %220 : vector<8x32xf32>
    %222 = arith.truncf %221 : vector<8x32xf32> to vector<8x32xbf16>
    %223 = vector.extract_strided_slice %156 {offsets = [0, 24], sizes = [32, 8], strides = [1, 1]} : vector<32x32xbf16> to vector<32x8xbf16>
    %cst_87 = arith.constant dense<0.000000e+00> : vector<8x8xf32>
    %224 = tpu.matmul %222, %223, %cst_87 {dimension_numbers = #tpu.dot_dimension_numbers<[1], [0], [0], [1], [0, 0, 1, 1], [], []>} : vector<8x32xbf16>, vector<32x8xbf16>, vector<8x8xf32> -> vector<8x8xf32>
    %225 = tpu.concatenate %173, %190, %207, %224 in 1 : vector<8x8xf32>, vector<8x8xf32>, vector<8x8xf32>, vector<8x8xf32> -> vector<8x32xf32>
    %226 = arith.addf %46, %225 : vector<8x32xf32>
    %227 = arith.truncf %226 : vector<8x32xf32> to vector<8x32xbf16>
    %cst_88 = arith.constant dense<0.000000e+00> : vector<8x32xf32>
    %228 = tpu.matmul %227, %150, %cst_88 {dimension_numbers = #tpu.dot_dimension_numbers<[1], [0], [0], [1], [0, 0, 1, 1], [], []>} : vector<8x32xbf16>, vector<32x32xbf16>, vector<8x32xf32> -> vector<8x32xf32>
    %229 = vector.broadcast %151 : vector<1x32xf32> to vector<8x32xf32>
    %230 = arith.addf %228, %229 : vector<8x32xf32>
    %cst_89 = arith.constant 0.000000e+00 : f32
    %231 = vector.broadcast %cst_89 : f32 to vector<8x32xf32>
    %232 = arith.maximumf %230, %231 : vector<8x32xf32>
    %233 = arith.addf %226, %232 : vector<8x32xf32>
    %234 = arith.truncf %142 : vector<4x32xf32> to vector<4x32xbf16>
    %c0_90 = arith.constant 0 : index
    %c0_91 = arith.constant 0 : index
    %235 = vector.load %arg20[%c0_90, %c0_91] : memref<32x32xbf16, #tpu.memory_space<vmem>>, vector<32x32xbf16>
    %cst_92 = arith.constant dense<0.000000e+00> : vector<4x32xf32>
    %236 = tpu.matmul %234, %235, %cst_92 {dimension_numbers = #tpu.dot_dimension_numbers<[1], [0], [0], [1], [0, 0, 1, 1], [], []>} : vector<4x32xbf16>, vector<32x32xbf16>, vector<4x32xf32> -> vector<4x32xf32>
    %237 = arith.truncf %236 : vector<4x32xf32> to vector<4x32xbf16>
    %238 = arith.truncf %233 : vector<8x32xf32> to vector<8x32xbf16>
    %c0_93 = arith.constant 0 : index
    %c0_94 = arith.constant 0 : index
    %239 = vector.load %arg21[%c0_93, %c0_94] : memref<32x32xbf16, #tpu.memory_space<vmem>>, vector<32x32xbf16>
    %cst_95 = arith.constant dense<0.000000e+00> : vector<8x32xf32>
    %240 = tpu.matmul %238, %239, %cst_95 {dimension_numbers = #tpu.dot_dimension_numbers<[1], [0], [0], [1], [0, 0, 1, 1], [], []>} : vector<8x32xbf16>, vector<32x32xbf16>, vector<8x32xf32> -> vector<8x32xf32>
    %241 = arith.truncf %240 : vector<8x32xf32> to vector<8x32xbf16>
    %cst_96 = arith.constant dense<0.000000e+00> : vector<32x32xf32>
    %242 = tpu.matmul %13, %237, %cst_96 {dimension_numbers = #tpu.dot_dimension_numbers<[1], [0], [0], [1], [0, 0, 1, 1], [], []>} : vector<32x4xbf16>, vector<4x32xbf16>, vector<32x32xf32> -> vector<32x32xf32>
    %cst_97 = arith.constant dense<0.000000e+00> : vector<32x32xf32>
    %243 = tpu.matmul %12, %241, %cst_97 {dimension_numbers = #tpu.dot_dimension_numbers<[1], [0], [0], [1], [0, 0, 1, 1], [], []>} : vector<32x8xbf16>, vector<8x32xbf16>, vector<32x32xf32> -> vector<32x32xf32>
    %244 = arith.addf %242, %243 : vector<32x32xf32>
    %245 = arith.addf %244, %51 : vector<32x32xf32>
    %c0_98 = arith.constant 0 : index
    %c0_99 = arith.constant 0 : index
    %246 = vector.load %arg22[%c0_98, %c0_99] : memref<1x32xf32, #tpu.memory_space<vmem>>, vector<1x32xf32>
    %247 = vector.broadcast %246 : vector<1x32xf32> to vector<32x32xf32>
    %248 = arith.addf %245, %247 : vector<32x32xf32>
    %cst_100 = arith.constant 0.000000e+00 : f32
    %249 = vector.broadcast %cst_100 : f32 to vector<32x32xf32>
    %250 = arith.maximumf %248, %249 : vector<32x32xf32>
    %251 = arith.addf %250, %5 : vector<32x32xf32>
    %c0_101 = arith.constant 0 : index
    %c0_102 = arith.constant 0 : index
    %c0_103 = arith.constant 0 : index
    %252 = vector.load %arg27[%c0_101, %c0_102, %c0_103] : memref<1x8x32xf32, #tpu.memory_space<vmem>>, vector<1x8x32xf32>
    %253 = vector.shape_cast %252 : vector<1x8x32xf32> to vector<8x32xf32>
    %254 = vector.shape_cast %233 : vector<8x32xf32> to vector<1x8x32xf32>
    tpu.vector_store %arg27[%c0_101, %c0_102, %c0_103], %254 {strides = array<i32>} : memref<1x8x32xf32, #tpu.memory_space<vmem>>, vector<1x8x32xf32>,
    %c0_104 = arith.constant 0 : index
    %c0_105 = arith.constant 0 : index
    %c0_106 = arith.constant 0 : index
    %255 = vector.load %arg28[%c0_104, %c0_105, %c0_106] : memref<1x4x32xf32, #tpu.memory_space<vmem>>, vector<1x4x32xf32>
    %256 = vector.shape_cast %255 : vector<1x4x32xf32> to vector<4x32xf32>
    %257 = vector.shape_cast %142 : vector<4x32xf32> to vector<1x4x32xf32>
    tpu.vector_store %arg28[%c0_104, %c0_105, %c0_106], %257 {strides = array<i32>} : memref<1x4x32xf32, #tpu.memory_space<vmem>>, vector<1x4x32xf32>,
    %c0_107 = arith.constant 0 : index
    %c0_108 = arith.constant 0 : index
    %c0_109 = arith.constant 0 : index
    %258 = vector.load %arg29[%c0_107, %c0_108, %c0_109] : memref<1x32x32xf32, #tpu.memory_space<vmem>>, vector<1x32x32xf32>
    %259 = vector.shape_cast %258 : vector<1x32x32xf32> to vector<32x32xf32>
    %260 = vector.shape_cast %251 : vector<32x32xf32> to vector<1x32x32xf32>
    tpu.vector_store %arg29[%c0_107, %c0_108, %c0_109], %260 {strides = array<i32>} : memref<1x32x32xf32, #tpu.memory_space<vmem>>, vector<1x32x32xf32>,
    %c0_110 = arith.constant 0 : index
    %c0_111 = arith.constant 0 : index
    %261 = vector.load %arg25[%c0_110, %c0_111] : memref<1x32xbf16, #tpu.memory_space<vmem>>, vector<1x32xbf16>
    %262 = arith.truncf %251 : vector<32x32xf32> to vector<32x32xbf16>
    %cst_112 = arith.constant dense<0.000000e+00> : vector<1x32xf32>
    %263 = tpu.matmul %261, %262, %cst_112 {dimension_numbers = #tpu.dot_dimension_numbers<[1], [1], [0], [0], [0, 0, 1, 0], [], []>} : vector<1x32xbf16>, vector<32x32xbf16>, vector<1x32xf32> -> vector<1x32xf32>
    %c0_113 = arith.constant 0 : index
    %c0_114 = arith.constant 0 : index
    %264 = vector.load %arg24[%c0_113, %c0_114] : memref<1x32xbf16, #tpu.memory_space<vmem>>, vector<1x32xbf16>
    %265 = arith.truncf %233 : vector<8x32xf32> to vector<8x32xbf16>
    %cst_115 = arith.constant dense<0.000000e+00> : vector<1x8xf32>
    %266 = tpu.matmul %264, %265, %cst_115 {dimension_numbers = #tpu.dot_dimension_numbers<[1], [1], [0], [0], [0, 0, 1, 0], [], []>} : vector<1x32xbf16>, vector<8x32xbf16>, vector<1x8xf32> -> vector<1x8xf32>
    %c0_116 = arith.constant 0 : index
    %c0_117 = arith.constant 0 : index
    %267 = vector.load %arg23[%c0_116, %c0_117] : memref<1x32xbf16, #tpu.memory_space<vmem>>, vector<1x32xbf16>
    %268 = arith.truncf %142 : vector<4x32xf32> to vector<4x32xbf16>
    %cst_118 = arith.constant dense<0.000000e+00> : vector<1x4xf32>
    %269 = tpu.matmul %267, %268, %cst_118 {dimension_numbers = #tpu.dot_dimension_numbers<[1], [1], [0], [0], [0, 0, 1, 0], [], []>} : vector<1x32xbf16>, vector<4x32xbf16>, vector<1x4xf32> -> vector<1x4xf32>
    %270 = arith.truncf %266 : vector<1x8xf32> to vector<1x8xbf16>
    %cst_119 = arith.constant dense<0.000000e+00> : vector<1x32xf32>
    %271 = tpu.matmul %270, %10, %cst_119 {dimension_numbers = #tpu.dot_dimension_numbers<[1], [0], [0], [1], [0, 0, 1, 1], [], []>} : vector<1x8xbf16>, vector<8x32xbf16>, vector<1x32xf32> -> vector<1x32xf32>
    %272 = arith.addf %263, %271 : vector<1x32xf32>
    %273 = arith.truncf %269 : vector<1x4xf32> to vector<1x4xbf16>
    %cst_120 = arith.constant dense<0.000000e+00> : vector<1x32xf32>
    %274 = tpu.matmul %273, %11, %cst_120 {dimension_numbers = #tpu.dot_dimension_numbers<[1], [0], [0], [1], [0, 0, 1, 1], [], []>} : vector<1x4xbf16>, vector<4x32xbf16>, vector<1x32xf32> -> vector<1x32xf32>
    %275 = arith.addf %272, %274 : vector<1x32xf32>
    %c0_121 = arith.constant 0 : index
    %c0_122 = arith.constant 0 : index
    %276 = vector.load %arg26[%c0_121, %c0_122] : memref<1x1xf32, #tpu.memory_space<vmem>>, vector<1x1xf32>
    %277 = vector.broadcast %276 : vector<1x1xf32> to vector<1x32xf32>
    %278 = arith.addf %275, %277 : vector<1x32xf32>
    %c0_123 = arith.constant 0 : index
    %c0_124 = arith.constant 0 : index
    %c0_125 = arith.constant 0 : index
    %279 = vector.load %arg30[%c0_123, %c0_124, %c0_125] : memref<1x1x32xf32, #tpu.memory_space<vmem>>, vector<1x1x32xf32>
    %280 = vector.shape_cast %279 : vector<1x1x32xf32> to vector<1x32xf32>
    %281 = vector.shape_cast %278 : vector<1x32xf32> to vector<1x1x32xf32>
    tpu.vector_store %arg30[%c0_123, %c0_124, %c0_125], %281 {strides = array<i32>} : memref<1x1x32xf32, #tpu.memory_space<vmem>>, vector<1x1x32xf32>,
    return
  }
  func.func @transform_0(%arg0: i32) -> (i32, i32, i32) {
    %c0_i32 = arith.constant 0 : i32
    %c0_i32_0 = arith.constant 0 : i32
    %c0_i32_1 = arith.constant 0 : i32
    return %arg0, %c0_i32, %c0_i32_0 : i32, i32, i32
  }
  func.func @transform_1(%arg0: i32) -> (i32, i32, i32) {
    %c0_i32 = arith.constant 0 : i32
    %c0_i32_0 = arith.constant 0 : i32
    %c0_i32_1 = arith.constant 0 : i32
    return %arg0, %c0_i32, %c0_i32_0 : i32, i32, i32
  }
  func.func @transform_2(%arg0: i32) -> (i32, i32, i32) {
    %c0_i32 = arith.constant 0 : i32
    %c0_i32_0 = arith.constant 0 : i32
    %c0_i32_1 = arith.constant 0 : i32
    return %arg0, %c0_i32, %c0_i32_0 : i32, i32, i32
  }
  func.func @transform_3(%arg0: i32) -> (i32, i32, i32) {
    %c0_i32 = arith.constant 0 : i32
    %c0_i32_0 = arith.constant 0 : i32
    %c0_i32_1 = arith.constant 0 : i32
    return %arg0, %c0_i32, %c0_i32_0 : i32, i32, i32
  }
  func.func @transform_4(%arg0: i32) -> (i32, i32) {
    %c0_i32 = arith.constant 0 : i32
    %c0_i32_0 = arith.constant 0 : i32
    %c0_i32_1 = arith.constant 0 : i32
    return %c0_i32, %c0_i32_0 : i32, i32
  }
  func.func @transform_5(%arg0: i32) -> (i32, i32) {
    %c0_i32 = arith.constant 0 : i32
    %c0_i32_0 = arith.constant 0 : i32
    %c0_i32_1 = arith.constant 0 : i32
    return %c0_i32, %c0_i32_0 : i32, i32
  }
  func.func @transform_6(%arg0: i32) -> (i32, i32) {
    %c0_i32 = arith.constant 0 : i32
    %c0_i32_0 = arith.constant 0 : i32
    %c0_i32_1 = arith.constant 0 : i32
    return %c0_i32, %c0_i32_0 : i32, i32
  }
  func.func @transform_7(%arg0: i32) -> (i32, i32) {
    %c0_i32 = arith.constant 0 : i32
    %c0_i32_0 = arith.constant 0 : i32
    %c0_i32_1 = arith.constant 0 : i32
    return %c0_i32, %c0_i32_0 : i32, i32
  }
  func.func @transform_8(%arg0: i32) -> (i32, i32) {
    %c0_i32 = arith.constant 0 : i32
    %c0_i32_0 = arith.constant 0 : i32
    %c0_i32_1 = arith.constant 0 : i32
    return %c0_i32, %c0_i32_0 : i32, i32
  }
  func.func @transform_9(%arg0: i32) -> (i32, i32) {
    %c0_i32 = arith.constant 0 : i32
    %c0_i32_0 = arith.constant 0 : i32
    %c0_i32_1 = arith.constant 0 : i32
    return %c0_i32, %c0_i32_0 : i32, i32
  }
  func.func @transform_10(%arg0: i32) -> (i32, i32) {
    %c0_i32 = arith.constant 0 : i32
    %c0_i32_0 = arith.constant 0 : i32
    %c0_i32_1 = arith.constant 0 : i32
    return %c0_i32, %c0_i32_0 : i32, i32
  }
  func.func @transform_11(%arg0: i32) -> (i32, i32) {
    %c0_i32 = arith.constant 0 : i32
    %c0_i32_0 = arith.constant 0 : i32
    %c0_i32_1 = arith.constant 0 : i32
    return %c0_i32, %c0_i32_0 : i32, i32
  }
  func.func @transform_12(%arg0: i32) -> (i32, i32) {
    %c0_i32 = arith.constant 0 : i32
    %c0_i32_0 = arith.constant 0 : i32
    %c0_i32_1 = arith.constant 0 : i32
    return %c0_i32, %c0_i32_0 : i32, i32
  }
  func.func @transform_13(%arg0: i32) -> (i32, i32) {
    %c0_i32 = arith.constant 0 : i32
    %c0_i32_0 = arith.constant 0 : i32
    %c0_i32_1 = arith.constant 0 : i32
    return %c0_i32, %c0_i32_0 : i32, i32
  }
  func.func @transform_14(%arg0: i32) -> (i32, i32) {
    %c0_i32 = arith.constant 0 : i32
    %c0_i32_0 = arith.constant 0 : i32
    %c0_i32_1 = arith.constant 0 : i32
    return %c0_i32, %c0_i32_0 : i32, i32
  }
  func.func @transform_15(%arg0: i32) -> (i32, i32) {
    %c0_i32 = arith.constant 0 : i32
    %c0_i32_0 = arith.constant 0 : i32
    %c0_i32_1 = arith.constant 0 : i32
    return %c0_i32, %c0_i32_0 : i32, i32
  }
  func.func @transform_16(%arg0: i32) -> (i32, i32) {
    %c0_i32 = arith.constant 0 : i32
    %c0_i32_0 = arith.constant 0 : i32
    %c0_i32_1 = arith.constant 0 : i32
    return %c0_i32, %c0_i32_0 : i32, i32
  }
  func.func @transform_17(%arg0: i32) -> (i32, i32) {
    %c0_i32 = arith.constant 0 : i32
    %c0_i32_0 = arith.constant 0 : i32
    %c0_i32_1 = arith.constant 0 : i32
    return %c0_i32, %c0_i32_0 : i32, i32
  }
  func.func @transform_18(%arg0: i32) -> (i32, i32) {
    %c0_i32 = arith.constant 0 : i32
    %c0_i32_0 = arith.constant 0 : i32
    %c0_i32_1 = arith.constant 0 : i32
    return %c0_i32, %c0_i32_0 : i32, i32
  }
  func.func @transform_19(%arg0: i32) -> (i32, i32) {
    %c0_i32 = arith.constant 0 : i32
    %c0_i32_0 = arith.constant 0 : i32
    %c0_i32_1 = arith.constant 0 : i32
    return %c0_i32, %c0_i32_0 : i32, i32
  }
  func.func @transform_20(%arg0: i32) -> (i32, i32) {
    %c0_i32 = arith.constant 0 : i32
    %c0_i32_0 = arith.constant 0 : i32
    %c0_i32_1 = arith.constant 0 : i32
    return %c0_i32, %c0_i32_0 : i32, i32
  }
  func.func @transform_21(%arg0: i32) -> (i32, i32) {
    %c0_i32 = arith.constant 0 : i32
    %c0_i32_0 = arith.constant 0 : i32
    %c0_i32_1 = arith.constant 0 : i32
    return %c0_i32, %c0_i32_0 : i32, i32
  }
  func.func @transform_22(%arg0: i32) -> (i32, i32) {
    %c0_i32 = arith.constant 0 : i32
    %c0_i32_0 = arith.constant 0 : i32
    %c0_i32_1 = arith.constant 0 : i32
    return %c0_i32, %c0_i32_0 : i32, i32
  }
  func.func @transform_23(%arg0: i32) -> (i32, i32) {
    %c0_i32 = arith.constant 0 : i32
    %c0_i32_0 = arith.constant 0 : i32
    %c0_i32_1 = arith.constant 0 : i32
    return %c0_i32, %c0_i32_0 : i32, i32
  }
  func.func @transform_24(%arg0: i32) -> (i32, i32) {
    %c0_i32 = arith.constant 0 : i32
    %c0_i32_0 = arith.constant 0 : i32
    %c0_i32_1 = arith.constant 0 : i32
    return %c0_i32, %c0_i32_0 : i32, i32
  }
  func.func @transform_25(%arg0: i32) -> (i32, i32) {
    %c0_i32 = arith.constant 0 : i32
    %c0_i32_0 = arith.constant 0 : i32
    %c0_i32_1 = arith.constant 0 : i32
    return %c0_i32, %c0_i32_0 : i32, i32
  }
  func.func @transform_26(%arg0: i32) -> (i32, i32, i32) {
    %c0_i32 = arith.constant 0 : i32
    %c0_i32_0 = arith.constant 0 : i32
    %c0_i32_1 = arith.constant 0 : i32
    return %arg0, %c0_i32, %c0_i32_0 : i32, i32, i32
  }
  func.func @transform_27(%arg0: i32) -> (i32, i32, i32) {
    %c0_i32 = arith.constant 0 : i32
    %c0_i32_0 = arith.constant 0 : i32
    %c0_i32_1 = arith.constant 0 : i32
    return %arg0, %c0_i32, %c0_i32_0 : i32, i32, i32
  }
  func.func @transform_28(%arg0: i32) -> (i32, i32, i32) {
    %c0_i32 = arith.constant 0 : i32
    %c0_i32_0 = arith.constant 0 : i32
    %c0_i32_1 = arith.constant 0 : i32
    return %arg0, %c0_i32, %c0_i32_0 : i32, i32, i32
  }
  func.func @transform_29(%arg0: i32) -> (i32, i32, i32) {
    %c0_i32 = arith.constant 0 : i32
    %c0_i32_0 = arith.constant 0 : i32
    %c0_i32_1 = arith.constant 0 : i32
    return %arg0, %c0_i32, %c0_i32_0 : i32, i32, i32
  }
}

</mosaic_0001>

<bundles_post_ra>
// kernel: tile.9
= control target key start
LH: loop header
LB: loop body
LE: loop exit
PB: predicated region body
PF: predicated region fallthrough
CT: control target
= control target key end

     0   :  { %s134_s10 = smov 20   ;;  %s135_s11 = smov 12   ;;  %vm63_vm0 = vcmask 31744   ;;  %vm69_vm1 = vcmask 261344   ;;  %vm75_vm2 = vcmask 228544   ;;  %vm81_vm3 = vcmask 195744   ;;  %s159_s0 = inlined_call_operand.vmem [shape: bf16[4,8,4], index: 0, kind: input, shape index: {}]   ;;  %s160_s1 = inlined_call_operand.vmem [shape: bf16[4,32], index: 1, kind: output, shape index: {}]  }
   0x1   :  { %v125_v0 = vld [vmem:[%s159_s0 + $0x8] sm:$0xff]   ;;  %v122_v1 = vld [vmem:[%s159_s0] sm:$0xff]   ;;  %s133_s0 = smov 28   ;;  %s136_s12 = smov 24   ;;  %vm87_vm4 = vcmask 162944   ;;  %vm93_vm5 = vcmask 130144  }
   0x2   :  { %v119_v2 = vunpack.c.l.bf16 %v125_v0  ;;  %v120_v3 = vunpack.c.h.bf16 %v125_v0  ;;  %v124_v4 = vunpack.c.h.bf16 %v122_v1  ;;  %v123_v5 = vunpack.c.l.bf16 %v122_v1  ;;  %s137_s13 = smov 16   ;;  %s138_s14 = smov 8  }
   0x3   :  { %s139_s15 = smov 4   ;;  %vm99_vm6 = vcmask 97344   ;;  %vm105_vm7 = vcmask 64544  }
   0x4   :  { %18 = vst [vmem:[#allocation1 + $0x18] sm:$0xff] %v120_v3 }
   0x5   :  { %33 = vst [vmem:[#allocation1 + $0x10] sm:$0xff] %v119_v2 }
   0x6   :  { %48 = vst [vmem:[#allocation1 + $0x8] sm:$0xff] %v124_v4 }
   0x7   :  { %61 = vst [vmem:[#allocation1] sm:$0xff] %v123_v5 }
   0xe   :  { %v66_v6 = vld [vmem:[#allocation1 + $0x7] ss:$8 sm:$0xf]   ;;  %v78_v7 = vld [vmem:[#allocation1 + $0x5] ss:$8 sm:$0xf]  }
   0xf   :  { %67 = vrot.lane.b32.xlu0 %v66_v6, %s133_s0  ;;  %79 = vrot.lane.b32.xlu1 %v78_v7, %s134_s10  ;;  %v90_v8 = vld [vmem:[#allocation1 + $0x3] ss:$8 sm:$0xf]   ;;  %v72_v9 = vld [vmem:[#allocation1 + $0x6] ss:$8 sm:$0xf]  }
  0x10   :  { %91 = vrot.lane.b32.xlu2 %v90_v8, %s135_s11  ;;  %v84_v10 = vld [vmem:[#allocation1 + $0x4] ss:$8 sm:$0xf]   ;;  %v96_v11 = vld [vmem:[#allocation1 + $0x2] ss:$8 sm:$0xf]  }
  0x11   :  { %v102_v12 = vld [vmem:[#allocation1 + $0x1] ss:$8 sm:$0xf]   ;;  %v62_v13 = vld [vmem:[#allocation1] ss:$8 sm:$0xf]  }
  0x12   :  { %64 = vst.msk [vmem:[#allocation0] sm:$0xf] %vm63_vm0, %v62_v13  }
  0x17   :  { %73 = vrot.lane.b32.xlu0 %v72_v9, %s136_s12  ;;  %85 = vrot.lane.b32.xlu1 %v84_v10, %s137_s13 }
  0x18   :  { %97 = vrot.lane.b32.xlu2 %v96_v11, %s138_s14 }
  0x1f   :  { %103 = vrot.lane.b32.xlu0 %v102_v12, %s139_s15 }
  0x6a   :  { %v92_v14 = vpop.permute.xlu2 %91  }
  0x72   :  { %v98_v15 = vpop.permute.xlu2 %97  }
  0x81   :  { %v68_v16 = vpop.permute.xlu0 %67   ;;  %v80_v17 = vpop.permute.xlu1 %79  }
  0x82   :  { %70 = vst.msk [vmem:[#allocation0] sm:$0xf] %vm69_vm1, %v68_v16  }
  0x89   :  { %v74_v18 = vpop.permute.xlu0 %73   ;;  %v86_v19 = vpop.permute.xlu1 %85  }
  0x8a   :  { %76 = vst.msk [vmem:[#allocation0] sm:$0xf] %vm75_vm2, %v74_v18  }
  0x8b   :  { %82 = vst.msk [vmem:[#allocation0] sm:$0xf] %vm81_vm3, %v80_v17  }
  0x8c   :  { %88 = vst.msk [vmem:[#allocation0] sm:$0xf] %vm87_vm4, %v86_v19  }
  0x8d   :  { %94 = vst.msk [vmem:[#allocation0] sm:$0xf] %vm93_vm5, %v92_v14  }
  0x8e   :  { %100 = vst.msk [vmem:[#allocation0] sm:$0xf] %vm99_vm6, %v98_v15  }
  0x91   :  { %v104_v20 = vpop.permute.xlu0 %103  }
  0x92   :  { %106 = vst.msk [vmem:[#allocation0] sm:$0xf] %vm105_vm7, %v104_v20  }
  0x99   :  { %v109_v21 = vld [vmem:[#allocation0] sm:$0xf] }
  0x9a   :  { %v110_v22 = vpack.c.bf16 0.0, %v109_v21 }
  0x9c   :  { %113 = vst [vmem:[%s160_s1] sm:$0x3] %v110_v22 }

// kernel: gratif_forward.3
= control target key start
LH: loop header
LB: loop body
LE: loop exit
PB: predicated region body
PF: predicated region fallthrough
CT: control target
= control target key end

     0   :  { %s2845_s6 = smov 1   ;;  %s2846_s10 = smov 2   ;;  %s3522_s0 = inlined_call_operand.smem [shape: u32[30], index: -1, kind: input, shape index: {}] }
   0x1   :  { %s2896_s5 = sld [smem:[%s3522_s0]]   ;;  %s2847_s14 = smov 3  }
   0x2   :  { %s2901_s9 = sld [smem:[%s3522_s0 + %s2845_s6]]   ;;  %s2848_s18 = smov 4  }
   0x3   :  { %s2906_s13 = sld [smem:[%s3522_s0 + %s2846_s10]]   ;;  %s2849_s22 = smov 5  }
   0x4   :  { %s2911_s17 = sld [smem:[%s3522_s0 + %s2847_s14]]   ;;  %s2850_s26 = smov 6  }
   0x5   :  { %s2916_s21 = sld [smem:[%s3522_s0 + %s2848_s18]]   ;;  %s2851_s30 = smov 7  }
   0x6   :  { %s2921_s25 = sld [smem:[%s3522_s0 + %s2849_s22]]   ;;  %s2852_s4 = smov 8  }
   0x7   :  { %3552 = sst [smem:[#allocation10_spill]] %s2896_s5  ;;  %s2853_s10 = smov 9  }
   0x8   :  { %3553 = sst [smem:[#allocation11_spill]] %s2901_s9  ;;  %s2854_s15 = smov 10  }
   0x9   :  { %3554 = sst [smem:[#allocation12_spill]] %s2906_s13  ;;  %s2855_s20 = smov 11  }
   0xa   :  { %3555 = sst [smem:[#allocation13_spill]] %s2911_s17  ;;  %s2857_s1 = smov 13  }
   0xb   :  { %3556 = sst [smem:[#allocation14_spill]] %s2916_s21  ;;  %s2858_s7 = smov 14  }
   0xc   :  { %3557 = sst [smem:[#allocation15_spill]] %s2921_s25  ;;  %s2860_s22 = smov 16  }
   0xd   :  { %s2926_s29 = sld [smem:[%s3522_s0 + %s2850_s26]]   ;;  %s2856_s26 = smov 12  }
   0xe   :  { %s2931_s3 = sld [smem:[%s3522_s0 + %s2851_s30]]   ;;  %s2861_s28 = smov 17  }
   0xf   :  { %s2936_s8 = sld [smem:[%s3522_s0 + %s2852_s4]]   ;;  %s2871_s16 = smov 27  }
  0x10   :  { %s2941_s14 = sld [smem:[%s3522_s0 + %s2853_s10]]   ;;  %s2870_s10 = smov 26  }
  0x11   :  { %s2946_s19 = sld [smem:[%s3522_s0 + %s2854_s15]]   ;;  %s2859_s15 = smov 15  }
  0x12   :  { %s2951_s24 = sld [smem:[%s3522_s0 + %s2855_s20]]   ;;  %s2872_s23 = smov 28  }
  0x13   :  { %s2956_s30 = sld [smem:[%s3522_s0 + %s2856_s26]]  }
  0x14   :  { %3558 = sst [smem:[#allocation16_spill]] %s2931_s3 }
  0x15   :  { %3559 = sst [smem:[#allocation17_spill]] %s2936_s8 }
  0x16   :  { %3560 = sst [smem:[#allocation18_spill]] %s2941_s14 }
  0x17   :  { %3561 = sst [smem:[#allocation19_spill]] %s2946_s19 }
  0x18   :  { %3562 = sst [smem:[#allocation20_spill]] %s2951_s24 }
  0x19   :  { %s2961_s6 = sld [smem:[%s3522_s0 + %s2857_s1]]   ;;  %s2873_s1 = smov 29  }
  0x1a   :  { %s2966_s12 = sld [smem:[%s3522_s0 + %s2858_s7]]   ;;  %s2862_s7 = smov 18  }
  0x1b   :  { %s2971_s20 = sld [smem:[%s3522_s0 + %s2859_s15]]   ;;  %s2863_s15 = smov 19  }
  0x1c   :  { %s2976_s27 = sld [smem:[%s3522_s0 + %s2860_s22]]   ;;  %s2864_s22 = smov 20  }
  0x1d   :  { %s2981_s4 = sld [smem:[%s3522_s0 + %s2861_s28]]   ;;  %s2865_s28 = smov 21  }
  0x1e   :  { %s2991_s21 = sld [smem:[%s3522_s0 + %s2863_s15]]   ;;  %s2867_s15 = smov 23  }
  0x1f   :  { %3563 = sst [smem:[#allocation21_spill]] %s2961_s6 }
  0x20   :  { %3564 = sst [smem:[#allocation22_spill]] %s2966_s12 }
  0x21   :  { %3565 = sst [smem:[#allocation23_spill]] %s2971_s20 }
  0x22   :  { %3566 = sst [smem:[#allocation24_spill]] %s2976_s27 }
  0x23   :  { %3567 = sst [smem:[#allocation25_spill]] %s2981_s4 }
  0x24   :  { %s2986_s12 = sld [smem:[%s3522_s0 + %s2862_s7]]   ;;  %s2866_s7 = smov 22  }
  0x25   :  { %3569 = sst [smem:[#allocation27_spill]] %s2991_s21 }
  0x26   :  { %s2996_s6 = sld [smem:[%s3522_s0 + %s2864_s22]]   ;;  %s2868_s22 = smov 24  }
  0x27   :  { %s3001_s4 = sld [smem:[%s3522_s0 + %s2865_s28]]   ;;  %s2869_s28 = smov 25  }
  0x28   :  { %s3011_s21 = sld [smem:[%s3522_s0 + %s2867_s15]]  }
  0x29   :  { %s3039_s20 = sld [smem:[%s3522_s0 + %s2873_s1]]  }
  0x2a   :  { %3568 = sst [smem:[#allocation26_spill]] %s2986_s12 }
  0x2b   :  { %s3006_s12 = sld [smem:[%s3522_s0 + %s2866_s7]]  }
  0x2c   :  { %3570 = sst [smem:[#allocation28_spill]] %s2996_s6 }
  0x2d   :  { %3571 = sst [smem:[#allocation29_spill]] %s3001_s4 }
  0x2e   :  { %3573 = sst [smem:[#allocation31_spill]] %s3011_s21 }
  0x2f   :  { %s3016_s6 = sld [smem:[%s3522_s0 + %s2868_s22]]  }
  0x30   :  { %s2417_s4 = sld [smem:[%s3522_s0 + %s2869_s28]]  }
  0x31   :  { %3572 = sst [smem:[#allocation30_spill]] %s3006_s12 }
  0x32   :  { %s3024_s12 = sld [smem:[%s3522_s0 + %s2870_s10]]  }
  0x33   :  { %s3029_s21 = sld [smem:[%s3522_s0 + %s2871_s16]]  }
  0x35   :  { %3574 = sst [smem:[#allocation32_spill]] %s3016_s6 }
  0x36   :  { %s3034_s6 = sld [smem:[%s3522_s0 + %s2872_s23]]   ;;  %v65_v0 = vstv %s2417_s4 }
  0x37   :  { %66 = vst [vmem:[#allocation2] sm:$0x1] %v65_v0 }
  0x38   :  { %67 = vsyncpa [#allocation4], 0 }
  0x39   :  { %69 = vsyncpa [#allocation4 + $0x1], 0 }
  0x3a   :  { %70 = vsyncpa [#allocation6], 0 }
  0x3b   :  { %72 = vsyncpa [#allocation6 + $0x1], 0  ;;  %s3041_s10 = smov 0   ;;  %s3043_s7 = smov 0  }
  0x3c   :  { %s3045_s11 = smov 0   ;;  %s3047_s16 = smov 0  }
  0x3d LB: > { %s3575_s19 = sld [smem:[#allocation19_spill]]  ;;  %s3062_s0 = sadd.s32 4294967295, %s2843_s16   ;;  %s2843_s16 = sphi %s3047_s16, %s3618_s16   ;;  %s2839_s11 = sphi %s3045_s11, %s3617_s11   ;;  %s2835_s7 = sphi %s3043_s7, %s3616_s7   ;;  %s2831_s10 = sphi %s3041_s10, %s3615_s10  }
  0x3e   : > { %s3576_s8 = sld [smem:[#allocation17_spill]]  ;;  %s3527_s4 = sadd.s32 4294967294, %s2843_s16  }
  0x3f   : > { %s3577_s3 = sld [smem:[#allocation16_spill]]  ;;  %s3066_s15 = sadd.s32 1, %s2843_s16  }
  0x40   : > { %s3578_s14 = sld [smem:[#allocation18_spill]]  ;;  %s651_s18 = sadd.s32 1, %s2839_s11 }
  0x41   : > { %s648_s23 = ssub.s32 %s2843_s16, %s3066_s15  ;;  %p661_p0 = scmp.ne.s32.totalorder %s2839_s11, %s2835_s7 }
  0x42   : > { %p649_p1 = scmp.eq.s32.totalorder %s648_s23, 0  ;;  %p662_p2 = scmp.eq.s32.totalorder %s3062_s0, 1 }
  0x43   : > { %p667_p3 = scmp.ne.s32.totalorder %s2835_s7, %s2831_s10  ;;  %p668_p4 = scmp.eq.s32.totalorder %s3527_s4, 1 }
  0x44   : > { %s3079_s22 = scalar_select %p649_p1, %s2839_s11, %s651_s18  }
  0x45   : > { %p3081_p5 = por %p662_p2, %p661_p0  ;;  %p3085_p6 = por %p668_p4, %p667_p3 }
  0x46   : > { %3579 = sst [smem:[#allocation33_spill]] %s3079_s22  ;;  %p2426_p7 = scmp.ge.s32.totalorder %s2843_s16, 1 }
  0x47   : > { %p858_p8 = scmp.lt.s32.totalorder %s2843_s16, 3 }
  0x49   : > { %p859_p9 = pnand %p2426_p7, %p858_p8 }
  0x4a   : > { %s3582_s5 = sld [smem:[#allocation10_spill]] (!%p859_p9)  ;;  %p958_p10 = scmp.lt.s32.totalorder (!%p859_p9), %s3062_s0, 1 }
  0x4b   : > { %862 = sbr.rel (%p859_p9) target bundleno = 2816 (0xb00), region = 124  ;;  %s3583_s9 = sld [smem:[#allocation11_spill]] (!%p859_p9) }
  0x4c   : > { %s3584_s13 = sld [smem:[#allocation12_spill]] (!%p859_p9) }
  0x4d   : > { %s3585_s24 = sld [smem:[#allocation20_spill]] (!%p859_p9) }
  0x4e   : > { %s3586_s17 = sld [smem:[#allocation13_spill]] (!%p859_p9) }
  0x4f   : > { %s3587_s25 = sld [smem:[#allocation15_spill]] (!%p859_p9) }
  0x50   : > { %v2570_v1 = vld [vmem:[%s3578_s14 + $0x8] sm:$0xff]  ;;  %v2569_v2 = vld [vmem:[%s3578_s14] sm:$0xff]  ;;  %s3095_s28 = scalar_select %p958_p10, %s3062_s0, 1  ;;  %vm1027_vm0 = vcmask 261120   ;;  %v2462_v6 = vld [vmem:[%s3575_s19 + $0x10] sm:$0xf] }
  0x51   : > { %1069 = vmatpush.bf16.msra.mxu1 %v2570_v1  ;;  %v2568_v5 = vld [vmem:[%s3576_s8 + $0x8] sm:$0xff]  ;;  %v2574_v7 = vld [vmem:[%s3575_s19 + $0x14] sm:$0xf0]  ;;  %v2454_v8 = vld [vmem:[%s3575_s19] sm:$0xf]  ;;  %vm1176_vm1 = vcmask 1043456  }
  0x52   : > { %s2430_s2 = sshll.u32 %s3095_s28, 3  ;;  %s2431_s23 = sshll.u32 %s3095_s28, 2  ;;  %1037 = vmatpush.bf16.msra.mxu0 %v2568_v5  ;;  %v2567_v9 = vld [vmem:[%s3576_s8] sm:$0xff]  ;;  %v2463_v11 = vor.u32 %v2574_v7, %v2462_v6  ;;  %v2572_v12 = vld [vmem:[%s3575_s19 + $0x4] sm:$0xf0]  ;;  %vm1169_vm2 = vcmask 64512  }
  0x53   : > { %s961_s18 = scalar_lea.vmem %s3582_s5, %s2430_s2  ;;  %s2562_s4 = sshll.u32 %s3095_s28, 5  ;;  %v2455_v13 = vor.u32 %v2572_v12, %v2454_v8  ;;  %v3134_v27 = vld [vmem:[%s2926_s29] sm:$0xff]  ;;  %v3139_v29 = vld [vmem:[%s2926_s29 + $0x8] sm:$0xff]  ;;  %v2877_v1 = vmov 0   ;;  %vm1250_vm7 = vcmask 257024   ;;  %vm1562_vm8 = vcmask 1041408  }
  0x54   : > { %v978_v3 = vld [vmem:[%s961_s18] sm:$0xff]  ;;  %s965_s22 = scalar_lea.vmem %s3583_s9, %s2431_s23  ;;  %s3108_s14 = scalar_lea.vmem %s3584_s13, %s2562_s4  ;;  %1112 = vmatpush.bf16.msra.mxu2 %v2463_v11  ;;  %2676 = vset.pattern.permute.xlu2 %v2877_v1  ;;  %vm1555_vm9 = vcmask 31744   ;;  %vm1487_vm12 = vcmask 130048   ;;  %vm1489_vm13 = vcmask 195584  }
  0x55   : > { %1070 = vmatpush.bf16.msra.mxu1 %v2569_v2  ;;  %v1007_v4 = vpack.c.bf16 %v978_v3, %v978_v3  ;;  %v979_v10 = vld [vmem:[%s965_s22] sm:$0xf]  ;;  %v981_v15 = vld [vmem:[%s3108_s14 + $0x8] sm:$0xff]  ;;  %s3539_s4 = smov 96   ;;  %v982_v21 = vld [vmem:[%s3108_s14 + $0x10] sm:$0xff]  ;;  %s3529_s22 = smov 112   ;;  %2677 = vset.pattern.permute.xlu0 %v2877_v1 }
  0x56   : > { %v980_v14 = vld [vmem:[%s3108_s14] sm:$0xff]  ;;  %v1008_v16 = vpack.c.bf16 %v979_v10, %v979_v10  ;;  %1038 = vmatpush.bf16.msra.mxu0 %v2567_v9  ;;  %v983_v22 = vld [vmem:[%s3108_s14 + $0x18] sm:$0xff]  ;;  %s3540_s2 = smov 120   ;;  %s973_s18 = scalar_lea.vmem %s3586_s17, %s3095_s28 }
  0x57   : > { %v3114_v17 = vpack.c.bf16 %v981_v15, %v980_v14  ;;  %v3126_v23 = vpack.c.bf16 %v983_v22, %v982_v21  ;;  %v2680_v33 = vld [vmem:[%s2956_s30] ss:$0 sm:$0xff]  ;;  %s3533_s23 = smov 104   ;;  %s3590_s27 = sld [smem:[#allocation24_spill]] }
  0x58   : > { %2451 = vmatmul.msk.bf16.vlgmr.msra.gmra.mxu1 %vm1027_vm0, %v1007_v4  ;;  %1113 = vmatpush.bf16.msra.mxu2 %v2455_v13  ;;  %v2679_v35 = vld [vmem:[%s3585_s24] ss:$0 sm:$0xff]  ;;  %s3545_s5 = smov 24   ;;  %s3608_s8 = sld [smem:[#allocation26_spill]] }
  0x59   : > { %2442 = vmatmul.msk.bf16.vlgmr.msra.gmra.mxu0 %vm1027_vm0, %v1008_v16  ;;  %v984_v5 = vld [vmem:[%s973_s18] sm:$0x1]  ;;  %s3531_s18 = smov 80   ;;  %s3611_s13 = sld [smem:[#allocation29_spill]] }
  0x5a   : > { %vm985_vm3 = vcmp.gt.f32.partialorder %v984_v5, 0.0  ;;  %v3192_v9 = vld [vmem:[%s3587_s25] sm:$0x3]  ;;  %v2571_v5 = vld [vmem:[%s3575_s19 + $0x4] sm:$0xf]  ;;  %s2556_s17 = sshll.u32 %s3062_s0, 3 }
  0x5b   : > { %2468 = vmatmul.msk.bf16.vlgmr.msra.gmra.mxu2 %vm1027_vm0, %v3114_v17  ;;  %v998_v10 = vsel %vm985_vm3, 1, %v2877_v1  ;;  %v1003_v12 = vunpack.c.l.bf16 %v3192_v9 }
  0x5c   : > { %v999_v11 = vperm.slane %v998_v10, 0 }
  0x5d   : > { %vm1004_vm5 = vcmp.gt.f32.partialorder %v1003_v12, 0.0 }
  0x5e   : > { %vm3197_vm4 = vcmp.eq.s32.totalorder %v999_v11, 1 }
  0x5f   : > { %vm1005_vm6 = vmand %vm1004_vm5, %vm3197_vm4 }
  0x6b   : > { %2469 = vmatmul.msk.bf16.gmra.mxu2 %vm1027_vm0, %v3126_v23 }
  0xd5   : > { %v3119_v18 = vpop.f32.mrf.mxu1 }
  0xd6   : > { %v1155_v19 = vpack.c.bf16 %v3119_v18, %v3119_v18  ;;  %v3130_v24 = vpop.f32.mrf.mxu0 }
  0xd7   : > { %v3151_v38 = vadd.f32 %v2679_v35, %v3130_v24 }
  0xd8   : > { %1167 = vrot.lane.b32.xlu0 %v1155_v19, %s3539_s4 }
  0xd9   : > { %v1212_v42 = vmul.f32 0.17677669, %v3151_v38 }
  0xdb   : > { %v1213_v48 = vpack.c.bf16 %v1212_v42, %v1212_v42 }
  0xdd   : > { %v1074_v20 = vpop.f32.mrf.mxu1  ;;  %v1286_v51 = vunpack.c.l.b16 %v1213_v48 }
  0xde   : > { %v1042_v28 = vpop.f32.mrf.mxu0  ;;  %v3143_v30 = vpop.f32.mrf.mxu2  ;;  %v2878_v20 = vmov -1e+10  }
  0xdf   : > { %v3165_v56 = vpack.c.b16 %v1286_v51, %v1286_v51  ;;  %v3204_v21 = vsel %vm1005_vm6, 0.0, %v2878_v20 }
  0xe6   : > { %v3147_v34 = vpop.f32.mrf.mxu2 }
  0xee   : > { %v3155_v44 = vpop.f32.mrf.mxu2 }
  0xf6   : > { %v3162_v53 = vpop.f32.mrf.mxu2 }
 0x14a   : > { %v1168_v25 = vpop.permute.xlu0 %1167 }
 0x14b   : > { %v1178_v26 = vsel %vm1176_vm1, %v1168_v25, 0 }
 0x14c   : > { %1187 = vmatpush.bf16.msrb.mxu0 %v1178_v26 }
 0x14f   : > { %2480 = vmatmul.msk.bf16.vlgmr.msrb.gmra.mxu0 %vm1169_vm2, %v3134_v27 }
 0x15f   : > { %2481 = vmatmul.msk.bf16.gmra.mxu0 %vm1169_vm2, %v3139_v29 }
 0x1cc   : > { %v1189_v31 = vpop.f32.mrf.mxu0 }
 0x1cd   : > { %v1190_v32 = vadd.f32 %v1189_v31, %v3143_v30 }
 0x1cf   : > { %v1203_v36 = vadd.f32 %v2680_v33, %v1190_v32 }
 0x1d1   : > { %v1214_v40 = vpack.c.bf16 %v1203_v36, %v1203_v36 }
 0x1d3   : > { %v1222_v45 = vunpack.c.l.b16 %v1214_v40 }
 0x1d4   : > { %v1191_v37 = vpop.f32.mrf.mxu0 }
 0x1d5   : > { %v1192_v39 = vadd.f32 %v1191_v37, %v3147_v34 }
 0x1d7   : > { %v1204_v41 = vadd.f32 %v2680_v33, %v1192_v39 }
 0x1d9   : > { %v1215_v43 = vpack.c.bf16 %v1204_v41, %v1204_v41 }
 0x1db   : > { %v1223_v46 = vunpack.c.l.b16 %v1215_v43 }
 0x1dc   : > { %v1194_v47 = vpop.f32.mrf.mxu0 }
 0x1dd   : > { %v3157_v49 = vpack.c.b16 %v1223_v46, %v1222_v45  ;;  %v1195_v50 = vadd.f32 %v1194_v47, %v3155_v44  ;;  %v1149_v47 = vpack.c.bf16 %v3130_v24, %v3130_v24 }
 0x1df   : > { %1352 = vrot.lane.b32.xlu1 %v3157_v49, %s3529_s22  ;;  %v1205_v52 = vadd.f32 %v2680_v33, %v1195_v50  ;;  %v1232_v0 = vsel %vm1169_vm2, %v3157_v49, 0 }
 0x1e1   : > { %v1216_v57 = vpack.c.bf16 %v1205_v52, %v1205_v52 }
 0x1e3   : > { %v1224_v60 = vunpack.c.l.b16 %v1216_v57 }
 0x1e4   : > { %v1196_v54 = vpop.f32.mrf.mxu0 }
 0x1e5   : > { %v1197_v55 = vadd.f32 %v1196_v54, %v3162_v53 }
 0x1e7   : > { %v1206_v58 = vadd.f32 %v2680_v33, %v1197_v55  ;;  %1350 = vrot.lane.b32.xlu1 %v3165_v56, %s3529_s22 }
 0x1e9   : > { %v1217_v59 = vpack.c.bf16 %v1206_v58, %v1206_v58 }
 0x1eb   : > { %v1225_v61 = vunpack.c.l.b16 %v1217_v59 }
 0x1ed   : > { %v3169_v62 = vpack.c.b16 %v1225_v61, %v1224_v60 }
 0x1ef   : > { %1354 = vrot.lane.b32.xlu0 %v3169_v62, %s3529_s22  ;;  %v1235_v63 = vsel %vm1169_vm2, %v3169_v62, 0  ;;  %s2881_s22 = smov 64  }
 0x1f0   : > { %1243 = vmatpush.bf16.xpose.msrb.mxu1 %v1235_v63 }
 0x1f7   : > { %1292 = vrot.lane.b32.xlu0 %v3169_v62, %s3540_s2 }
 0x1f8   : > { %1244 = vmatpush.bf16.xpose.msrb.mxu1 %v1232_v0 }
 0x1ff   : > { %1290 = vrot.lane.b32.xlu0 %v3157_v49, %s3540_s2  ;;  %2482 = vmatmul.msk.bf16.vlgmr.msrb.gmra.mxu1 %vm1169_vm2, %v1213_v48 }
 0x207   : > { %1263 = vrot.lane.b32.xlu0 %v3157_v49, %s3539_s4 }
 0x20f   : > { %1288 = vrot.lane.b32.xlu0 %v3165_v56, %s3540_s2 }
 0x251   : > { %v1353_v4 = vpop.permute.xlu1 %1352 }
 0x252   : > { %v1360_v7 = vsel %vm1169_vm2, %v1353_v4, 0 }
 0x259   : > { %v1351_v13 = vpop.permute.xlu1 %1350 }
 0x261   : > { %v1355_v2 = vpop.permute.xlu0 %1354 }
 0x262   : > { %v1363_v3 = vsel %vm1169_vm2, %v1355_v2, 0  ;;  %v2573_v2 = vld [vmem:[%s3575_s19 + $0x14] sm:$0xf] }
 0x263   : > { %1371 = vmatpush.bf16.xpose.msra.mxu0 %v1363_v3  ;;  %v2464_v3 = vld [vmem:[%s3575_s19 + $0x18] sm:$0xf0] }
 0x264   : > { %v2467_v4 = vor.u32 %v2573_v2, %v2464_v3 }
 0x266   : > { %1131 = vmatpush.bf16.msra.mxu3 %v2467_v4 }
 0x269   : > { %v1293_v6 = vpop.permute.xlu0 %1292 }
 0x26a   : > { %v1301_v8 = vsel %vm1169_vm2, %v1293_v6, 0  ;;  %v2456_v6 = vld [vmem:[%s3575_s19 + $0x8] sm:$0xf0] }
 0x26b   : > { %1309 = vmatpush.bf16.xpose.msrb.mxu2 %v1301_v8  ;;  %1372 = vmatpush.bf16.xpose.msra.mxu0 %v1360_v7  ;;  %v2459_v7 = vor.u32 %v2571_v5, %v2456_v6 }
 0x26d   : > { %1132 = vmatpush.bf16.msra.mxu3 %v2459_v7 }
 0x270   : > { %2470 = vmatmul.msk.bf16.vlgmr.msra.gmra.mxu3 %vm1027_vm0, %v3114_v17 }
 0x271   : > { %v1291_v14 = vpop.permute.xlu0 %1290 }
 0x272   : > { %2486 = vmatmul.msk.bf16.vlgmr.msra.gmra.mxu0 %vm1169_vm2, %v1351_v13  ;;  %v1298_v15 = vsel %vm1169_vm2, %v1291_v14, 0 }
 0x273   : > { %1310 = vmatpush.bf16.xpose.msrb.mxu2 %v1298_v15 }
 0x279   : > { %v1264_v19 = vpop.permute.xlu0 %1263 }
 0x27c   : > { %v1246_v22 = vpop.f32.mrf.mxu1 }
 0x27d   : > { %v1247_v25 = vadd.f32 %v1246_v22, %v3204_v21 }
 0x27f   : > { %v1251_v26 = vsel %vm1250_vm7, %v1247_v25, -inf }
 0x280   : > { %1252 = vmax.xlane.f32.xlu2 %v1251_v26  ;;  %2471 = vmatmul.msk.bf16.gmra.mxu3 %vm1027_vm0, %v3126_v23 }
 0x281   : > { %v1289_v28 = vpop.permute.xlu0 %1288 }
 0x282   : > { %2484 = vmatmul.msk.bf16.vlgmr.msrb.gmra.mxu2 %vm1169_vm2, %v1289_v28 }
 0x284   : > { %v1248_v31 = vpop.f32.mrf.mxu1 }
 0x298   : > { %1265 = vrot.lane.b32.xlu2 %v3169_v62, %s3539_s4 }
 0x2ef   : > { %v1374_v32 = vpop.f32.mrf.mxu0 }
 0x2f0   : > { %v1375_v33 = vadd.f32 %v1374_v32, %v3204_v21 }
 0x2f2   : > { %v1378_v35 = vsel %vm1250_vm7, %v1375_v33, -inf }
 0x2f3   : > { %1379 = vmax.xlane.f32.xlu2 %v1378_v35  ;;  %v1253_v36 = vpop.xlane.xlu2 %1252 }
 0x2f4   : > { %v1254_v37 = vsub.f32 %v1247_v25, %v1253_v36  ;;  %v3264_v25 = vld [vmem:[%s3577_s3] sm:$0xff] }
 0x2f6   : > { %v1255_v39 = vmul.f32 1.442695, %v1254_v37 }
 0x2f7   : > { %v1376_v40 = vpop.f32.mrf.mxu0 }
 0x2f8   : > { %2685 = vpow2.f32 %v1255_v39 }
 0x2fb   : > { %v1266_v41 = vpop.permute.xlu2 %1265 }
 0x2fc   : > { %1278 = vmatpush.bf16.msra.mxu1 %v1266_v41 }
 0x2fe   : > { %v2686_v42 = vpop.eup %2685 }
 0x2ff   : > { %v1257_v43 = vsel %vm1250_vm7, %v2686_v42, 0.0 }
 0x300   : > { %1258 = vadd.xlane.f32.xlu1 %v1257_v43  ;;  %1279 = vmatpush.bf16.msra.mxu1 %v1264_v19 }
 0x305   : > { %v1312_v45 = vpop.f32.mrf.mxu2 }
 0x306   : > { %v1313_v48 = vadd.f32 %v1312_v45, %v3204_v21 }
 0x308   : > { %v1316_v50 = vsel %vm1250_vm7, %v1313_v48, -inf }
 0x30b   : > { %1416 = vrot.lane.b32.xlu2 %v3169_v62, %s3533_s23 }
 0x30d   : > { %v1314_v46 = vpop.f32.mrf.mxu2 }
 0x313   : > { %1392 = vrot.lane.b32.xlu2 %v3169_v62, %s3531_s18 }
 0x319   : > { %1390 = vrot.lane.b32.xlu1 %v3157_v49, %s3531_s18  ;;  %s3537_s18 = smov 88  }
 0x31b   : > { %1414 = vrot.lane.b32.xlu2 %v3157_v49, %s3533_s23 }
 0x321   : > { %1547 = vrot.lane.b32.xlu1 %v3155_v44, %s2881_s22 }
 0x323   : > { %1412 = vrot.lane.b32.xlu2 %v3165_v56, %s3533_s23  ;;  %s3535_s23 = smov 72  }
 0x329   : > { %1543 = vrot.lane.b32.xlu1 %v3143_v30, %s2881_s22 }
 0x32b   : > { %1537 = vrot.lane.b32.xlu2 %v1149_v47, %s3539_s4 }
 0x331   : > { %1545 = vrot.lane.b32.xlu1 %v3147_v34, %s2881_s22 }
 0x354   : > { %1317 = vmax.xlane.f32.xlu2 %v1316_v50 }
 0x366   : > { %v1380_v44 = vpop.xlane.xlu2 %1379 }
 0x367   : > { %v1381_v51 = vsub.f32 %v1375_v33, %v1380_v44 }
 0x369   : > { %v1382_v52 = vmul.f32 1.442695, %v1381_v51 }
 0x36b   : > { %2687 = vpow2.f32 %v1382_v52 }
 0x36c   : > { %1330 = vrot.lane.b32.xlu2 %v3169_v62, %s3537_s18 }
 0x36e   : > { %v1417_v24 = vpop.permute.xlu2 %1416 }
 0x36f   : > { %v1425_v30 = vsel %vm1169_vm2, %v1417_v24, 0 }
 0x370   : > { %1433 = vmatpush.bf16.xpose.msra.mxu2 %v1425_v30 }
 0x371   : > { %v2688_v54 = vpop.eup %2687 }
 0x372   : > { %v1384_v34 = vsel %vm1250_vm7, %v2688_v54, 0.0 }
 0x373   : > { %v1259_v55 = vpop.xlane.xlu1 %1258  ;;  %1385 = vadd.xlane.f32.xlu0 %v1384_v34 }
 0x374   : > { %2689 = vrcp.f32 %v1259_v55  ;;  %1328 = vrot.lane.b32.xlu2 %v3157_v49, %s3537_s18  ;;  %v2681_v55 = vld [vmem:[%s3590_s27] ss:$0 sm:$0xff]  ;;  %s3594_s18 = smov 104  }
 0x376   : > { %v1393_v56 = vpop.permute.xlu2 %1392 }
 0x377   : > { %1405 = vmatpush.bf16.msrb.mxu1 %v1393_v56 }
 0x37a   : > { %v2690_v57 = vpop.eup %2689 }
 0x37b   : > { %v1261_v58 = vmul.f32 %v2690_v57, %v2686_v42 }
 0x37c   : > { %1452 = vrot.lane.b32.xlu2 %v3157_v49, %s3535_s23 }
 0x37d   : > { %v1262_v59 = vpack.c.bf16 %v1261_v58, %v1261_v58 }
 0x37e   : > { %v1415_v60 = vpop.permute.xlu2 %1414 }
 0x37f   : > { %v1422_v61 = vsel %vm1169_vm2, %v1415_v60, 0  ;;  %2483 = vmatmul.msk.bf16.vlgmr.msra.gmra.mxu1 %vm1027_vm0, %v1262_v59 }
 0x380   : > { %1434 = vmatpush.bf16.xpose.msra.mxu2 %v1422_v61 }
 0x386   : > { %v1413_v63 = vpop.permute.xlu2 %1412 }
 0x387   : > { %1549 = vrot.lane.b32.xlu0 %v3162_v53, %s2881_s22  ;;  %2488 = vmatmul.msk.bf16.vlgmr.msra.gmra.mxu2 %vm1169_vm2, %v1413_v63  ;;  %s3591_s22 = sld [smem:[#allocation23_spill]] }
 0x38b   : > { %v1391_v0 = vpop.permute.xlu1 %1390 }
 0x38c   : > { %1406 = vmatpush.bf16.msrb.mxu1 %v1391_v0 }
 0x38e   : > { %v1538_v49 = vpop.permute.xlu2 %1537 }
 0x38f   : > { %v1564_v1 = vsel %vm1562_vm8, %v1538_v49, 0 }
 0x390   : > { %1573 = vmatpush.bf16.msra.mxu1 %v1564_v1 }
 0x393   : > { %v1548_v42 = vpop.permute.xlu1 %1547 }
 0x39b   : > { %v1544_v43 = vpop.permute.xlu1 %1543 }
 0x3a3   : > { %v1546_v47 = vpop.permute.xlu1 %1545 }
 0x3c7   : > { %v1318_v53 = vpop.xlane.xlu2 %1317 }
 0x3c8   : > { %v1319_v8 = vsub.f32 %v1313_v48, %v1318_v53 }
 0x3ca   : > { %v1320_v10 = vmul.f32 1.442695, %v1319_v8  ;;  %v2678_v8 = vld [vmem:[%s3591_s22] ss:$0 sm:$0xff]  ;;  %s3593_s22 = smov 112  }
 0x3cc   : > { %2691 = vpow2.f32 %v1320_v10 }
 0x3cf   : > { %v1331_v11 = vpop.permute.xlu2 %1330 }
 0x3d0   : > { %1343 = vmatpush.bf16.msrb.mxu3 %v1331_v11 }
 0x3d2   : > { %v2692_v12 = vpop.eup %2691 }
 0x3d3   : > { %v1322_v13 = vsel %vm1250_vm7, %v2692_v12, 0.0 }
 0x3d4   : > { %1323 = vadd.xlane.f32.xlu0 %v1322_v13 }
 0x3d7   : > { %v1329_v14 = vpop.permute.xlu2 %1328 }
 0x3d8   : > { %1344 = vmatpush.bf16.msrb.mxu3 %v1329_v14 }
 0x3e6   : > { %v1386_v15 = vpop.xlane.xlu0 %1385 }
 0x3e7   : > { %2693 = vrcp.f32 %v1386_v15  ;;  %v3297_v15 = vpop.f32.mrf.mxu3 }
 0x3e8   : > { %1454 = vrot.lane.b32.xlu0 %v3169_v62, %s3535_s23  ;;  %v3271_v62 = vld [vmem:[%s3577_s3 + $0x8] sm:$0xff]  ;;  %s3592_s23 = sld [smem:[#allocation21_spill]]  ;;  %s3597_s3 = smov 120  }
 0x3ed   : > { %v2694_v17 = vpop.eup %2693 }
 0x3ee   : > { %v1388_v23 = vmul.f32 %v2694_v17, %v2688_v54 }
 0x3f0   : > { %v1389_v19 = vpack.c.bf16 %v1388_v23, %v1388_v23 }
 0x3f2   : > { %2487 = vmatmul.msk.bf16.vlgmr.msrb.gmra.mxu1 %vm1027_vm0, %v1389_v19 }
 0x3f9   : > { %v1550_v35 = vpop.permute.xlu0 %1549 }
 0x3fc   : > { %v3261_v22 = vpop.f32.mrf.mxu1 }
 0x402   : > { %2507 = vmatmul.msk.bf16.vlgmr.msra.gmra.mxu1 %vm1555_vm9, %v3264_v25 }
 0x404   : > { %v1283_v26 = vpop.f32.mrf.mxu1 }
 0x40a   : > { %v1436_v28 = vpop.f32.mrf.mxu2 }
 0x40b   : > { %v1437_v31 = vadd.f32 %v1436_v28, %v3204_v21  ;;  %v1453_v21 = vpop.permute.xlu2 %1452 }
 0x40d   : > { %v1440_v32 = vsel %vm1250_vm7, %v1437_v31, -inf }
 0x40e   : > { %1441 = vmax.xlane.f32.xlu1 %v1440_v32  ;;  %v2575_v32 = vld [vmem:[%s3592_s23] sm:$0xff] }
 0x412   : > { %v1438_v33 = vpop.f32.mrf.mxu2  ;;  %2508 = vmatmul.msk.bf16.gmra.mxu1 %vm1555_vm9, %v3271_v62 }
 0x447   : > { %v1324_v36 = vpop.xlane.xlu0 %1323 }
 0x448   : > { %2695 = vrcp.f32 %v1324_v36 }
 0x44e   : > { %v2696_v37 = vpop.eup %2695 }
 0x44f   : > { %v1326_v39 = vmul.f32 %v2696_v37, %v2692_v12  ;;  %v3290_v12 = vadd.f32 %v2678_v8, %v3119_v18  ;;  %v3302_v18 = vpop.f32.mrf.mxu3 }
 0x451   : > { %v1327_v40 = vpack.c.bf16 %v1326_v39, %v1326_v39  ;;  %v1598_v14 = vmul.f32 0.17677669, %v3290_v12 }
 0x453   : > { %2485 = vmatmul.msk.bf16.vlgmr.msrb.gmra.mxu3 %vm1027_vm0, %v1327_v40  ;;  %v1599_v17 = vpack.c.bf16 %v1598_v14, %v1598_v14 }
 0x455   : > { %v1671_v16 = vunpack.c.l.b16 %v1599_v17 }
 0x457   : > { %v3308_v23 = vpop.f32.mrf.mxu3 }
 0x45a   : > { %v1455_v41 = vpop.permute.xlu0 %1454 }
 0x45b   : > { %1467 = vmatpush.bf16.msra.mxu3 %v1455_v41 }
 0x45f   : > { %1468 = vmatpush.bf16.msra.mxu3 %v1453_v21  ;;  %v3312_v19 = vpop.f32.mrf.mxu3 }
 0x46f   : > { %v3276_v45 = vpop.f32.mrf.mxu1 }
 0x477   : > { %v1410_v46 = vpop.f32.mrf.mxu1 }
 0x47f   : > { %v1575_v48 = vpop.f32.mrf.mxu1 }
 0x480   : > { %v1576_v59 = vadd.f32 %v1575_v48, %v1544_v43 }
 0x481   : > { %v1442_v50 = vpop.xlane.xlu1 %1441 }
 0x482   : > { %v1443_v44 = vsub.f32 %v1437_v31, %v1442_v50  ;;  %v1589_v49 = vadd.f32 %v2681_v55, %v1576_v59  ;;  %v2576_v31 = vld [vmem:[%s3592_s23 + $0x8] sm:$0xff] }
 0x483   : > { %1517 = vmatpush.bf16.msrb.mxu0 %v2576_v31 }
 0x484   : > { %v1444_v51 = vmul.f32 1.442695, %v1443_v44  ;;  %v1600_v5 = vpack.c.bf16 %v1589_v49, %v1589_v49 }
 0x486   : > { %2697 = vpow2.f32 %v1444_v51  ;;  %v1608_v10 = vunpack.c.l.b16 %v1600_v5 }
 0x487   : > { %v1577_v52 = vpop.f32.mrf.mxu1  ;;  %1518 = vmatpush.bf16.msrb.mxu0 %v2575_v32 }
 0x488   : > { %v1578_v56 = vadd.f32 %v1577_v52, %v1546_v47 }
 0x48a   : > { %v1590_v61 = vadd.f32 %v2681_v55, %v1578_v56 }
 0x48c   : > { %v2698_v24 = vpop.eup %2697  ;;  %v1601_v2 = vpack.c.bf16 %v1590_v61, %v1590_v61 }
 0x48d   : > { %v1446_v30 = vsel %vm1250_vm7, %v2698_v24, 0.0 }
 0x48e   : > { %1447 = vadd.xlane.f32.xlu1 %v1446_v30  ;;  %v1609_v7 = vunpack.c.l.b16 %v1601_v2 }
 0x48f   : > { %v1580_v54 = vpop.f32.mrf.mxu1 }
 0x490   : > { %v1581_v34 = vadd.f32 %v1580_v54, %v1548_v42  ;;  %v3287_v11 = vpack.c.b16 %v1609_v7, %v1608_v10 }
 0x492   : > { %v1591_v57 = vadd.f32 %v2681_v55, %v1581_v34  ;;  %v1618_v13 = vsel %vm1169_vm2, %v3287_v11, 0 }
 0x494   : > { %v1602_v63 = vpack.c.bf16 %v1591_v57, %v1591_v57 }
 0x496   : > { %v1610_v3 = vunpack.c.l.b16 %v1602_v63 }
 0x497   : > { %v1582_v58 = vpop.f32.mrf.mxu1 }
 0x498   : > { %v1583_v60 = vadd.f32 %v1582_v58, %v1550_v35 }
 0x49a   : > { %v1592_v0 = vadd.f32 %v2681_v55, %v1583_v60 }
 0x49c   : > { %v1603_v1 = vpack.c.bf16 %v1592_v0, %v1592_v0 }
 0x49e   : > { %v1611_v4 = vunpack.c.l.b16 %v1603_v1 }
 0x4a0   : > { %v3280_v6 = vpack.c.b16 %v1611_v4, %v1610_v3 }
 0x4a2   : > { %1677 = vrot.lane.b32.xlu0 %v3280_v6, %s3540_s2  ;;  %v1621_v53 = vsel %vm1169_vm2, %v3280_v6, 0 }
 0x4a3   : > { %1629 = vmatpush.bf16.xpose.msrb.mxu2 %v1621_v53 }
 0x4aa   : > { %1650 = vrot.lane.b32.xlu0 %v3280_v6, %s3539_s4  ;;  %s3541_s4 = smov 8  }
 0x4ab   : > { %1630 = vmatpush.bf16.xpose.msrb.mxu2 %v1618_v13 }
 0x4b2   : > { %2509 = vmatmul.msk.bf16.vlgmr.msrb.gmra.mxu2 %vm1169_vm2, %v1599_v17  ;;  %1675 = vrot.lane.b32.xlu0 %v3287_v11, %s3540_s2  ;;  %s3595_s2 = sld [smem:[#allocation14_spill]] }
 0x4b8   : > { %v3321_v43 = vld [vmem:[%s3595_s2] sm:$0xf]  ;;  %s3544_s2 = smov 16  }
 0x4b9   : > { %v996_v46 = vunpack.c.l.bf16 %v3321_v43 }
 0x4ba   : > { %1739 = vrot.lane.b32.xlu0 %v3280_v6, %s3593_s22 }
 0x4bb   : > { %vm997_vm10 = vcmp.gt.f32.partialorder %v996_v46, 0.0 }
 0x4bc   : > { %vm1001_vm11 = vmand %vm997_vm10, %vm3197_vm4 }
 0x4bd   : > { %v3327_v48 = vsel %vm1001_vm11, 0.0, %v2878_v20  ;;  %v1672_v20 = vpack.c.b16 %v1671_v16, %v1671_v16 }
 0x4c2   : > { %1801 = vrot.lane.b32.xlu0 %v3280_v6, %s3594_s18 }
 0x4ca   : > { %1799 = vrot.lane.b32.xlu0 %v3287_v11, %s3594_s18 }
 0x4d6   : > { %v1346_v26 = vpop.f32.mrf.mxu3 }
 0x4d7   : > { %1475 = vrot.lane.b32.xlu2 %v1346_v26, %s3541_s4  ;;  %s3596_s4 = smov 96  }
 0x4de   : > { %v1348_v28 = vpop.f32.mrf.mxu3 }
 0x501   : > { %v1448_v33 = vpop.xlane.xlu1 %1447 }
 0x502   : > { %2699 = vrcp.f32 %v1448_v33 }
 0x508   : > { %v2700_v35 = vpop.eup %2699 }
 0x509   : > { %v1450_v36 = vmul.f32 %v2700_v35, %v2698_v24 }
 0x50b   : > { %v1451_v37 = vpack.c.bf16 %v1450_v36, %v1450_v36 }
 0x50d   : > { %2489 = vmatmul.msk.bf16.vlgmr.msra.gmra.mxu3 %vm1027_vm0, %v1451_v37 }
 0x514   : > { %v1678_v39 = vpop.permute.xlu0 %1677 }
 0x515   : > { %v1686_v40 = vsel %vm1169_vm2, %v1678_v39, 0 }
 0x516   : > { %1694 = vmatpush.bf16.xpose.msra.mxu0 %v1686_v40 }
 0x51c   : > { %v1651_v41 = vpop.permute.xlu0 %1650 }
 0x51d   : > { %1663 = vmatpush.bf16.msrb.mxu3 %v1651_v41 }
 0x524   : > { %v1676_v21 = vpop.permute.xlu0 %1675 }
 0x525   : > { %v1683_v42 = vsel %vm1169_vm2, %v1676_v21, 0 }
 0x526   : > { %1695 = vmatpush.bf16.xpose.msra.mxu0 %v1683_v42 }
 0x52c   : > { %v1740_v47 = vpop.permute.xlu0 %1739 }
 0x52d   : > { %v1748_v0 = vsel %vm1169_vm2, %v1740_v47, 0 }
 0x531   : > { %v1476_v3 = vpop.permute.xlu2 %1475 }
 0x532   : > { %v1486_v4 = vsel %vm1169_vm2, %v3261_v22, %v1476_v3 }
 0x534   : > { %v1802_v50 = vpop.permute.xlu0 %1801 }
 0x535   : > { %v1810_v44 = vsel %vm1169_vm2, %v1802_v50, 0  ;;  %v1632_v51 = vpop.f32.mrf.mxu2 }
 0x536   : > { %v1633_v52 = vadd.f32 %v1632_v51, %v3327_v48  ;;  %1818 = vmatpush.bf16.xpose.msrb.mxu1 %v1810_v44 }
 0x538   : > { %v1636_v24 = vsel %vm1027_vm0, %v1633_v52, -inf }
 0x539   : > { %1637 = vmax.xlane.f32.xlu1 %v1636_v24 }
 0x53c   : > { %v1800_v30 = vpop.permute.xlu0 %1799 }
 0x53d   : > { %v1807_v54 = vsel %vm1169_vm2, %v1800_v30, 0  ;;  %v1634_v34 = vpop.f32.mrf.mxu2 }
 0x53e   : > { %1819 = vmatpush.bf16.xpose.msrb.mxu1 %v1807_v54 }
 0x552   : > { %1479 = vrot.lane.b32.xlu1 %v3276_v45, %s3544_s2 }
 0x55a   : > { %1648 = vrot.lane.b32.xlu1 %v3287_v11, %s3596_s4  ;;  %s3599_s4 = sld [smem:[#allocation22_spill]] }
 0x560   : > { %v2682_v32 = vld [vmem:[%s3599_s4] ss:$0 sm:$0xff]  ;;  %s3600_s4 = smov 88  }
 0x562   : > { %1673 = vrot.lane.b32.xlu1 %v1672_v20, %s3597_s3  ;;  %s3598_s3 = sld [smem:[#allocation28_spill]] }
 0x568   : > { %v2581_v31 = vld [vmem:[%s3598_s3] sm:$0xff] }
 0x56a   : > { %1737 = vrot.lane.b32.xlu1 %v3287_v11, %s3593_s22 }
 0x572   : > { %1735 = vrot.lane.b32.xlu1 %v1672_v20, %s3593_s22 }
 0x590   : > { %v1470_v55 = vpop.f32.mrf.mxu3 }
 0x591   : > { %1483 = vrot.lane.b32.xlu2 %v1470_v55, %s3545_s5  ;;  %s3602_s5 = smov 80  }
 0x598   : > { %v1472_v56 = vpop.f32.mrf.mxu3 }
 0x5ac   : > { %v1638_v57 = vpop.xlane.xlu1 %1637 }
 0x5ad   : > { %v1639_v58 = vsub.f32 %v1633_v52, %v1638_v57 }
 0x5af   : > { %v1640_v45 = vmul.f32 1.442695, %v1639_v58 }
 0x5b1   : > { %2701 = vpow2.f32 %v1640_v45 }
 0x5b7   : > { %v2702_v59 = vpop.eup %2701 }
 0x5b8   : > { %v1642_v60 = vsel %vm1027_vm0, %v2702_v59, 0.0 }
 0x5ba   : > { %1643 = vadd.xlane.f32.xlu2 %v1642_v60 }
 0x5c4   : > { %v1480_v61 = vpop.permute.xlu1 %1479 }
 0x5c5   : > { %v1488_v5 = vsel %vm1487_vm12, %v1486_v4, %v1480_v61 }
 0x5cc   : > { %v1649_v63 = vpop.permute.xlu1 %1648 }
 0x5cd   : > { %1664 = vmatpush.bf16.msrb.mxu3 %v1649_v63 }
 0x5d1   : > { %1756 = vmatpush.bf16.xpose.msra.mxu3 %v1748_v0 }
 0x5d2   : > { %1797 = vrot.lane.b32.xlu2 %v1672_v20, %s3594_s18  ;;  %s3360_s18 = sand.u32 1, %s2835_s7  }
 0x5d3   : > { %s2428_s22 = sshll.u32 %s3360_s18, 2 }
 0x5d4   : > { %v1674_v49 = vpop.permute.xlu1 %1673  ;;  %s3365_s2 = scalar_lea.vmem [#allocation5], %s2428_s22  ;;  %s3601_s22 = smov 72  }
 0x5dc   : > { %v1738_v1 = vpop.permute.xlu1 %1737 }
 0x5dd   : > { %v1745_v2 = vsel %vm1169_vm2, %v1738_v1, 0 }
 0x5de   : > { %1757 = vmatpush.bf16.xpose.msra.mxu3 %v1745_v2 }
 0x5e4   : > { %v1736_v28 = vpop.permute.xlu1 %1735 }
 0x5eb   : > { %v1484_v7 = vpop.permute.xlu2 %1483 }
 0x5ec   : > { %v1490_v53 = vsel %vm1489_vm13, %v1488_v5, %v1484_v7 }
 0x5ed   : > { %v1491_v8 = vadd.f32 %v1490_v53, %v3151_v38  ;;  %v2582_v38 = vld [vmem:[%s3598_s3 + $0x8] sm:$0xff]  ;;  %s3606_s3 = smov 24  }
 0x5ee   : > { %1969 = vmatpush.bf16.msra.mxu1 %v2582_v38 }
 0x5ef   : > { %v1492_v10 = vpack.c.bf16 %v1491_v8, %v1491_v8 }
 0x5f1   : > { %2498 = vmatmul.msk.bf16.vlgmr.msrb.gmra.mxu0 %vm1027_vm0, %v1492_v10 }
 0x5f2   : > { %1970 = vmatpush.bf16.msra.mxu1 %v2581_v31 }
 0x601   : > { %2511 = vmatmul.msk.bf16.vlgmr.msra.gmra.mxu0 %vm1169_vm2, %v1674_v49 }
 0x62d   : > { %v1644_v13 = vpop.xlane.xlu2 %1643 }
 0x62e   : > { %2703 = vrcp.f32 %v1644_v13 }
 0x634   : > { %v2704_v14 = vpop.eup %2703 }
 0x635   : > { %v1646_v22 = vmul.f32 %v2704_v14, %v2702_v59  ;;  %v1798_v17 = vpop.permute.xlu2 %1797 }
 0x636   : > { %2515 = vmatmul.msk.bf16.vlgmr.msrb.gmra.mxu1 %vm1169_vm2, %v1798_v17 }
 0x637   : > { %v1647_v26 = vpack.c.bf16 %v1646_v22, %v1646_v22 }
 0x639   : > { %2510 = vmatmul.msk.bf16.vlgmr.msrb.gmra.mxu3 %vm1027_vm0, %v1647_v26 }
 0x649   : > { %2513 = vmatmul.msk.bf16.vlgmr.msra.gmra.mxu3 %vm1169_vm2, %v1736_v28 }
 0x66e   : > { %v1520_v33 = vpop.f32.mrf.mxu0 }
 0x66f   : > { %v1521_v35 = vadd.f32 %v2682_v32, %v1520_v33 }
 0x671   : > { %v1524_v36 = vmax.f32 %v1521_v35, 0.0 }
 0x673   : > { %v1525_v37 = vadd.f32 %v1524_v36, %v1491_v8 }
 0x675   : > { %v3363_v39 = vpack.c.bf16 %v1525_v37, %v1525_v37  ;;  %2042 = vst.msk [vmem:[%s3365_s2] sm:$0xf] %vm1250_vm7, %v1525_v37 }
 0x676   : > { %v1522_v40 = vpop.f32.mrf.mxu0 }
 0x677   : > { %v1927_v41 = vsel %vm1027_vm0, %v3363_v39, 0 }
 0x678   : > { %2078 = vmatpush.bf16.xpose.msrb.mxu1 %v1927_v41 }
 0x67e   : > { %v1697_v21 = vpop.f32.mrf.mxu0 }
 0x67f   : > { %v1698_v42 = vadd.f32 %v1697_v21, %v3327_v48 }
 0x681   : > { %v1701_v46 = vsel %vm1027_vm0, %v1698_v42, -inf }
 0x682   : > { %1702 = vmax.xlane.f32.xlu0 %v1701_v46 }
 0x686   : > { %v1699_v47 = vpop.f32.mrf.mxu0 }
 0x6b3   : > { %v1821_v50 = vpop.f32.mrf.mxu1 }
 0x6b4   : > { %v1822_v44 = vadd.f32 %v1821_v50, %v3327_v48 }
 0x6b6   : > { %v1825_v51 = vsel %vm1027_vm0, %v1822_v44, -inf }
 0x6b7   : > { %1826 = vmax.xlane.f32.xlu1 %v1825_v51 }
 0x6bb   : > { %v1823_v52 = vpop.f32.mrf.mxu1 }
 0x6bc   : > { %v3375_v24 = vpop.f32.mrf.mxu3 }
 0x6c4   : > { %v1668_v30 = vpop.f32.mrf.mxu3 }
 0x6cc   : > { %v1759_v54 = vpop.f32.mrf.mxu3 }
 0x6cd   : > { %v1760_v34 = vadd.f32 %v1759_v54, %v3327_v48 }
 0x6cf   : > { %v1763_v16 = vsel %vm1027_vm0, %v1760_v34, -inf }
 0x6d0   : > { %1764 = vmax.xlane.f32.xlu2 %v1763_v16  ;;  %1715 = vrot.lane.b32.xlu1 %v3280_v6, %s3600_s4 }
 0x6d4   : > { %v1761_v20 = vpop.f32.mrf.mxu3 }
 0x6f5   : > { %v1703_v55 = vpop.xlane.xlu0 %1702 }
 0x6f6   : > { %v1704_v56 = vsub.f32 %v1698_v42, %v1703_v55 }
 0x6f8   : > { %v1705_v57 = vmul.f32 1.442695, %v1704_v56 }
 0x6fa   : > { %2705 = vpow2.f32 %v1705_v57 }
 0x700   : > { %v2706_v58 = vpop.eup %2705 }
 0x701   : > { %v1707_v45 = vsel %vm1027_vm0, %v2706_v58, 0.0 }
 0x702   : > { %1708 = vadd.xlane.f32.xlu0 %v1707_v45 }
 0x716   : > { %1713 = vrot.lane.b32.xlu0 %v3287_v11, %s3600_s4  ;;  %s3604_s4 = sld [smem:[#allocation25_spill]] }
 0x71c   : > { %v2578_v41 = vld [vmem:[%s3604_s4 + $0x8] sm:$0xff]  ;;  %v2577_v42 = vld [vmem:[%s3604_s4] sm:$0xff]  ;;  %s2427_s4 = sshll.u32 %s3360_s18, 3 }
 0x71d   : > { %1900 = vmatpush.bf16.msrb.mxu3 %v2578_v41  ;;  %s3419_s9 = scalar_lea.vmem [#allocation3], %s2427_s4  ;;  %v2147_v41 = vld [vmem:[#allocation2] sm:$0x1]  ;;  %s3612_s4 = sld [smem:[#allocation32_spill]] }
 0x71e   : > { %1839 = vrot.lane.b32.xlu0 %v3280_v6, %s3601_s22 }
 0x721   : > { %1901 = vmatpush.bf16.msrb.mxu3 %v2577_v42 }
 0x726   : > { %1777 = vrot.lane.b32.xlu0 %v3280_v6, %s3602_s5 }
 0x72a   : > { %v1827_v48 = vpop.xlane.xlu1 %1826 }
 0x72b   : > { %v1828_v59 = vsub.f32 %v1822_v44, %v1827_v48 }
 0x72d   : > { %v1829_v60 = vmul.f32 1.442695, %v1828_v59 }
 0x72e   : > { %1775 = vrot.lane.b32.xlu0 %v3287_v11, %s3602_s5  ;;  %s3603_s5 = sld [smem:[#allocation27_spill]] }
 0x72f   : > { %2707 = vpow2.f32 %v1829_v60 }
 0x734   : > { %v2580_v22 = vld [vmem:[%s3603_s5 + $0x8] sm:$0xff]  ;;  %v2579_v26 = vld [vmem:[%s3603_s5] sm:$0xff]  ;;  %s3607_s5 = smov 16  }
 0x735   : > { %v2708_v61 = vpop.eup %2707 }
 0x736   : > { %v1831_v63 = vsel %vm1027_vm0, %v2708_v61, 0.0 }
 0x737   : > { %1832 = vadd.xlane.f32.xlu2 %v1831_v63 }
 0x742   : > { %v1716_v0 = vpop.permute.xlu1 %1715 }
 0x743   : > { %1728 = vmatpush.bf16.msra.mxu2 %v1716_v0  ;;  %v1765_v49 = vpop.xlane.xlu2 %1764 }
 0x744   : > { %v1766_v1 = vsub.f32 %v1760_v34, %v1765_v49 }
 0x746   : > { %v1767_v2 = vmul.f32 1.442695, %v1766_v1 }
 0x748   : > { %2709 = vpow2.f32 %v1767_v2 }
 0x74e   : > { %v2710_v3 = vpop.eup %2709 }
 0x74f   : > { %1837 = vrot.lane.b32.xlu2 %v3287_v11, %s3601_s22  ;;  %v1769_v6 = vsel %vm1027_vm0, %v2710_v3, 0.0  ;;  %s3605_s22 = smov 8  }
 0x750   : > { %1770 = vadd.xlane.f32.xlu1 %v1769_v6 }
 0x775   : > { %v1709_v4 = vpop.xlane.xlu0 %1708 }
 0x776   : > { %2711 = vrcp.f32 %v1709_v4  ;;  %v2684_v4 = vld [vmem:[%s3611_s13] ss:$0 sm:$0xff] }
 0x77c   : > { %v2712_v5 = vpop.eup %2711 }
 0x77d   : > { %v1711_v7 = vmul.f32 %v2712_v5, %v2706_v58  ;;  %v2683_v58 = vld [vmem:[%s3608_s8] ss:$0 sm:$0xff]  ;;  %v2131_v5 = vsel %vm1562_vm8, %v3192_v9, 0  ;;  %s2429_s8 = sshll.u32 %s3360_s18, 5 }
 0x77e   : > { %s3444_s13 = scalar_lea.vmem [#allocation7], %s2429_s8  ;;  %s2197_s8 = sshll.u32 %s3365_s2, 4  ;;  %s2198_s8 = int_to_ptr.vmem [resolvable:$true] %s2197_s8 }
 0x77f   : > { %v1712_v8 = vpack.c.bf16 %v1711_v7, %v1711_v7  ;;  %s2211_s23 = sshll.u32 %s3444_s13, 4  ;;  %s3479_s23 = int_to_ptr.vmem [resolvable:$true] %s2211_s23 }
 0x788   : > { %v1714_v53 = vpop.permute.xlu0 %1713 }
 0x789   : > { %1729 = vmatpush.bf16.msra.mxu2 %v1714_v53 }
 0x78c   : > { %2512 = vmatmul.msk.bf16.vlgmr.msra.gmra.mxu2 %vm1027_vm0, %v1712_v8 }
 0x790   : > { %v1840_v10 = vpop.permute.xlu0 %1839 }
 0x791   : > { %1852 = vmatpush.bf16.msrb.mxu2 %v1840_v10 }
 0x798   : > { %v1778_v13 = vpop.permute.xlu0 %1777 }
 0x799   : > { %1790 = vmatpush.bf16.msrb.mxu0 %v1778_v13 }
 0x7a0   : > { %v1776_v14 = vpop.permute.xlu0 %1775 }
 0x7a1   : > { %1791 = vmatpush.bf16.msrb.mxu0 %v1776_v14 }
 0x7a5   : > { %1935 = vmatpush.bf16.msra.mxu0 %v2580_v22 }
 0x7a9   : > { %1936 = vmatpush.bf16.msra.mxu0 %v2579_v26 }
 0x7aa   : > { %v1833_v11 = vpop.xlane.xlu2 %1832 }
 0x7ab   : > { %2713 = vrcp.f32 %v1833_v11  ;;  %v2717_v11 = vld [vmem:[%s3108_s14] sm:$0xff] }
 0x7b1   : > { %v2714_v17 = vpop.eup %2713 }
 0x7b2   : > { %v1835_v28 = vmul.f32 %v2714_v17, %v2708_v61  ;;  %v1838_v38 = vpop.permute.xlu2 %1837  ;;  %v2089_v17 = vsel %vm1176_vm1, %v3321_v43, 0 }
 0x7b3   : > { %1853 = vmatpush.bf16.msrb.mxu2 %v1838_v38 }
 0x7b4   : > { %v1836_v31 = vpack.c.bf16 %v1835_v28, %v1835_v28 }
 0x7b6   : > { %2516 = vmatmul.msk.bf16.vlgmr.msrb.gmra.mxu2 %vm1027_vm0, %v1836_v31 }
 0x7c3   : > { %v1771_v32 = vpop.xlane.xlu1 %1770 }
 0x7c4   : > { %2715 = vrcp.f32 %v1771_v32 }
 0x7ca   : > { %v2716_v33 = vpop.eup %2715 }
 0x7cb   : > { %v1773_v35 = vmul.f32 %v2716_v33, %v2710_v3 }
 0x7cd   : > { %v1774_v36 = vpack.c.bf16 %v1773_v35, %v1773_v35  ;;  %v2718_v35 = vld [vmem:[%s3108_s14 + $0x8] sm:$0xff] }
 0x7cf   : > { %2514 = vmatmul.msk.bf16.vlgmr.msrb.gmra.mxu0 %vm1027_vm0, %v1774_v36 }
 0x7df   : > { %2534 = vmatmul.msk.bf16.vlgmr.msra.gmra.mxu0 %vm1027_vm0, %v3363_v39 }
 0x80f   : > { %v1731_v37 = vpop.f32.mrf.mxu2 }
 0x810   : > { %1860 = vrot.lane.b32.xlu0 %v1731_v37, %s3605_s22 }
 0x817   : > { %v1733_v40 = vpop.f32.mrf.mxu2 }
 0x839   : > { %v1855_v21 = vpop.f32.mrf.mxu2 }
 0x83a   : > { %1868 = vrot.lane.b32.xlu0 %v1855_v21, %s3606_s3  ;;  %s3609_s3 = sld [smem:[#allocation30_spill]] }
 0x841   : > { %v1857_v46 = vpop.f32.mrf.mxu2 }
 0x84c   : > { %v1793_v47 = vpop.f32.mrf.mxu0 }
 0x84d   : > { %1864 = vrot.lane.b32.xlu2 %v1793_v47, %s3607_s5  ;;  %s3610_s5 = sld [smem:[#allocation31_spill]]  ;;  %v2719_v47 = vld [vmem:[%s3108_s14 + $0x10] sm:$0xff] }
 0x853   : > { %v2050_v61 = vld [vmem:[%s3610_s5] sm:$0x1] }
 0x854   : > { %v1795_v50 = vpop.f32.mrf.mxu0 }
 0x855   : > { %2150 = vperm.xlu2 %2676, %v2147_v41  }
 0x85c   : > { %v1938_v44 = vpop.f32.mrf.mxu0 }
 0x85d   : > { %v1942_v51 = vpack.c.bf16 %v1938_v44, %v1938_v44 }
 0x85f   : > { %v2000_v39 = vsel %vm1562_vm8, %v1942_v51, 0 }
 0x860   : > { %2009 = vmatpush.bf16.msra.mxu3 %v2000_v39 }
 0x864   : > { %v1940_v52 = vpop.f32.mrf.mxu0 }
 0x865   : > { %v2720_v52 = vld [vmem:[%s3108_s14 + $0x18] sm:$0xff]  ;;  %s2162_s14 = sand.u32 1, %s3062_s0  }
 0x866   : > { %s3470_s24 = scalar_lea.sflag [#allocation6], %s2162_s14 }
 0x882   : > { %v1861_v30 = vpop.permute.xlu0 %1860 }
 0x883   : > { %v1871_v34 = vsel %vm1169_vm2, %v3375_v24, %v1861_v30 }
 0x8a7   : > { %v1865_v54 = vpop.permute.xlu2 %1864 }
 0x8a8   : > { %v1872_v16 = vsel %vm1487_vm12, %v1871_v34, %v1865_v54 }
 0x8ac   : > { %v1869_v20 = vpop.permute.xlu0 %1868 }
 0x8ad   : > { %v1873_v55 = vsel %vm1489_vm13, %v1872_v16, %v1869_v20  ;;  %v2047_v20 = vld [vmem:[%s3612_s4] sm:$0x1]  ;;  %s2741_s4 = scalar_lea.hbm %s3029_s21, 8 }
 0x8ae   : > { %v1874_v56 = vadd.f32 %v1873_v55, %v3290_v12 }
 0x8b0   : > { %v1875_v57 = vpack.c.bf16 %v1874_v56, %v1874_v56 }
 0x8b2   : > { %2525 = vmatmul.msk.bf16.vlgmr.msrb.gmra.mxu3 %vm1027_vm0, %v1875_v57 }
 0x8c2   : > { %2546 = vmatmul.msk.bf16.vlgmr.msra.gmra.mxu3 %vm1555_vm9, %v3264_v25 }
 0x8d2   : > { %2547 = vmatmul.msk.bf16.gmra.mxu3 %vm1555_vm9, %v3271_v62  ;;  %v2067_v62 = vld [vmem:[%s3609_s3] sm:$0x1]  ;;  %s2557_s3 = sshll.u32 %s3062_s0, 2 }
 0x8d3   : > { %s2195_s5 = scalar_lea.hbm %s3029_s21, %s2557_s3 }
 0x8d4   : > { %s2199_s19 = sshll.u32 %s2195_s5, 4  ;;  %s2200_s19 = int_to_ptr.hbm [resolvable:$true] %s2199_s19 }
 0x8d5   : > { %s2735_s25 = sshra.s32 %s2200_s19, 4  ;;  %s2736_s25 = int_to_ptr.hbm [resolvable:$true] %s2735_s25 }
 0x8d6   : > { %s2737_s27 = scalar_lea.hbm %s2736_s25, 4  ;;  %p2742_p0 = scmp.lt.s32.totalorder %s2736_s25, %s3029_s21 }
 0x8d7   : > { %p2738_p11 = scmp.ne.s32.totalorder %s2736_s25, %s2737_s27  ;;  %p2743_p1 = scmp.lt.s32.totalorder %s2741_s4, %s2737_s27 }
 0x8d9   : > { %p2739_p12 = pnand %p2738_p11, %p3081_p5  ;;  %p2744_p2 = por %p2743_p1, %p2742_p0 }
 0x8db   : > { %p2740_p13 = pneg %p2739_p12 }
 0x8dd   : > { %p2745_p3 = pnand %p2744_p2, %p2740_p13 }
 0x935   : > { %v1903_v24 = vpop.f32.mrf.mxu3 }
 0x936   : > { %v1904_v45 = vadd.f32 %v2683_v58, %v1903_v24 }
 0x938   : > { %v1907_v48 = vmax.f32 %v1904_v45, 0.0 }
 0x93a   : > { %v1908_v59 = vadd.f32 %v1907_v48, %v1874_v56 }
 0x93c   : > { %v1943_v60 = vpack.c.bf16 %v1908_v59, %v1908_v59  ;;  %2041 = vst.msk [vmem:[%s3419_s9] sm:$0xff] %vm1027_vm0, %v1908_v59 }
 0x93d   : > { %v1905_v12 = vpop.f32.mrf.mxu3 }
 0x93e   : > { %2543 = vmatmul.msk.bf16.vlgmr.msra.gmra.mxu1 %vm1027_vm0, %v1943_v60  ;;  %v1961_v25 = vsel %vm1027_vm0, %v1943_v60, 0 }
 0x93f   : > { %2061 = vmatpush.bf16.xpose.msrb.mxu0 %v1961_v25 }
 0x945   : > { %v2011_v2 = vpop.f32.mrf.mxu3 }
 0x946   : > { %2548 = vmatmul.msk.bf16.vlgmr.msrb.gmra.mxu0 %vm1027_vm0, %v2050_v61 }
 0x947   : > { %2098 = vmatpush.bf16.msra.mxu0 %v2089_v17 }
 0x94d   : > { %v2013_v53 = vpop.f32.mrf.mxu3 }
 0x94e   : > { %2549 = vmatmul.msk.bf16.vlgmr.msrb.gmra.mxu1 %vm1027_vm0, %v2067_v62 }
 0x955   : > { %v2016_v31 = vpop.f32.mrf.mxu3 }
 0x95d   : > { %v2018_v46 = vpop.f32.mrf.mxu3 }
 0x9bb   : > { %v1972_v63 = vpop.f32.mrf.mxu1 }
 0x9bc   : > { %v1976_v0 = vpack.c.bf16 %v1972_v63, %v1972_v63 }
 0x9be   : > { %v1978_v49 = vsel %vm1176_vm1, %v1976_v0, 0 }
 0x9bf   : > { %1987 = vmatpush.bf16.msra.mxu2 %v1978_v49 }
 0x9c2   : > { %2544 = vmatmul.msk.bf16.vlgmr.msra.gmra.mxu2 %vm1169_vm2, %v3134_v27 }
 0x9c3   : > { %v1974_v1 = vpop.f32.mrf.mxu1  ;;  %2140 = vmatpush.bf16.msrb.mxu2 %v2131_v5  ;;  %v2063_v9 = vpop.f32.mrf.mxu0 }
 0x9c4   : > { %v2084_v26 = vpack.c.bf16 %v2063_v9, %v2063_v9 }
 0x9c6   : > { %2550 = vmatmul.msk.bf16.vlgmr.msra.gmra.mxu0 %vm1169_vm2, %v2084_v26 }
 0x9cb   : > { %v2080_v8 = vpop.f32.mrf.mxu1 }
 0x9cc   : > { %v2126_v13 = vpack.c.bf16 %v2080_v8, %v2080_v8 }
 0x9d2   : > { %2545 = vmatmul.msk.bf16.gmra.mxu2 %vm1169_vm2, %v3139_v29 }
 0x9d3   : > { %v2082_v28 = vpop.f32.mrf.mxu1 }
 0x9e2   : > { %2552 = vmatmul.msk.bf16.vlgmr.msrb.gmra.mxu2 %vm1555_vm9, %v2126_v13 }
 0xa45   : > { %v1989_v3 = vpop.f32.mrf.mxu2 }
 0xa46   : > { %v2012_v6 = vadd.f32 %v2011_v2, %v1989_v3 }
 0xa48   : > { %v2021_v7 = vadd.f32 %v2012_v6, %v3297_v15 }
 0xa4a   : > { %v2029_v10 = vadd.f32 %v2684_v4, %v2021_v7 }
 0xa4c   : > { %v2033_v27 = vmax.f32 %v2029_v10, 0.0 }
 0xa4d   : > { %v1991_v29 = vpop.f32.mrf.mxu2 }
 0xa4e   : > { %v2014_v14 = vadd.f32 %v2013_v53, %v1991_v29  ;;  %v2037_v22 = vadd.f32 %v2717_v11, %v2033_v27 }
 0xa50   : > { %v2022_v15 = vadd.f32 %v2014_v14, %v3302_v18  ;;  %2043 = vst.msk [vmem:[%s3444_s13] sm:$0xff] %vm1027_vm0, %v2037_v22  ;;  %v2065_v18 = vpop.f32.mrf.mxu0 }
 0xa52   : > { %v2030_v38 = vadd.f32 %v2684_v4, %v2022_v15 }
 0xa54   : > { %v2034_v32 = vmax.f32 %v2030_v38, 0.0 }
 0xa55   : > { %v1994_v33 = vpop.f32.mrf.mxu2 }
 0xa56   : > { %v2017_v43 = vadd.f32 %v2016_v31, %v1994_v33  ;;  %v2038_v36 = vadd.f32 %v2718_v35, %v2034_v32 }
 0xa58   : > { %v2023_v37 = vadd.f32 %v2017_v43, %v3308_v23  ;;  %2044 = vst.msk [vmem:[%s3444_s13 + $0x8] sm:$0xff] %vm1027_vm0, %v2038_v36  ;;  %v2048_v16 = vpack.c.bf16 %v2038_v36, %v2037_v22 }
 0xa5a   : > { %v2031_v40 = vadd.f32 %v2684_v4, %v2023_v37 }
 0xa5c   : > { %v2035_v21 = vmax.f32 %v2031_v40, 0.0 }
 0xa5d   : > { %v1996_v42 = vpop.f32.mrf.mxu2 }
 0xa5e   : > { %v2039_v50 = vadd.f32 %v2719_v47, %v2035_v21  ;;  %v2019_v44 = vadd.f32 %v2018_v46, %v1996_v42 }
 0xa60   : > { %v2024_v51 = vadd.f32 %v2019_v44, %v3312_v19  ;;  %2045 = vst.msk [vmem:[%s3444_s13 + $0x10] sm:$0xff] %vm1027_vm0, %v2039_v50  ;;  %v2108_v19 = vsel %vm1027_vm0, %v2048_v16, 0 }
 0xa62   : > { %v2032_v23 = vadd.f32 %v2684_v4, %v2024_v51 }
 0xa64   : > { %v2036_v39 = vmax.f32 %v2032_v23, 0.0 }
 0xa66   : > { %v2040_v30 = vadd.f32 %v2720_v52, %v2036_v39 }
 0xa68   : > { %v2049_v54 = vpack.c.bf16 %v2040_v30, %v2039_v50  ;;  %2046 = vst.msk [vmem:[%s3444_s13 + $0x18] sm:$0xff] %vm1027_vm0, %v2040_v30 }
 0xa6a   : > { %v2111_v34 = vsel %vm1027_vm0, %v2049_v54, 0 }
 0xa6b   : > { %2119 = vmatpush.bf16.xpose.msra.mxu1 %v2111_v34 }
 0xa73   : > { %2120 = vmatpush.bf16.xpose.msra.mxu1 %v2108_v19 }
 0xa7a   : > { %2551 = vmatmul.msk.bf16.vlgmr.msra.gmra.mxu1 %vm1027_vm0, %v2047_v20 }
 0xa7b   : > { %2748 = shalt.err (!%p2745_p3)
}
 0xa7c   : > { %2585 = dma.vmem_to_hbm [thread:$0]  (%p3081_p5), %s2198_s8, 64, %s2200_s19, %s3470_s24  }
 0xa7d   : > { %s2181_s2 = scalar_lea.hbm %s3024_s12, %s2556_s17  ;;  %s2183_s13 = sshll.u32 %s3419_s9, 4  ;;  %s2184_s13 = int_to_ptr.vmem [resolvable:$true] %s2183_s13 }
 0xa7e   : > { %s2185_s25 = sshll.u32 %s2181_s2, 4  ;;  %s2583_s27 = sshll.u32 %s3062_s0, 5  ;;  %s2186_s25 = int_to_ptr.hbm [resolvable:$true] %s2185_s25 }
 0xa7f   : > { %s2158_s3 = scalar_lea.sflag [#allocation4], %s3360_s18  ;;  %s2763_s5 = sshra.s32 %s2186_s25, 4  ;;  %s2764_s5 = int_to_ptr.hbm [resolvable:$true] %s2763_s5 }
 0xa80   : > { %s2765_s14 = scalar_lea.hbm %s2764_s5, 8  ;;  %s2769_s4 = scalar_lea.hbm %s3024_s12, 16 }
 0xa81   : > { %p2766_p4 = scmp.ne.s32.totalorder %s2764_s5, %s2765_s14  ;;  %p2770_p9 = scmp.lt.s32.totalorder %s2764_s5, %s3024_s12 }
 0xa82   : > { %p2771_p10 = scmp.lt.s32.totalorder %s2769_s4, %s2765_s14 }
 0xa83   : > { %p2767_p7 = pnand %p2766_p4, %p3081_p5 }
 0xa84   : > { %p2772_p11 = por %p2771_p10, %p2770_p9 }
 0xa85   : > { %p2768_p8 = pneg %p2767_p7 }
 0xa87   : > { %p2773_p12 = pnand %p2772_p11, %p2768_p8 }
 0xa89   : > { %2776 = shalt.err (!%p2773_p12)
}
 0xa8a   : > { %2584 = dma.vmem_to_hbm [thread:$0]  (%p3081_p5), %s2184_s13, 128, %s2186_s25, %s2158_s3  }
 0xa8b   : > { %s2210_s9 = scalar_lea.hbm %s3034_s6, %s2583_s27  ;;  %s2797_s18 = scalar_lea.hbm %s3034_s6, 64 }
 0xa8c   : > { %s2213_s17 = sshll.u32 %s2210_s9, 4  ;;  %s2214_s17 = int_to_ptr.hbm [resolvable:$true] %s2213_s17 }
 0xa8d   : > { %s2791_s19 = sshra.s32 %s2214_s17, 4  ;;  %s2792_s19 = int_to_ptr.hbm [resolvable:$true] %s2791_s19 }
 0xa8e   : > { %s2793_s0 = scalar_lea.hbm %s2792_s19, 32  ;;  %p2798_p2 = scmp.lt.s32.totalorder %s2792_s19, %s3034_s6 }
 0xa8f   : > { %p2794_p13 = scmp.ne.s32.totalorder %s2792_s19, %s2793_s0  ;;  %p2799_p3 = scmp.lt.s32.totalorder %s2797_s18, %s2793_s0 }
 0xa91   : > { %p2795_p0 = pnand %p2794_p13, %p3081_p5  ;;  %p2800_p4 = por %p2799_p3, %p2798_p2 }
 0xa93   : > { %p2796_p1 = pneg %p2795_p0 }
 0xa95   : > { %p2801_p7 = pnand %p2800_p4, %p2796_p1 }
 0xa97   : > { %2804 = shalt.err (!%p2801_p7)
}
 0xa98   : > { %s2887_s8 = smov 128   ;;  %v2100_v55 = vpop.f32.mrf.mxu0  ;;  %v2142_v56 = vpop.f32.mrf.mxu2  ;;  %s976_s2 = scalar_lea.vmem %s3039_s20, %s3095_s28  ;;  %vm2155_vm14 = vcmask 253952  }
 0xa99   : > { %2586 = dma.vmem_to_hbm [thread:$0]  (%p3081_p5), %s3479_s23, 512, %s2214_s17, %s3470_s24, %s2887_s8, %s2887_s8, %s3605_s22   ;;  %v2151_v24 = vpop.permute.xlu2 %2150 }
 0xa9a   : > { %v2153_v59 = vperm.slane %v2151_v24, 0 }
 0xaa0   : > { %v2102_v57 = vpop.f32.mrf.mxu0  ;;  %v2144_v58 = vpop.f32.mrf.mxu2 }
 0xaf7   : > { %v2122_v45 = vpop.f32.mrf.mxu1 }
 0xaf8   : > { %v2123_v48 = vadd.f32 %v2122_v45, %v2100_v55 }
 0xafa   : > { %v2146_v60 = vadd.f32 %v2142_v56, %v2123_v48 }
 0xafc   : > { %v2154_v12 = vadd.f32 %v2153_v59, %v2146_v60 }
 0xafe   : > { %2156 = vst.msk [vmem:[%s976_s2] sm:$0x1] %vm2155_vm14, %v2154_v12 }
 0xaff   : > { %v2124_v25 = vpop.f32.mrf.mxu1 }
 0xb00 PF: > { %p2600_p8 = scmp.ge.s32.totalorder %s2843_s16, 2  ;;  %s2231_s24 = sand.u32 1, %s2831_s10  }
 0xb01   : > { %s2232_s26 = scalar_lea.sflag [#allocation4], %s2231_s24 }
 0xb02   : > { %p2591_p5 = pnand %p2600_p8, %p3085_p6 }
 0xb04   : > { %p2592_p9 = pneg %p2591_p5 }
 0xb06   : > { %2822 = dma.done.wait (%p2592_p9), %s2232_s26, 128  }
 0xb07   : > { %2824 = vsyncadd (%p2592_p9), %s2232_s26, 4294967168  ;;  %s3613_s23 = sadd.s32 4294967294, %s2843_s16  }
 0xb08   : > { %s2241_s22 = sand.u32 1, %s3613_s23  }
 0xb09   : > { %s2242_s28 = scalar_lea.sflag [#allocation6], %s2241_s22 }
 0xb0a   : > { %2826 = dma.done.wait (%p2592_p9), %s2242_s28, 576  }
 0xb0b   : > { %2828 = vsyncadd (%p2592_p9), %s2242_s28, 4294966720  ;;  %s3614_s13 = sld [smem:[#allocation33_spill]]  ;;  %p75_p10 = scmp.ge.s32.totalorder %s3066_s15, 4  }
 0xb0c   : > { %s3615_s10 = smov %s2835_s7  ;;  %s3616_s7 = smov %s2839_s11 }
 0xb0d   : > { %s3618_s16 = smov %s3066_s15  ;;  %77 = sbr.rel (!%p75_p10) target bundleno = 61 (0x3d), region = 241 }
 0xb11   : > { %s3617_s11 = smov %s3614_s13 }
 0xb12   :  { %2264 = vsyncpa [#allocation4], 1 }
 0xb13   :  { %2266 = vsyncpa [#allocation4 + $0x1], 1 }
 0xb14   :  { %2267 = vsyncpa [#allocation6], 1 }
 0xb15   :  { %2269 = vsyncpa [#allocation6 + $0x1], 1 }

// kernel: gratif_forward.2
= control target key start
LH: loop header
LB: loop body
LE: loop exit
PB: predicated region body
PF: predicated region fallthrough
CT: control target
= control target key end

     0   :  { %s3096_s0 = inlined_call_operand.vmem [shape: f32[2,8,32], index: 0, kind: input, shape index: {}]   ;;  %s3097_s1 = inlined_call_operand.vmem [shape: f32[2,4,32], index: 1, kind: input, shape index: {}]   ;;  %s3098_s2 = inlined_call_operand.vmem [shape: f32[2,32,1], index: 2, kind: input, shape index: {}]   ;;  %s3099_s3 = inlined_call_operand.vmem [shape: f32[2,32,1], index: 3, kind: input, shape index: {}]   ;;  %s3100_s4 = inlined_call_operand.vmem [shape: f32[2,1,32], index: 4, kind: input, shape index: {}]   ;;  %s3101_s5 = inlined_call_operand.vmem [shape: bf16[8,32], index: 5, kind: input, shape index: {}]   ;;  %s3102_s6 = inlined_call_operand.vmem [shape: bf16[4,32], index: 6, kind: input, shape index: {}]   ;;  %s3103_s7 = inlined_call_operand.vmem [shape: bf16[32,8], index: 7, kind: input, shape index: {}]   ;;  %s3104_s8 = inlined_call_operand.vmem [shape: bf16[32,4], index: 8, kind: input, shape index: {}]   ;;  %s3105_s9 = inlined_call_operand.vmem [shape: f32[1,32], index: 9, kind: input, shape index: {}]   ;;  %s3106_s10 = inlined_call_operand.vmem [shape: f32[1,32], index: 10, kind: input, shape index: {}]   ;;  %s3107_s11 = inlined_call_operand.vmem [shape: f32[1,32], index: 11, kind: input, shape index: {}, may-alias: {11,15,18,19,22,25}]   ;;  %s3108_s12 = inlined_call_operand.vmem [shape: bf16[32,96], index: 12, kind: input, shape index: {}]   ;;  %s3109_s13 = inlined_call_operand.vmem [shape: bf16[32,96], index: 13, kind: input, shape index: {}]   ;;  %s3110_s14 = inlined_call_operand.vmem [shape: bf16[32,160], index: 14, kind: input, shape index: {}]   ;;  %s3111_s15 = inlined_call_operand.vmem [shape: f32[1,32], index: 15, kind: input, shape index: {}, may-alias: {11,15,18,19,22,25}]   ;;  %s3112_s16 = inlined_call_operand.vmem [shape: f32[1,64], index: 16, kind: input, shape index: {}, may-alias: {16,20}]   ;;  %s3113_s17 = inlined_call_operand.vmem [shape: bf16[32,32], index: 17, kind: input, shape index: {}]   ;;  %s3114_s18 = inlined_call_operand.vmem [shape: f32[1,32], index: 18, kind: input, shape index: {}, may-alias: {11,15,18,19,22,25}]   ;;  %s3115_s19 = inlined_call_operand.vmem [shape: f32[1,32], index: 19, kind: input, shape index: {}, may-alias: {11,15,18,19,22,25}]   ;;  %s3116_s20 = inlined_call_operand.vmem [shape: f32[1,64], index: 20, kind: input, shape index: {}, may-alias: {16,20}]   ;;  %s3117_s21 = inlined_call_operand.vmem [shape: bf16[32,32], index: 21, kind: input, shape index: {}]   ;;  %s3118_s22 = inlined_call_operand.vmem [shape: f32[1,32], index: 22, kind: input, shape index: {}, may-alias: {11,15,18,19,22,25}]   ;;  %s3119_s23 = inlined_call_operand.vmem [shape: bf16[32,32], index: 23, kind: input, shape index: {}]   ;;  %s3120_s24 = inlined_call_operand.vmem [shape: bf16[32,32], index: 24, kind: input, shape index: {}]   ;;  %s3121_s25 = inlined_call_operand.vmem [shape: f32[1,32], index: 25, kind: input, shape index: {}, may-alias: {11,15,18,19,22,25}]   ;;  %s3122_s26 = inlined_call_operand.vmem [shape: f32[2,8,32], index: 26, kind: output, shape index: {0}]   ;;  %s3123_s27 = inlined_call_operand.vmem [shape: f32[2,4,32], index: 27, kind: output, shape index: {1}]   ;;  %s3124_s28 = inlined_call_operand.vmem [shape: f32[2,32,32], index: 28, kind: output, shape index: {2}]  }
   0x1   :  { %3130 = sst [smem:[#allocation3_spill]] %s3096_s0 }
   0x2   :  { %3131 = sst [smem:[#allocation4_spill]] %s3097_s1 }
   0x3   :  { %3132 = sst [smem:[#allocation5_spill]] %s3098_s2 }
   0x4   :  { %3133 = sst [smem:[#allocation6_spill]] %s3099_s3 }
   0x5   :  { %3134 = sst [smem:[#allocation7_spill]] %s3100_s4 }
   0x6   :  { %3135 = sst [smem:[#allocation8_spill]] %s3101_s5 }
   0x7   :  { %3136 = sst [smem:[#allocation9_spill]] %s3102_s6 }
   0x8   :  { %3137 = sst [smem:[#allocation10_spill]] %s3103_s7 }
   0x9   :  { %3138 = sst [smem:[#allocation11_spill]] %s3104_s8  ;;  %s2629_s8 = smov 0  }
   0xa   :  { %3139 = sst [smem:[#allocation12_spill]] %s3105_s9 }
   0xb   :  { %3140 = sst [smem:[#allocation13_spill]] %s3106_s10 }
   0xc   :  { %3141 = sst [smem:[#allocation14_spill]] %s3107_s11 }
   0xd   :  { %3142 = sst [smem:[#allocation15_spill]] %s3108_s12 }
   0xe   :  { %3143 = sst [smem:[#allocation16_spill]] %s3109_s13 }
   0xf   :  { %3144 = sst [smem:[#allocation17_spill]] %s3124_s28 }
  0x10 LB: > { %3145 = sst [smem:[#allocation2_spill]] %s2469_s8  ;;  %s2243_s5 = sadd.s32 4294967295, %s2469_s8   ;;  %s2469_s8 = sphi %s2629_s8, %s39_s8  }
  0x11   : > { %p2247_p0 = scmp.ge.s32.totalorder %s2469_s8, 1  ;;  %p803_p1 = scmp.lt.s32.totalorder %s2469_s8, 3 }
  0x13   : > { %p804_p2 = pnand %p2247_p0, %p803_p1 }
  0x14   : > { %s3146_s13 = sld [smem:[#allocation16_spill]] (!%p804_p2)  ;;  %p901_p3 = scmp.lt.s32.totalorder (!%p804_p2), %s2243_s5, 1 }
  0x15   : > { %807 = sbr.rel (%p804_p2) target bundleno = 2658 (0xa62), region = 124  ;;  %s3147_s2 = sld [smem:[#allocation3_spill]] (!%p804_p2) }
  0x16   : > { %s3148_s4 = sld [smem:[#allocation6_spill]] (!%p804_p2)  ;;  %s2472_s8 = smov (!%p804_p2), 96  }
  0x17   : > { %s3149_s6 = sld [smem:[#allocation5_spill]] (!%p804_p2)  ;;  %s2473_s3 = smov (!%p804_p2), 112  }
  0x18   : > { %s3150_s12 = sld [smem:[#allocation15_spill]] (!%p804_p2) }
  0x19   : > { %s3154_s28 = sld [smem:[#allocation14_spill]] (!%p804_p2) }
  0x1a   : > { %v2384_v0 = vld [vmem:[%s3146_s13 + $0x8] sm:$0xff]  ;;  %v2471_v1 = vmov 0   ;;  %v2383_v2 = vld [vmem:[%s3146_s13] sm:$0xff]  ;;  %s3166_s5 = smov (!%p901_p3, %s2243_s5), 1  ;;  %vm1061_vm0 = vcmask 261120   ;;  %s3151_s13 = sld [smem:[#allocation4_spill]] }
  0x1b   : > { %2419 = vset.pattern.permute.xlu1 %v2471_v1  ;;  %2418 = vset.pattern.permute.xlu0 %v2471_v1  ;;  %s3128_s10 = sshll.u32 %s3166_s5, 3  ;;  %s2650_s0 = sshll.u32 %s3166_s5, 5  ;;  %v2286_v13 = vld [vmem:[%s3110_s14 + $0x10] sm:$0xf]  ;;  %v2388_v14 = vld [vmem:[%s3110_s14 + $0x14] sm:$0xf0] }
  0x1c   : > { %1103 = vmatpush.bf16.msra.mxu1 %v2384_v0  ;;  %2420 = vset.pattern.permute.xlu2 %v2471_v1  ;;  %s904_s7 = scalar_lea.vmem %s3147_s2, %s3128_s10  ;;  %s2661_s9 = scalar_lea.vmem %s3148_s4, %s2650_s0  ;;  %v2287_v15 = vor.u32 %v2388_v14, %v2286_v13  ;;  %v2387_v16 = vld [vmem:[%s3110_s14 + $0x14] sm:$0xf]  ;;  %v2288_v17 = vld [vmem:[%s3110_s14 + $0x18] sm:$0xf0]  ;;  %v2278_v20 = vld [vmem:[%s3110_s14] sm:$0xf] }
  0x1d   : > { %v936_v3 = vld [vmem:[%s904_s7] sm:$0xff]  ;;  %s913_s11 = scalar_lea.vmem %s3149_s6, %s2650_s0  ;;  %v971_v8 = vld [vmem:[%s2661_s9 + $0x8] sm:$0xff]  ;;  %v972_v10 = vld [vmem:[%s2661_s9 + $0x10] sm:$0xff]  ;;  %s2249_s29 = sshll.u32 %s3166_s5, 2  ;;  %v2291_v19 = vor.u32 %v2387_v16, %v2288_v17  ;;  %vm1210_vm1 = vcmask 1043456   ;;  %vm1203_vm2 = vcmask 64512  }
  0x1e   : > { %v1041_v4 = vpack.c.bf16 %v936_v3, %v936_v3  ;;  %v970_v5 = vld [vmem:[%s2661_s9] sm:$0xff]  ;;  %v940_v7 = vld [vmem:[%s913_s11 + $0x10] sm:$0xff]  ;;  %v939_v9 = vld [vmem:[%s913_s11 + $0x8] sm:$0xff]  ;;  %1146 = vmatpush.bf16.msra.mxu2 %v2287_v15  ;;  %s3152_s4 = sld [smem:[#allocation13_spill]]  ;;  %s2474_s10 = smov 120   ;;  %vm1284_vm7 = vcmask 257024  }
  0x1f   : > { %977 = vperm.xlu1 %2419, %v970_v5   ;;  %v938_v6 = vld [vmem:[%s913_s11] sm:$0xff]  ;;  %955 = vperm.xlu2 %2420, %v940_v7   ;;  %v941_v11 = vld [vmem:[%s913_s11 + $0x18] sm:$0xff]  ;;  %v2382_v12 = vld [vmem:[%s3150_s12 + $0x8] sm:$0xff]  ;;  %s3155_s7 = sld [smem:[#allocation10_spill]]  ;;  %vm1596_vm8 = vcmask 1041408   ;;  %vm1589_vm9 = vcmask 31744  }
  0x20   : > { %1104 = vmatpush.bf16.msra.mxu1 %v2383_v2  ;;  %945 = vperm.xlu0 %2418, %v938_v6   ;;  %s908_s11 = scalar_lea.vmem %s3151_s13, %s2249_s29  ;;  %v2381_v18 = vld [vmem:[%s3150_s12] sm:$0xff]  ;;  %v2386_v21 = vld [vmem:[%s3110_s14 + $0x4] sm:$0xf0]  ;;  %v2280_v24 = vld [vmem:[%s3110_s14 + $0x8] sm:$0xf0]  ;;  %s3153_s13 = sld [smem:[#allocation12_spill]] }
  0x21   : > { %1071 = vmatpush.bf16.msra.mxu0 %v2382_v12  ;;  %v2385_v22 = vld [vmem:[%s3110_s14 + $0x4] sm:$0xf]  ;;  %v2279_v23 = vor.u32 %v2386_v21, %v2278_v20  ;;  %v937_v25 = vld [vmem:[%s908_s11] sm:$0xf]  ;;  %1165 = vmatpush.bf16.msra.mxu3 %v2291_v19  ;;  %v973_v49 = vld [vmem:[%s2661_s9 + $0x18] sm:$0xff]  ;;  %s3156_s2 = sld [smem:[#allocation7_spill]] }
  0x22   : > { %v2283_v26 = vor.u32 %v2385_v22, %v2280_v24  ;;  %v1042_v27 = vpack.c.bf16 %v937_v25, %v937_v25  ;;  %v2424_v34 = vld [vmem:[%s3154_s28] ss:$0 sm:$0xff]  ;;  %s3157_s30 = sld [smem:[#allocation9_spill]]  ;;  %s2477_s11 = smov 80   ;;  %vm1521_vm12 = vcmask 130048   ;;  %vm1523_vm13 = vcmask 195584  }
  0x23   : > { %2275 = vmatmul.msk.bf16.vlgmr.msra.gmra.mxu1 %vm1061_vm0, %v1041_v4  ;;  %1147 = vmatpush.bf16.msra.mxu2 %v2279_v23  ;;  %v2425_v6 = vld [vmem:[%s3111_s15] ss:$0 sm:$0xff]  ;;  %s2478_s28 = smov 64   ;;  %s3161_s1 = sld [smem:[#allocation8_spill]] }
  0x24   : > { %v2422_v28 = vld [vmem:[%s3152_s4] ss:$0 sm:$0xff]  ;;  %s2481_s4 = smov 16   ;;  %s2482_s6 = smov 8  }
  0x25   : > { %1072 = vmatpush.bf16.msra.mxu0 %v2381_v18  ;;  %1166 = vmatpush.bf16.msra.mxu3 %v2283_v26  ;;  %v2739_v54 = vld [vmem:[%s3155_s7] sm:$0xff]  ;;  %v2756_v5 = vld [vmem:[%s3155_s7 + $0x8] sm:$0xff] }
  0x26   : > { %v2423_v29 = vld [vmem:[%s3153_s13] ss:$0 sm:$0xff]  ;;  %s2476_s13 = smov 104  }
  0x27   : > { %982 = vperm.xlu1 %2419, %v971_v8   ;;  %v2426_v17 = vld [vmem:[%s3112_s16] ss:$0 sm:$0xff]  ;;  %s921_s9 = scalar_lea.vmem %s3156_s2, %s3166_s5  ;;  %s2483_s2 = smov 24  }
  0x28   : > { %950 = vperm.xlu0 %2418, %v939_v9   ;;  %2266 = vmatmul.msk.bf16.vlgmr.msra.gmra.mxu0 %vm1061_vm0, %v1042_v27 }
  0x2f   : > { %987 = vperm.xlu1 %2419, %v972_v10  }
  0x30   : > { %960 = vperm.xlu0 %2418, %v941_v11  }
  0x79   : > { %v956_v50 = vpop.permute.xlu2 %955 }
  0x7a   : > { %v968_v56 = vmul.f32 %v2423_v29, %v956_v50 }
  0x91   : > { %v978_v30 = vpop.permute.xlu1 %977 }
  0x92   : > { %v946_v31 = vpop.permute.xlu0 %945  ;;  %v998_v32 = vmul.f32 %v2422_v28, %v978_v30 }
  0x93   : > { %v966_v33 = vmul.f32 %v2423_v29, %v946_v31 }
  0x95   : > { %v1002_v35 = vadd.f32 %v998_v32, %v966_v33 }
  0x97   : > { %v2717_v39 = vadd.f32 %v2424_v34, %v1002_v35 }
  0x99   : > { %v983_v36 = vpop.permute.xlu1 %982  ;;  %v1014_v44 = vmax.f32 %v2717_v39, 0.0 }
  0x9a   : > { %v999_v37 = vmul.f32 %v2422_v28, %v983_v36  ;;  %v951_v38 = vpop.permute.xlu0 %950 }
  0x9b   : > { %v967_v40 = vmul.f32 %v2423_v29, %v951_v38 }
  0x9d   : > { %v1003_v42 = vadd.f32 %v999_v37, %v967_v40 }
  0x9f   : > { %v2724_v45 = vadd.f32 %v2424_v34, %v1003_v42 }
  0xa0   : > { %v2719_v41 = vpop.f32.mrf.mxu1 }
  0xa1   : > { %v1189_v43 = vpack.c.bf16 %v2719_v41, %v2719_v41  ;;  %v1015_v46 = vmax.f32 %v2724_v45, 0.0  ;;  %v988_v51 = vpop.permute.xlu1 %987 }
  0xa2   : > { %v1000_v55 = vmul.f32 %v2422_v28, %v988_v51  ;;  %v961_v57 = vpop.permute.xlu0 %960 }
  0xa3   : > { %1201 = vrot.lane.b32.xlu2 %v1189_v43, %s2472_s8  ;;  %v1043_v47 = vpack.c.bf16 %v1015_v46, %v1014_v44  ;;  %v969_v60 = vmul.f32 %v2423_v29, %v961_v57  ;;  %v1021_v57 = vld [vmem:[%s3157_s30] sm:$0x3]  ;;  %s2479_s30 = smov 88  }
  0xa4   : > { %v1004_v58 = vadd.f32 %v1000_v55, %v968_v56  ;;  %v1018_v55 = vld [vmem:[%s921_s9] sm:$0x1]  ;;  %s3160_s9 = sld [smem:[#allocation11_spill]] }
  0xa5   : > { %2292 = vmatmul.msk.bf16.vlgmr.msra.gmra.mxu2 %vm1061_vm0, %v1043_v47  ;;  %2294 = vmatmul.msk.bf16.vlgmr.msra.gmra.mxu3 %vm1061_vm0, %v1043_v47  ;;  %v2765_v7 = vpop.f32.mrf.mxu0  ;;  %vm1019_vm3 = vcmp.gt.f32.partialorder %v1018_v55, 0.0 }
  0xa6   : > { %v2743_v62 = vadd.f32 %v2424_v34, %v1004_v58  ;;  %v2768_v8 = vadd.f32 %v2425_v6, %v2765_v7  ;;  %v1032_v58 = vsel %vm1019_vm3, 1, %v2471_v1 }
  0xa8   : > { %v1108_v48 = vpop.f32.mrf.mxu1  ;;  %v1016_v2 = vmax.f32 %v2743_v62, 0.0  ;;  %v1246_v9 = vmul.f32 0.17677669, %v2768_v8 }
  0xaa   : > { %v1247_v10 = vpack.c.bf16 %v1246_v9, %v1246_v9 }
  0xab   : > { %992 = vperm.xlu2 %2420, %v973_v49  }
  0xac   : > { %v1320_v11 = vunpack.c.l.b16 %v1247_v10 }
  0xad   : > { %v1076_v12 = vpop.f32.mrf.mxu0 }
  0xae   : > { %v2771_v13 = vpack.c.b16 %v1320_v11, %v1320_v11 }
  0xb3   : > { %1384 = vrot.lane.b32.xlu2 %v2771_v13, %s2473_s3 }
  0xfd   : > { %v1202_v52 = vpop.permute.xlu2 %1201 }
  0xfe   : > { %v1212_v53 = vsel %vm1210_vm1, %v1202_v52, 0 }
  0xff   : > { %1221 = vmatpush.bf16.msrb.mxu0 %v1212_v53 }
 0x102   : > { %2304 = vmatmul.msk.bf16.vlgmr.msrb.gmra.mxu0 %vm1203_vm2, %v2739_v54 }
 0x105   : > { %v993_v59 = vpop.permute.xlu2 %992 }
 0x106   : > { %v1001_v61 = vmul.f32 %v2422_v28, %v993_v59  ;;  %v1033_v59 = vperm.slane %v1032_v58, 0 }
 0x108   : > { %v1005_v63 = vadd.f32 %v1001_v61, %v969_v60  ;;  %v1037_v60 = vunpack.c.l.bf16 %v1021_v57  ;;  %vm2819_vm4 = vcmp.eq.s32.totalorder %v1033_v59, 1 }
 0x10a   : > { %v2745_v0 = vadd.f32 %v2424_v34, %v1005_v63  ;;  %vm1038_vm5 = vcmp.gt.f32.partialorder %v1037_v60, 0.0  ;;  %v2475_v63 = vmov -1e+10  }
 0x10b   : > { %vm1039_vm6 = vmand %vm1038_vm5, %vm2819_vm4 }
 0x10c   : > { %v1017_v3 = vmax.f32 %v2745_v0, 0.0 }
 0x10d   : > { %v1385_v48 = vpop.permute.xlu2 %1384 }
 0x10e   : > { %v1044_v4 = vpack.c.bf16 %v1017_v3, %v1016_v2 }
 0x110   : > { %2293 = vmatmul.msk.bf16.gmra.mxu2 %vm1061_vm0, %v1044_v4  ;;  %2295 = vmatmul.msk.bf16.gmra.mxu3 %vm1061_vm0, %v1044_v4  ;;  %v2826_v4 = vsel %vm1039_vm6, 0.0, %v2475_v63 }
 0x112   : > { %2305 = vmatmul.msk.bf16.gmra.mxu0 %vm1203_vm2, %v2756_v5 }
 0x128   : > { %v2775_v14 = vpop.f32.mrf.mxu2  ;;  %v2936_v61 = vpop.f32.mrf.mxu3 }
 0x130   : > { %v2781_v19 = vpop.f32.mrf.mxu2 }
 0x17f   : > { %v1223_v15 = vpop.f32.mrf.mxu0 }
 0x180   : > { %v1224_v16 = vadd.f32 %v1223_v15, %v2775_v14 }
 0x182   : > { %v1237_v18 = vadd.f32 %v2426_v17, %v1224_v16 }
 0x184   : > { %v1248_v22 = vpack.c.bf16 %v1237_v18, %v1237_v18 }
 0x186   : > { %v1256_v25 = vunpack.c.l.b16 %v1248_v22 }
 0x187   : > { %v1225_v20 = vpop.f32.mrf.mxu0 }
 0x188   : > { %v1226_v21 = vadd.f32 %v1225_v20, %v2781_v19 }
 0x18a   : > { %v1238_v23 = vadd.f32 %v2426_v17, %v1226_v21 }
 0x18c   : > { %v1249_v24 = vpack.c.bf16 %v1238_v23, %v1238_v23 }
 0x18e   : > { %v1257_v26 = vunpack.c.l.b16 %v1249_v24 }
 0x18f   : > { %v1228_v28 = vpop.f32.mrf.mxu0 }
 0x190   : > { %v2784_v27 = vpack.c.b16 %v1257_v26, %v1256_v25  ;;  %v1183_v25 = vpack.c.bf16 %v2765_v7, %v2765_v7 }
 0x192   : > { %1386 = vrot.lane.b32.xlu1 %v2784_v27, %s2473_s3  ;;  %v1266_v47 = vsel %vm1203_vm2, %v2784_v27, 0 }
 0x193   : > { %v2788_v29 = vpop.f32.mrf.mxu2 }
 0x194   : > { %v1229_v30 = vadd.f32 %v1228_v28, %v2788_v29 }
 0x196   : > { %v1239_v31 = vadd.f32 %v2426_v17, %v1229_v30 }
 0x197   : > { %v1230_v32 = vpop.f32.mrf.mxu0 }
 0x198   : > { %v1250_v35 = vpack.c.bf16 %v1239_v31, %v1239_v31 }
 0x19a   : > { %v1258_v38 = vunpack.c.l.b16 %v1250_v35 }
 0x19b   : > { %v2791_v33 = vpop.f32.mrf.mxu2 }
 0x19c   : > { %v1231_v34 = vadd.f32 %v1230_v32, %v2791_v33 }
 0x19e   : > { %v1240_v36 = vadd.f32 %v2426_v17, %v1231_v34 }
 0x1a0   : > { %v1251_v37 = vpack.c.bf16 %v1240_v36, %v1240_v36 }
 0x1a2   : > { %v1259_v40 = vunpack.c.l.b16 %v1251_v37 }
 0x1a4   : > { %v2794_v42 = vpack.c.b16 %v1259_v40, %v1258_v38 }
 0x1a6   : > { %1326 = vrot.lane.b32.xlu2 %v2794_v42, %s2474_s10  ;;  %1388 = vrot.lane.b32.xlu0 %v2794_v42, %s2473_s3  ;;  %v1269_v43 = vsel %vm1203_vm2, %v2794_v42, 0 }
 0x1a7   : > { %1277 = vmatpush.bf16.xpose.msrb.mxu1 %v1269_v43 }
 0x1ae   : > { %1297 = vrot.lane.b32.xlu2 %v2784_v27, %s2472_s8 }
 0x1af   : > { %1278 = vmatpush.bf16.xpose.msrb.mxu1 %v1266_v47 }
 0x1b6   : > { %2306 = vmatmul.msk.bf16.vlgmr.msrb.gmra.mxu1 %vm1203_vm2, %v1247_v10 }
 0x200   : > { %v1327_v49 = vpop.permute.xlu2 %1326 }
 0x201   : > { %v1335_v50 = vsel %vm1203_vm2, %v1327_v49, 0 }
 0x202   : > { %1343 = vmatpush.bf16.xpose.msrb.mxu2 %v1335_v50 }
 0x204   : > { %v1387_v53 = vpop.permute.xlu1 %1386 }
 0x205   : > { %v1394_v56 = vsel %vm1203_vm2, %v1387_v53, 0 }
 0x208   : > { %v1298_v24 = vpop.permute.xlu2 %1297 }
 0x218   : > { %v1389_v51 = vpop.permute.xlu0 %1388 }
 0x219   : > { %v1397_v52 = vsel %vm1203_vm2, %v1389_v51, 0 }
 0x21a   : > { %1405 = vmatpush.bf16.xpose.msra.mxu0 %v1397_v52 }
 0x222   : > { %1406 = vmatpush.bf16.xpose.msra.mxu0 %v1394_v56  ;;  %v2870_v56 = vld [vmem:[%s3160_s9] sm:$0xff] }
 0x229   : > { %2310 = vmatmul.msk.bf16.vlgmr.msra.gmra.mxu0 %vm1203_vm2, %v1385_v48 }
 0x233   : > { %v1280_v6 = vpop.f32.mrf.mxu1 }
 0x234   : > { %v1281_v1 = vadd.f32 %v1280_v6, %v2826_v4  ;;  %v2879_v6 = vld [vmem:[%s3160_s9 + $0x8] sm:$0xff] }
 0x236   : > { %v1285_v9 = vsel %vm1284_vm7, %v1281_v1, -inf }
 0x237   : > { %1286 = vmax.xlane.f32.xlu0 %v1285_v9 }
 0x23b   : > { %v1282_v10 = vpop.f32.mrf.mxu1 }
 0x24b   : > { %1299 = vrot.lane.b32.xlu0 %v2794_v42, %s2472_s8 }
 0x253   : > { %1322 = vrot.lane.b32.xlu0 %v2771_v13, %s2474_s10 }
 0x2a6   : > { %v1408_v11 = vpop.f32.mrf.mxu0 }
 0x2a7   : > { %v1409_v12 = vadd.f32 %v1408_v11, %v2826_v4 }
 0x2a9   : > { %v1412_v15 = vsel %vm1284_vm7, %v1409_v12, -inf }
 0x2aa   : > { %1413 = vmax.xlane.f32.xlu1 %v1412_v15  ;;  %v1287_v16 = vpop.xlane.xlu0 %1286 }
 0x2ab   : > { %v1288_v17 = vsub.f32 %v1281_v1, %v1287_v16 }
 0x2ad   : > { %v1289_v18 = vmul.f32 1.442695, %v1288_v17 }
 0x2ae   : > { %v1410_v20 = vpop.f32.mrf.mxu0 }
 0x2af   : > { %2431 = vpow2.f32 %v1289_v18 }
 0x2b5   : > { %v2432_v21 = vpop.eup %2431 }
 0x2b6   : > { %v1291_v22 = vsel %vm1284_vm7, %v2432_v21, 0.0 }
 0x2b7   : > { %1292 = vadd.xlane.f32.xlu2 %v1291_v22 }
 0x2bd   : > { %v1300_v23 = vpop.permute.xlu0 %1299 }
 0x2be   : > { %1312 = vmatpush.bf16.msra.mxu1 %v1300_v23 }
 0x2c2   : > { %1313 = vmatpush.bf16.msra.mxu1 %v1298_v24 }
 0x2c3   : > { %1324 = vrot.lane.b32.xlu1 %v2784_v27, %s2474_s10 }
 0x2c5   : > { %v1323_v37 = vpop.permute.xlu0 %1322 }
 0x2cb   : > { %1450 = vrot.lane.b32.xlu1 %v2794_v42, %s2476_s13 }
 0x2cf   : > { %1426 = vrot.lane.b32.xlu2 %v2794_v42, %s2477_s11 }
 0x2d3   : > { %1448 = vrot.lane.b32.xlu1 %v2784_v27, %s2476_s13 }
 0x2d7   : > { %1424 = vrot.lane.b32.xlu2 %v2784_v27, %s2477_s11 }
 0x2db   : > { %1446 = vrot.lane.b32.xlu1 %v2771_v13, %s2476_s13 }
 0x2df   : > { %1571 = vrot.lane.b32.xlu2 %v1183_v25, %s2472_s8 }
 0x2e7   : > { %1581 = vrot.lane.b32.xlu2 %v2788_v29, %s2478_s28 }
 0x2ef   : > { %1583 = vrot.lane.b32.xlu2 %v2791_v33, %s2478_s28 }
 0x2f7   : > { %1579 = vrot.lane.b32.xlu2 %v2781_v19, %s2478_s28 }
 0x31d   : > { %v1414_v26 = vpop.xlane.xlu1 %1413 }
 0x31e   : > { %v1415_v28 = vsub.f32 %v1409_v12, %v1414_v26 }
 0x320   : > { %v1416_v30 = vmul.f32 1.442695, %v1415_v28 }
 0x322   : > { %2433 = vpow2.f32 %v1416_v30 }
 0x328   : > { %v2434_v31 = vpop.eup %2433 }
 0x329   : > { %v1418_v32 = vsel %vm1284_vm7, %v2434_v31, 0.0 }
 0x32a   : > { %1419 = vadd.xlane.f32.xlu0 %v1418_v32  ;;  %v1293_v13 = vpop.xlane.xlu2 %1292  ;;  %v2427_v32 = vld [vmem:[%s3116_s20] ss:$0 sm:$0xff] }
 0x32b   : > { %2435 = vrcp.f32 %v1293_v13 }
 0x331   : > { %v2436_v7 = vpop.eup %2435 }
 0x332   : > { %v1295_v34 = vmul.f32 %v2436_v7, %v2432_v21  ;;  %v1427_v35 = vpop.permute.xlu2 %1426 }
 0x333   : > { %1439 = vmatpush.bf16.msrb.mxu1 %v1427_v35 }
 0x334   : > { %v1296_v36 = vpack.c.bf16 %v1295_v34, %v1295_v34 }
 0x335   : > { %v1325_v29 = vpop.permute.xlu1 %1324 }
 0x336   : > { %2307 = vmatmul.msk.bf16.vlgmr.msra.gmra.mxu1 %vm1061_vm0, %v1296_v36  ;;  %v1332_v19 = vsel %vm1203_vm2, %v1325_v29, 0 }
 0x337   : > { %1344 = vmatpush.bf16.xpose.msrb.mxu2 %v1332_v19 }
 0x33a   : > { %v1425_v33 = vpop.permute.xlu2 %1424 }
 0x33b   : > { %1440 = vmatpush.bf16.msrb.mxu1 %v1425_v33 }
 0x33d   : > { %v1451_v38 = vpop.permute.xlu1 %1450 }
 0x33e   : > { %v1459_v40 = vsel %vm1203_vm2, %v1451_v38, 0  ;;  %1577 = vrot.lane.b32.xlu0 %v2775_v14, %s2478_s28  ;;  %2308 = vmatmul.msk.bf16.vlgmr.msrb.gmra.mxu2 %vm1203_vm2, %v1323_v37  ;;  %s2480_s28 = smov 72  }
 0x33f   : > { %1467 = vmatpush.bf16.xpose.msra.mxu2 %v1459_v40 }
 0x342   : > { %v1572_v43 = vpop.permute.xlu2 %1571 }
 0x343   : > { %v1598_v47 = vsel %vm1596_vm8, %v1572_v43, 0 }
 0x344   : > { %1607 = vmatpush.bf16.msra.mxu1 %v1598_v47 }
 0x345   : > { %v1449_v48 = vpop.permute.xlu1 %1448 }
 0x346   : > { %v1456_v49 = vsel %vm1203_vm2, %v1449_v48, 0 }
 0x347   : > { %1468 = vmatpush.bf16.xpose.msra.mxu2 %v1456_v49 }
 0x34a   : > { %v1582_v16 = vpop.permute.xlu2 %1581 }
 0x34d   : > { %v1447_v50 = vpop.permute.xlu1 %1446 }
 0x34e   : > { %2312 = vmatmul.msk.bf16.vlgmr.msra.gmra.mxu2 %vm1203_vm2, %v1447_v50 }
 0x39d   : > { %v1420_v51 = vpop.xlane.xlu0 %1419 }
 0x39e   : > { %2437 = vrcp.f32 %v1420_v51 }
 0x3a4   : > { %v2438_v52 = vpop.eup %2437 }
 0x3a5   : > { %v1422_v53 = vmul.f32 %v2438_v52, %v2434_v31 }
 0x3a7   : > { %v1423_v14 = vpack.c.bf16 %v1422_v53, %v1422_v53 }
 0x3a9   : > { %2311 = vmatmul.msk.bf16.vlgmr.msrb.gmra.mxu1 %vm1061_vm0, %v1423_v14 }
 0x3b0   : > { %v1578_v35 = vpop.permute.xlu0 %1577 }
 0x3b3   : > { %v2865_v55 = vpop.f32.mrf.mxu1 }
 0x3b9   : > { %2331 = vmatmul.msk.bf16.vlgmr.msra.gmra.mxu1 %vm1589_vm9, %v2870_v56 }
 0x3bb   : > { %v1317_v57 = vpop.f32.mrf.mxu1 }
 0x3c1   : > { %v1346_v58 = vpop.f32.mrf.mxu2 }
 0x3c2   : > { %v1347_v59 = vadd.f32 %v1346_v58, %v2826_v4 }
 0x3c4   : > { %v1350_v60 = vsel %vm1284_vm7, %v1347_v59, -inf }
 0x3c5   : > { %1351 = vmax.xlane.f32.xlu1 %v1350_v60  ;;  %v2421_v60 = vld [vmem:[%s3115_s19] ss:$0 sm:$0xff] }
 0x3c9   : > { %v1348_v1 = vpop.f32.mrf.mxu2  ;;  %2332 = vmatmul.msk.bf16.gmra.mxu1 %vm1589_vm9, %v2879_v6 }
 0x3d1   : > { %v1470_v9 = vpop.f32.mrf.mxu2 }
 0x3d2   : > { %v1471_v10 = vadd.f32 %v1470_v9, %v2826_v4  ;;  %v1584_v4 = vpop.permute.xlu2 %1583 }
 0x3d4   : > { %v1474_v11 = vsel %vm1284_vm7, %v1471_v10, -inf }
 0x3d5   : > { %1475 = vmax.xlane.f32.xlu2 %v1474_v11 }
 0x3d9   : > { %v1472_v12 = vpop.f32.mrf.mxu2 }
 0x3da   : > { %v1580_v24 = vpop.permute.xlu2 %1579 }
 0x3de   : > { %1364 = vrot.lane.b32.xlu1 %v2794_v42, %s2479_s30 }
 0x3e6   : > { %1362 = vrot.lane.b32.xlu1 %v2784_v27, %s2479_s30 }
 0x3ee   : > { %1488 = vrot.lane.b32.xlu1 %v2794_v42, %s2480_s28 }
 0x426   : > { %v2891_v15 = vpop.f32.mrf.mxu1 }
 0x42e   : > { %v1444_v17 = vpop.f32.mrf.mxu1 }
 0x436   : > { %v1609_v18 = vpop.f32.mrf.mxu1 }
 0x437   : > { %v1610_v29 = vadd.f32 %v1609_v18, %v1578_v35 }
 0x438   : > { %v1352_v20 = vpop.xlane.xlu1 %1351 }
 0x439   : > { %v1353_v21 = vsub.f32 %v1347_v59, %v1352_v20  ;;  %v1623_v47 = vadd.f32 %v2427_v32, %v1610_v29 }
 0x43b   : > { %v1354_v22 = vmul.f32 1.442695, %v1353_v21  ;;  %v1634_v53 = vpack.c.bf16 %v1623_v47, %v1623_v47 }
 0x43d   : > { %2439 = vpow2.f32 %v1354_v22  ;;  %v1642_v1 = vunpack.c.l.b16 %v1634_v53 }
 0x43e   : > { %v1611_v23 = vpop.f32.mrf.mxu1 }
 0x43f   : > { %v1612_v7 = vadd.f32 %v1611_v23, %v1580_v24 }
 0x441   : > { %v1624_v37 = vadd.f32 %v2427_v32, %v1612_v7  ;;  %v2941_v7 = vpop.f32.mrf.mxu3 }
 0x443   : > { %v2440_v25 = vpop.eup %2439  ;;  %v1635_v50 = vpack.c.bf16 %v1624_v37, %v1624_v37 }
 0x444   : > { %v1356_v26 = vsel %vm1284_vm7, %v2440_v25, 0.0 }
 0x445   : > { %1357 = vadd.xlane.f32.xlu0 %v1356_v26  ;;  %v1643_v58 = vunpack.c.l.b16 %v1635_v50 }
 0x446   : > { %v1614_v28 = vpop.f32.mrf.mxu1 }
 0x447   : > { %v1615_v31 = vadd.f32 %v1614_v28, %v1582_v16  ;;  %v2905_v9 = vpack.c.b16 %v1643_v58, %v1642_v1 }
 0x448   : > { %v1476_v30 = vpop.xlane.xlu2 %1475 }
 0x449   : > { %v1477_v42 = vsub.f32 %v1471_v10, %v1476_v30  ;;  %v1625_v34 = vadd.f32 %v2427_v32, %v1615_v31  ;;  %v2908_v10 = vadd.f32 %v2421_v60, %v2719_v41  ;;  %v1652_v12 = vsel %vm1203_vm2, %v2905_v9, 0 }
 0x44b   : > { %v1478_v13 = vmul.f32 1.442695, %v1477_v42  ;;  %v1636_v38 = vpack.c.bf16 %v1625_v34, %v1625_v34  ;;  %v1632_v16 = vmul.f32 0.17677669, %v2908_v10 }
 0x44d   : > { %2441 = vpow2.f32 %v1478_v13  ;;  %v1644_v51 = vunpack.c.l.b16 %v1636_v38  ;;  %v1633_v17 = vpack.c.bf16 %v1632_v16, %v1632_v16 }
 0x44e   : > { %v1616_v36 = vpop.f32.mrf.mxu1 }
 0x44f   : > { %v1617_v19 = vadd.f32 %v1616_v36, %v1584_v4 }
 0x450   : > { %v1365_v33 = vpop.permute.xlu1 %1364 }
 0x451   : > { %v1626_v40 = vadd.f32 %v2427_v32, %v1617_v19  ;;  %1377 = vmatpush.bf16.msrb.mxu3 %v1365_v33 }
 0x453   : > { %v2442_v43 = vpop.eup %2441  ;;  %v1637_v48 = vpack.c.bf16 %v1626_v40, %v1626_v40 }
 0x454   : > { %v1480_v49 = vsel %vm1284_vm7, %v2442_v43, 0.0 }
 0x455   : > { %v1645_v52 = vunpack.c.l.b16 %v1637_v48  ;;  %1481 = vadd.xlane.f32.xlu2 %v1480_v49 }
 0x457   : > { %v2898_v14 = vpack.c.b16 %v1645_v52, %v1644_v51 }
 0x458   : > { %v1363_v57 = vpop.permute.xlu1 %1362 }
 0x459   : > { %1378 = vmatpush.bf16.msrb.mxu3 %v1363_v57  ;;  %v1655_v59 = vsel %vm1203_vm2, %v2898_v14, 0  ;;  %v2390_v57 = vld [vmem:[%s3113_s17 + $0x8] sm:$0xff] }
 0x45a   : > { %1663 = vmatpush.bf16.xpose.msrb.mxu2 %v1655_v59  ;;  %1551 = vmatpush.bf16.msrb.mxu0 %v2390_v57  ;;  %v2389_v59 = vld [vmem:[%s3113_s17] sm:$0xff] }
 0x45e   : > { %1552 = vmatpush.bf16.msrb.mxu0 %v2389_v59 }
 0x460   : > { %v1489_v11 = vpop.permute.xlu1 %1488 }
 0x461   : > { %1501 = vmatpush.bf16.msra.mxu3 %v1489_v11 }
 0x462   : > { %1664 = vmatpush.bf16.xpose.msrb.mxu2 %v1652_v12 }
 0x469   : > { %2333 = vmatmul.msk.bf16.vlgmr.msrb.gmra.mxu2 %vm1203_vm2, %v1633_v17 }
 0x46d   : > { %1486 = vrot.lane.b32.xlu2 %v2784_v27, %s2480_s28  ;;  %v1020_v27 = vld [vmem:[%s3161_s1] sm:$0xf]  ;;  %s929_s1 = scalar_lea.vmem %s3123_s27, %s2249_s29 }
 0x46e   : > { %v1030_v28 = vunpack.c.l.bf16 %v1020_v27 }
 0x470   : > { %vm1031_vm10 = vcmp.gt.f32.partialorder %v1030_v28, 0.0 }
 0x471   : > { %vm1035_vm11 = vmand %vm1031_vm10, %vm2819_vm4 }
 0x4b8   : > { %v1358_v4 = vpop.xlane.xlu0 %1357 }
 0x4b9   : > { %2443 = vrcp.f32 %v1358_v4 }
 0x4bf   : > { %v2444_v18 = vpop.eup %2443 }
 0x4c0   : > { %v1360_v20 = vmul.f32 %v2444_v18, %v2440_v25  ;;  %v2924_v25 = vsel %vm1035_vm11, 0.0, %v2475_v63  ;;  %v1705_v63 = vunpack.c.l.b16 %v1633_v17 }
 0x4c2   : > { %v1361_v41 = vpack.c.bf16 %v1360_v20, %v1360_v20  ;;  %v1706_v13 = vpack.c.b16 %v1705_v63, %v1705_v63 }
 0x4c4   : > { %2309 = vmatmul.msk.bf16.vlgmr.msrb.gmra.mxu3 %vm1061_vm0, %v1361_v41 }
 0x4c8   : > { %v1482_v21 = vpop.xlane.xlu2 %1481 }
 0x4c9   : > { %2445 = vrcp.f32 %v1482_v21 }
 0x4cf   : > { %v2446_v22 = vpop.eup %2445 }
 0x4d0   : > { %v1484_v23 = vmul.f32 %v2446_v22, %v2442_v43  ;;  %v1487_v24 = vpop.permute.xlu2 %1486 }
 0x4d1   : > { %1502 = vmatpush.bf16.msra.mxu3 %v1487_v24 }
 0x4d2   : > { %v1485_v26 = vpack.c.bf16 %v1484_v23, %v1484_v23 }
 0x4d4   : > { %2313 = vmatmul.msk.bf16.vlgmr.msra.gmra.mxu3 %vm1061_vm0, %v1485_v26 }
 0x4ec   : > { %v1666_v30 = vpop.f32.mrf.mxu2 }
 0x4ed   : > { %v1667_v31 = vadd.f32 %v1666_v30, %v2924_v25 }
 0x4ef   : > { %v1670_v42 = vsel %vm1061_vm0, %v1667_v31, -inf }
 0x4f0   : > { %1671 = vmax.xlane.f32.xlu0 %v1670_v42 }
 0x4f4   : > { %v1668_v32 = vpop.f32.mrf.mxu2 }
 0x504   : > { %1513 = vrot.lane.b32.xlu0 %v2891_v15, %s2481_s4  ;;  %v2943_v15 = vpop.f32.mrf.mxu3 }
 0x50c   : > { %1709 = vrot.lane.b32.xlu0 %v2905_v9, %s2474_s10  ;;  %v2945_v34 = vpop.f32.mrf.mxu3 }
 0x514   : > { %1773 = vrot.lane.b32.xlu0 %v2898_v14, %s2473_s3 }
 0x51c   : > { %1835 = vrot.lane.b32.xlu0 %v2898_v14, %s2476_s13 }
 0x524   : > { %1833 = vrot.lane.b32.xlu0 %v2905_v9, %s2476_s13 }
 0x52c   : > { %1831 = vrot.lane.b32.xlu0 %v1706_v13, %s2476_s13 }
 0x547   : > { %v1380_v35 = vpop.f32.mrf.mxu3 }
 0x548   : > { %1509 = vrot.lane.b32.xlu1 %v1380_v35, %s2482_s6  ;;  %v2428_v35 = vld [vmem:[%s3114_s18] ss:$0 sm:$0xff] }
 0x54f   : > { %v1382_v36 = vpop.f32.mrf.mxu3 }
 0x557   : > { %v1504_v29 = vpop.f32.mrf.mxu3 }
 0x558   : > { %1517 = vrot.lane.b32.xlu1 %v1504_v29, %s2483_s2 }
 0x55f   : > { %v1506_v19 = vpop.f32.mrf.mxu3 }
 0x560   : > { %1711 = vrot.lane.b32.xlu1 %v2898_v14, %s2474_s10 }
 0x563   : > { %v1672_v33 = vpop.xlane.xlu0 %1671 }
 0x564   : > { %v1673_v37 = vsub.f32 %v1667_v31, %v1672_v33 }
 0x566   : > { %v1674_v38 = vmul.f32 1.442695, %v1673_v37 }
 0x568   : > { %2447 = vpow2.f32 %v1674_v38  ;;  %1684 = vrot.lane.b32.xlu1 %v2898_v14, %s2472_s8 }
 0x56e   : > { %v2448_v40 = vpop.eup %2447 }
 0x56f   : > { %v1676_v43 = vsel %vm1061_vm0, %v2448_v40, 0.0 }
 0x570   : > { %1682 = vrot.lane.b32.xlu1 %v2905_v9, %s2472_s8  ;;  %1677 = vadd.xlane.f32.xlu2 %v1676_v43 }
 0x576   : > { %v1514_v47 = vpop.permute.xlu0 %1513 }
 0x578   : > { %1707 = vrot.lane.b32.xlu1 %v1706_v13, %s2474_s10 }
 0x57e   : > { %v1710_v48 = vpop.permute.xlu0 %1709 }
 0x57f   : > { %v1717_v21 = vsel %vm1203_vm2, %v1710_v48, 0 }
 0x580   : > { %1771 = vrot.lane.b32.xlu1 %v2905_v9, %s2473_s3 }
 0x586   : > { %v1774_v49 = vpop.permute.xlu0 %1773 }
 0x587   : > { %v1782_v22 = vsel %vm1203_vm2, %v1774_v49, 0 }
 0x588   : > { %1769 = vrot.lane.b32.xlu1 %v1706_v13, %s2473_s3 }
 0x58e   : > { %v1836_v50 = vpop.permute.xlu0 %1835 }
 0x58f   : > { %v1844_v51 = vsel %vm1203_vm2, %v1836_v50, 0 }
 0x590   : > { %1852 = vmatpush.bf16.xpose.msrb.mxu1 %v1844_v51 }
 0x596   : > { %v1834_v52 = vpop.permute.xlu0 %1833 }
 0x597   : > { %v1841_v53 = vsel %vm1203_vm2, %v1834_v52, 0 }
 0x598   : > { %1853 = vmatpush.bf16.xpose.msrb.mxu1 %v1841_v53 }
 0x59e   : > { %v1832_v58 = vpop.permute.xlu0 %1831 }
 0x59f   : > { %2339 = vmatmul.msk.bf16.vlgmr.msrb.gmra.mxu1 %vm1203_vm2, %v1832_v58 }
 0x5ba   : > { %v1510_v60 = vpop.permute.xlu1 %1509 }
 0x5bb   : > { %v1520_v1 = vsel %vm1203_vm2, %v2865_v55, %v1510_v60 }
 0x5bc   : > { %v1522_v12 = vsel %vm1521_vm12, %v1520_v1, %v1514_v47 }
 0x5ca   : > { %v1518_v11 = vpop.permute.xlu1 %1517 }
 0x5cb   : > { %v1524_v16 = vsel %vm1523_vm13, %v1522_v12, %v1518_v11 }
 0x5cc   : > { %v1525_v17 = vadd.f32 %v1524_v16, %v2768_v8 }
 0x5ce   : > { %v1526_v4 = vpack.c.bf16 %v1525_v17, %v1525_v17 }
 0x5d0   : > { %2322 = vmatmul.msk.bf16.vlgmr.msrb.gmra.mxu0 %vm1061_vm0, %v1526_v4 }
 0x5d2   : > { %v1712_v18 = vpop.permute.xlu1 %1711 }
 0x5d3   : > { %v1720_v20 = vsel %vm1203_vm2, %v1712_v18, 0 }
 0x5d4   : > { %1728 = vmatpush.bf16.xpose.msra.mxu0 %v1720_v20 }
 0x5da   : > { %v1685_v41 = vpop.permute.xlu1 %1684 }
 0x5db   : > { %1697 = vmatpush.bf16.msrb.mxu3 %v1685_v41 }
 0x5dc   : > { %1729 = vmatpush.bf16.xpose.msra.mxu0 %v1717_v21 }
 0x5e2   : > { %v1683_v55 = vpop.permute.xlu1 %1682 }
 0x5e3   : > { %1698 = vmatpush.bf16.msrb.mxu3 %v1683_v55  ;;  %v1678_v23 = vpop.xlane.xlu2 %1677 }
 0x5e4   : > { %2449 = vrcp.f32 %v1678_v23 }
 0x5e7   : > { %1790 = vmatpush.bf16.xpose.msra.mxu3 %v1782_v22 }
 0x5ea   : > { %v2450_v8 = vpop.eup %2449  ;;  %v1708_v24 = vpop.permute.xlu1 %1707 }
 0x5eb   : > { %v1680_v26 = vmul.f32 %v2450_v8, %v2448_v40  ;;  %2335 = vmatmul.msk.bf16.vlgmr.msra.gmra.mxu0 %vm1203_vm2, %v1708_v24 }
 0x5ed   : > { %v1681_v27 = vpack.c.bf16 %v1680_v26, %v1680_v26 }
 0x5ef   : > { %2334 = vmatmul.msk.bf16.vlgmr.msrb.gmra.mxu3 %vm1061_vm0, %v1681_v27 }
 0x5f2   : > { %v1772_v28 = vpop.permute.xlu1 %1771 }
 0x5f3   : > { %v1779_v30 = vsel %vm1203_vm2, %v1772_v28, 0 }
 0x5f4   : > { %1791 = vmatpush.bf16.xpose.msra.mxu3 %v1779_v30 }
 0x5fa   : > { %v1770_v31 = vpop.permute.xlu1 %1769 }
 0x5ff   : > { %2337 = vmatmul.msk.bf16.vlgmr.msra.gmra.mxu3 %vm1203_vm2, %v1770_v31 }
 0x61c   : > { %v1855_v42 = vpop.f32.mrf.mxu1 }
 0x61d   : > { %v1856_v32 = vadd.f32 %v1855_v42, %v2924_v25 }
 0x61f   : > { %v1859_v63 = vsel %vm1061_vm0, %v1856_v32, -inf }
 0x620   : > { %1860 = vmax.xlane.f32.xlu1 %v1859_v63  ;;  %v2394_v63 = vld [vmem:[%s3119_s23 + $0x8] sm:$0xff] }
 0x624   : > { %v1857_v13 = vpop.f32.mrf.mxu1 }
 0x625   : > { %v2393_v13 = vld [vmem:[%s3119_s23] sm:$0xff] }
 0x64d   : > { %v1554_v36 = vpop.f32.mrf.mxu0 }
 0x64e   : > { %v1555_v29 = vadd.f32 %v2428_v35, %v1554_v36 }
 0x650   : > { %v1558_v19 = vmax.f32 %v1555_v29, 0.0 }
 0x652   : > { %v2992_v33 = vadd.f32 %v1558_v19, %v1525_v17 }
 0x654   : > { %2076 = vst.msk [vmem:[%s929_s1] sm:$0xf] %vm1284_vm7, %v2992_v33 }
 0x655   : > { %v1556_v37 = vpop.f32.mrf.mxu0 }
 0x656   : > { %v1943_v37 = vpack.c.bf16 %v2992_v33, %v2992_v33 }
 0x668   : > { %v1731_v38 = vpop.f32.mrf.mxu0 }
 0x669   : > { %v1732_v40 = vadd.f32 %v1731_v38, %v2924_v25 }
 0x66b   : > { %v1735_v43 = vsel %vm1061_vm0, %v1732_v40, -inf }
 0x66c   : > { %1736 = vmax.xlane.f32.xlu2 %v1735_v43 }
 0x670   : > { %v1733_v47 = vpop.f32.mrf.mxu0 }
 0x672   : > { %v2998_v48 = vpop.f32.mrf.mxu3 }
 0x67a   : > { %v1702_v49 = vpop.f32.mrf.mxu3 }
 0x67b   : > { %v2392_v49 = vld [vmem:[%s3117_s21 + $0x8] sm:$0xff] }
 0x67c   : > { %1934 = vmatpush.bf16.msrb.mxu3 %v2392_v49 }
 0x682   : > { %v1793_v50 = vpop.f32.mrf.mxu3 }
 0x683   : > { %v1794_v51 = vadd.f32 %v1793_v50, %v2924_v25  ;;  %v2391_v50 = vld [vmem:[%s3117_s21] sm:$0xff] }
 0x684   : > { %1935 = vmatpush.bf16.msrb.mxu3 %v2391_v50 }
 0x685   : > { %v1797_v52 = vsel %vm1061_vm0, %v1794_v51, -inf }
 0x686   : > { %1798 = vmax.xlane.f32.xlu0 %v1797_v52 }
 0x68a   : > { %v1795_v53 = vpop.f32.mrf.mxu3 }
 0x693   : > { %v1861_v57 = vpop.xlane.xlu1 %1860 }
 0x694   : > { %v1862_v58 = vsub.f32 %v1856_v32, %v1861_v57 }
 0x696   : > { %v1863_v59 = vmul.f32 1.442695, %v1862_v58 }
 0x698   : > { %2451 = vpow2.f32 %v1863_v59 }
 0x69a   : > { %1873 = vrot.lane.b32.xlu0 %v2898_v14, %s2480_s28 }
 0x69e   : > { %v2452_v60 = vpop.eup %2451 }
 0x69f   : > { %v1865_v1 = vsel %vm1061_vm0, %v2452_v60, 0.0 }
 0x6a0   : > { %1866 = vadd.xlane.f32.xlu1 %v1865_v1 }
 0x6a2   : > { %1811 = vrot.lane.b32.xlu0 %v2898_v14, %s2477_s11 }
 0x6aa   : > { %1809 = vrot.lane.b32.xlu0 %v2905_v9, %s2477_s11 }
 0x6b9   : > { %1871 = vrot.lane.b32.xlu1 %v2905_v9, %s2480_s28 }
 0x6df   : > { %v1737_v25 = vpop.xlane.xlu2 %1736 }
 0x6e0   : > { %v1738_v11 = vsub.f32 %v1732_v40, %v1737_v25 }
 0x6e2   : > { %v1739_v12 = vmul.f32 1.442695, %v1738_v11 }
 0x6e4   : > { %2453 = vpow2.f32 %v1739_v12 }
 0x6ea   : > { %v2454_v16 = vpop.eup %2453 }
 0x6eb   : > { %v1741_v17 = vsel %vm1061_vm0, %v2454_v16, 0.0 }
 0x6ec   : > { %1742 = vadd.xlane.f32.xlu2 %v1741_v17 }
 0x6f9   : > { %v1799_v4 = vpop.xlane.xlu0 %1798 }
 0x6fa   : > { %v1800_v21 = vsub.f32 %v1794_v51, %v1799_v4  ;;  %v2395_v4 = vld [vmem:[%s3120_s24] sm:$0xff] }
 0x6fc   : > { %v1801_v55 = vmul.f32 1.442695, %v1800_v21 }
 0x6fe   : > { %2455 = vpow2.f32 %v1801_v55 }
 0x704   : > { %1749 = vrot.lane.b32.xlu2 %v2898_v14, %s2479_s30  ;;  %v2456_v22 = vpop.eup %2455 }
 0x705   : > { %v1803_v23 = vsel %vm1061_vm0, %v2456_v22, 0.0 }
 0x70c   : > { %1747 = vrot.lane.b32.xlu2 %v2905_v9, %s2479_s30  ;;  %v1874_v18 = vpop.permute.xlu0 %1873  ;;  %s3162_s30 = sshll.u32 %s3166_s5, 3 }
 0x70d   : > { %s925_s8 = scalar_lea.vmem %s3122_s26, %s3162_s30 }
 0x713   : > { %v1867_v26 = vpop.xlane.xlu1 %1866 }
 0x714   : > { %v1812_v20 = vpop.permute.xlu0 %1811 }
 0x715   : > { %1824 = vmatpush.bf16.msrb.mxu0 %v1812_v20 }
 0x71c   : > { %v1810_v41 = vpop.permute.xlu0 %1809 }
 0x71d   : > { %1825 = vmatpush.bf16.msrb.mxu0 %v1810_v41 }
 0x721   : > { %1969 = vmatpush.bf16.msra.mxu0 %v2394_v63 }
 0x725   : > { %1970 = vmatpush.bf16.msra.mxu0 %v2393_v13 }
 0x72b   : > { %v1872_v30 = vpop.permute.xlu1 %1871 }
 0x735   : > { %1804 = vadd.xlane.f32.xlu2 %v1803_v23 }
 0x75f   : > { %v1743_v8 = vpop.xlane.xlu2 %1742 }
 0x760   : > { %2457 = vrcp.f32 %v1743_v8 }
 0x761   : > { %2459 = vrcp.f32 %v1867_v26 }
 0x766   : > { %v2458_v14 = vpop.eup %2457 }
 0x767   : > { %v1750_v24 = vpop.permute.xlu2 %1749  ;;  %v1745_v27 = vmul.f32 %v2458_v14, %v2454_v16  ;;  %v2460_v31 = vpop.eup %2459 }
 0x768   : > { %1762 = vmatpush.bf16.msra.mxu2 %v1750_v24  ;;  %v1869_v42 = vmul.f32 %v2460_v31, %v2452_v60 }
 0x769   : > { %v1746_v28 = vpack.c.bf16 %v1745_v27, %v1745_v27  ;;  %v2430_v27 = vld [vmem:[%s3121_s25] ss:$0 sm:$0xff] }
 0x76a   : > { %v1870_v32 = vpack.c.bf16 %v1869_v42, %v1869_v42 }
 0x76f   : > { %v1748_v9 = vpop.permute.xlu2 %1747 }
 0x770   : > { %1763 = vmatpush.bf16.msra.mxu2 %v1748_v9 }
 0x773   : > { %2336 = vmatmul.msk.bf16.vlgmr.msra.gmra.mxu2 %vm1061_vm0, %v1746_v28 }
 0x774   : > { %1886 = vmatpush.bf16.msrb.mxu2 %v1874_v18 }
 0x778   : > { %1887 = vmatpush.bf16.msrb.mxu2 %v1872_v30 }
 0x783   : > { %2340 = vmatmul.msk.bf16.vlgmr.msrb.gmra.mxu2 %vm1061_vm0, %v1870_v32 }
 0x7a8   : > { %v1805_v35 = vpop.xlane.xlu2 %1804 }
 0x7a9   : > { %2461 = vrcp.f32 %v1805_v35 }
 0x7af   : > { %v2462_v36 = vpop.eup %2461 }
 0x7b0   : > { %v1807_v29 = vmul.f32 %v2462_v36, %v2456_v22 }
 0x7b2   : > { %v1808_v19 = vpack.c.bf16 %v1807_v29, %v1807_v29 }
 0x7b4   : > { %2338 = vmatmul.msk.bf16.vlgmr.msrb.gmra.mxu0 %vm1061_vm0, %v1808_v19 }
 0x7c4   : > { %2358 = vmatmul.msk.bf16.vlgmr.msra.gmra.mxu0 %vm1061_vm0, %v1943_v37 }
 0x7f6   : > { %v1765_v38 = vpop.f32.mrf.mxu2 }
 0x7f7   : > { %1894 = vrot.lane.b32.xlu1 %v1765_v38, %s2482_s6  ;;  %s3163_s6 = sld [smem:[#allocation17_spill]] }
 0x7fe   : > { %v1767_v40 = vpop.f32.mrf.mxu2 }
 0x806   : > { %v1889_v43 = vpop.f32.mrf.mxu2 }
 0x807   : > { %1902 = vrot.lane.b32.xlu1 %v1889_v43, %s2483_s2  ;;  %s934_s2 = scalar_lea.vmem %s3163_s6, %s2650_s0 }
 0x80e   : > { %v1891_v47 = vpop.f32.mrf.mxu2 }
 0x831   : > { %v1827_v33 = vpop.f32.mrf.mxu0 }
 0x832   : > { %1898 = vrot.lane.b32.xlu0 %v1827_v33, %s2481_s4 }
 0x839   : > { %v1829_v51 = vpop.f32.mrf.mxu0 }
 0x841   : > { %v1972_v52 = vpop.f32.mrf.mxu0 }
 0x842   : > { %v1976_v53 = vpack.c.bf16 %v1972_v52, %v1972_v52 }
 0x844   : > { %v2034_v57 = vsel %vm1596_vm8, %v1976_v53, 0 }
 0x845   : > { %2043 = vmatpush.bf16.msra.mxu3 %v2034_v57 }
 0x849   : > { %v1974_v58 = vpop.f32.mrf.mxu0 }
 0x869   : > { %v1895_v59 = vpop.permute.xlu1 %1894 }
 0x86a   : > { %v1905_v60 = vsel %vm1203_vm2, %v2998_v48, %v1895_v59  ;;  %v2396_v48 = vld [vmem:[%s3120_s24 + $0x8] sm:$0xff] }
 0x86b   : > { %2003 = vmatpush.bf16.msra.mxu1 %v2396_v48 }
 0x86f   : > { %2004 = vmatpush.bf16.msra.mxu1 %v2395_v4 }
 0x879   : > { %v1903_v25 = vpop.permute.xlu1 %1902 }
 0x8a4   : > { %v1899_v1 = vpop.permute.xlu0 %1898 }
 0x8a5   : > { %v1906_v11 = vsel %vm1521_vm12, %v1905_v60, %v1899_v1 }
 0x8a6   : > { %v1907_v12 = vsel %vm1523_vm13, %v1906_v11, %v1903_v25 }
 0x8a7   : > { %v1908_v16 = vadd.f32 %v1907_v12, %v2908_v10  ;;  %v2429_v10 = vld [vmem:[%s3118_s22] ss:$0 sm:$0xff] }
 0x8a9   : > { %v1909_v17 = vpack.c.bf16 %v1908_v16, %v1908_v16 }
 0x8ab   : > { %2349 = vmatmul.msk.bf16.vlgmr.msrb.gmra.mxu3 %vm1061_vm0, %v1909_v17 }
 0x8bb   : > { %2370 = vmatmul.msk.bf16.vlgmr.msra.gmra.mxu3 %vm1589_vm9, %v2870_v56 }
 0x8cb   : > { %2371 = vmatmul.msk.bf16.gmra.mxu3 %vm1589_vm9, %v2879_v6 }
 0x92e   : > { %v1937_v18 = vpop.f32.mrf.mxu3 }
 0x92f   : > { %v1938_v20 = vadd.f32 %v2429_v10, %v1937_v18 }
 0x931   : > { %v1941_v56 = vmax.f32 %v1938_v20, 0.0 }
 0x933   : > { %v1942_v6 = vadd.f32 %v1941_v56, %v1908_v16 }
 0x935   : > { %v1977_v41 = vpack.c.bf16 %v1942_v6, %v1942_v6  ;;  %2075 = vst.msk [vmem:[%s925_s8] sm:$0xff] %vm1061_vm0, %v1942_v6 }
 0x936   : > { %v1939_v21 = vpop.f32.mrf.mxu3 }
 0x937   : > { %2367 = vmatmul.msk.bf16.vlgmr.msra.gmra.mxu1 %vm1061_vm0, %v1977_v41 }
 0x93e   : > { %v2045_v24 = vpop.f32.mrf.mxu3 }
 0x946   : > { %v2047_v28 = vpop.f32.mrf.mxu3 }
 0x94e   : > { %v2050_v13 = vpop.f32.mrf.mxu3 }
 0x956   : > { %v2052_v38 = vpop.f32.mrf.mxu3 }
 0x9b4   : > { %v2006_v55 = vpop.f32.mrf.mxu1 }
 0x9b5   : > { %v2010_v22 = vpack.c.bf16 %v2006_v55, %v2006_v55 }
 0x9b7   : > { %v2012_v23 = vsel %vm1210_vm1, %v2010_v22, 0 }
 0x9b8   : > { %2021 = vmatpush.bf16.msra.mxu2 %v2012_v23 }
 0x9bb   : > { %2368 = vmatmul.msk.bf16.vlgmr.msra.gmra.mxu2 %vm1203_vm2, %v2739_v54 }
 0x9bc   : > { %v2008_v8 = vpop.f32.mrf.mxu1 }
 0x9cb   : > { %2369 = vmatmul.msk.bf16.gmra.mxu2 %vm1203_vm2, %v2756_v5 }
 0xa3e   : > { %v2023_v14 = vpop.f32.mrf.mxu2 }
 0xa3f   : > { %v2046_v26 = vadd.f32 %v2045_v24, %v2023_v14 }
 0xa41   : > { %v2055_v9 = vadd.f32 %v2046_v26, %v2936_v61 }
 0xa43   : > { %v2063_v30 = vadd.f32 %v2430_v27, %v2055_v9 }
 0xa45   : > { %v2067_v31 = vmax.f32 %v2063_v30, 0.0 }
 0xa46   : > { %v2025_v54 = vpop.f32.mrf.mxu2 }
 0xa47   : > { %v2071_v5 = vadd.f32 %v2067_v31, %v1014_v44  ;;  %v2048_v42 = vadd.f32 %v2047_v28, %v2025_v54 }
 0xa49   : > { %2077 = vst.msk [vmem:[%s934_s2] sm:$0xff] %vm1061_vm0, %v2071_v5  ;;  %v2056_v32 = vadd.f32 %v2048_v42, %v2941_v7 }
 0xa4b   : > { %v2064_v63 = vadd.f32 %v2430_v27, %v2056_v32 }
 0xa4d   : > { %v2068_v35 = vmax.f32 %v2064_v63, 0.0 }
 0xa4e   : > { %v2028_v61 = vpop.f32.mrf.mxu2 }
 0xa4f   : > { %v2072_v36 = vadd.f32 %v2068_v35, %v1015_v46  ;;  %v2051_v29 = vadd.f32 %v2050_v13, %v2028_v61 }
 0xa51   : > { %2078 = vst.msk [vmem:[%s934_s2 + $0x8] sm:$0xff] %vm1061_vm0, %v2072_v36  ;;  %v2057_v19 = vadd.f32 %v2051_v29, %v2943_v15 }
 0xa53   : > { %v2065_v37 = vadd.f32 %v2430_v27, %v2057_v19 }
 0xa55   : > { %v2069_v39 = vmax.f32 %v2065_v37, 0.0 }
 0xa56   : > { %v2030_v44 = vpop.f32.mrf.mxu2 }
 0xa57   : > { %v2073_v40 = vadd.f32 %v2069_v39, %v1016_v2  ;;  %v2053_v7 = vadd.f32 %v2052_v38, %v2030_v44 }
 0xa59   : > { %2079 = vst.msk [vmem:[%s934_s2 + $0x10] sm:$0xff] %vm1061_vm0, %v2073_v40  ;;  %v2058_v43 = vadd.f32 %v2053_v7, %v2945_v34 }
 0xa5b   : > { %v2066_v47 = vadd.f32 %v2430_v27, %v2058_v43 }
 0xa5d   : > { %v2070_v45 = vmax.f32 %v2066_v47, 0.0 }
 0xa5f   : > { %v2074_v46 = vadd.f32 %v2070_v45, %v1017_v3 }
 0xa61   : > { %2080 = vst.msk [vmem:[%s934_s2 + $0x18] sm:$0xff] %vm1061_vm0, %v2074_v46 }
 0xa62 PF: > { %s3164_s0 = sld [smem:[#allocation2_spill]] }
 0xa68   : > { %s39_s8 = sadd.s32 1, %s3164_s0  }
 0xa69   : > { %p36_p4 = scmp.ge.s32.totalorder %s39_s8, 4  }
 0xa6b   :  { %38 = sbr.rel (!%p36_p4) target bundleno = 16 (0x10), region = 190 }

</bundles_post_ra>
